<compile_context>
chip_gen: v5e
topology: v5e:2x2
jax: 0.10.0
libtpu: 0.0.40
codegen_flags: <defaults>
</compile_context>

<pallas_src>
import math
import functools

import jax
import jax.numpy as jnp
from jax.experimental import pallas as pl
from jax.experimental.pallas import tpu as pltpu

# --- small-but-consistent model config (PyTorch file used 512/8/6/5000/2048) ---
# TODO(synk): scaled-down config; faithful-size port would revisit tiling.
D_MODEL = 128
NHEAD = 4
NUM_LAYERS = 2
VOCAB_SIZE = 512
DIM_FF = 256
D_K = D_MODEL // NHEAD
LN_EPS = 1e-5                 # PyTorch nn.LayerNorm default
DOT_DTYPE = jnp.bfloat16      # matmul weight / dot-input dtype

BATCH = 2
SEQ = 8

_WEIGHTS_PER_LAYER = 12       # wqkv,bqkv,wo,bo,g1,be1,w1,b1,w2,b2,g2,be2


# ---------------------------------------------------------------------------
# Fused whole-model kernel
# ---------------------------------------------------------------------------
def _fused_forward_kernel(ids_ref, emb_ref, *refs,
                          nhead, d_k, num_layers, n_batch, seq):
    """Embedding gather + all transformer layers + vocab projection."""
    npl = _WEIGHTS_PER_LAYER
    w_out_ref = refs[num_layers * npl + 0]
    b_out_ref = refs[num_layers * npl + 1]
    o_ref = refs[num_layers * npl + 2]
    x_scr = refs[num_layers * npl + 3]

    rows = n_batch * seq
    d = nhead * d_k

    # ---- in-kernel embedding gather (sqrt(d_model) pre-folded into table) ----
    for i in range(rows):
        tok = ids_ref[i]
        x_scr[pl.ds(i, 1), :] = emb_ref[pl.ds(tok, 1), :]
    x = x_scr[...]                                               # (rows, D) f32

    # ---- transformer layers; every weight is VMEM-resident -------------------
    for li in range(num_layers):
        (wqkv, bqkv, wo, bo, g1, be1,
         w1, b1, w2, b2, g2, be2) = refs[li * npl:(li + 1) * npl]

        # fused Q/K/V projection: one (rows,D)·(D,3D) matmul (scale folded in Q)
        qkv = jnp.dot(x.astype(DOT_DTYPE), wqkv[...],
                      preferred_element_type=jnp.float32) + bqkv[...]  # (rows,3D)

        wo_full = wo[...]                                        # (D, D) bf16
        attn_parts = []
        for b in range(n_batch):
            r0 = b * seq
            acc = jnp.zeros((seq, d), jnp.float32)
            for h in range(nhead):
                c0 = h * d_k
                q = qkv[r0:r0 + seq, c0:c0 + d_k]                # (S, d_k)
                k = qkv[r0:r0 + seq, d + c0:d + c0 + d_k]
                v = qkv[r0:r0 + seq, 2 * d + c0:2 * d + c0 + d_k]
                s = jnp.dot(q, k.T, preferred_element_type=jnp.float32)
                s = s - jnp.max(s, axis=-1, keepdims=True)
                p = jnp.exp(s)
                p = p * pl.reciprocal(jnp.sum(p, axis=-1, keepdims=True),
                                      approx=True)
                head = jnp.dot(p, v, preferred_element_type=jnp.float32)
                # accumulate output projection per head (no lane concat)
                acc = acc + jnp.dot(head.astype(DOT_DTYPE),
                                    wo_full[c0:c0 + d_k, :],
                                    preferred_element_type=jnp.float32)
            attn_parts.append(acc)
        attn = jnp.concatenate(attn_parts, axis=0) + bo[...]     # (rows, D)

        # residual + LayerNorm 1 (f32)
        y = x + attn
        mu = jnp.mean(y, axis=-1, keepdims=True)
        var = jnp.mean((y - mu) ** 2, axis=-1, keepdims=True)
        y = (y - mu) * jax.lax.rsqrt(var + LN_EPS)
        y = y * g1[...] + be1[...]

        # feed-forward: linear -> ReLU -> linear
        h1 = jnp.dot(y.astype(DOT_DTYPE), w1[...],
                     preferred_element_type=jnp.float32) + b1[...]
        h1 = jnp.maximum(h1, 0.0)
        ff = jnp.dot(h1.astype(DOT_DTYPE), w2[...],
                     preferred_element_type=jnp.float32) + b2[...]

        # residual + LayerNorm 2 (f32)
        z = y + ff
        mu2 = jnp.mean(z, axis=-1, keepdims=True)
        var2 = jnp.mean((z - mu2) ** 2, axis=-1, keepdims=True)
        z = (z - mu2) * jax.lax.rsqrt(var2 + LN_EPS)
        x = z * g2[...] + be2[...]

    # ---- final vocab projection (lane-dense output, V multiple of 128) -------
    logits = jnp.dot(x.astype(DOT_DTYPE), w_out_ref[...],
                     preferred_element_type=jnp.float32) + b_out_ref[...]
    o_ref[...] = logits.astype(o_ref.dtype)


# ---------------------------------------------------------------------------
# Wrapper: one pallas_call for the whole forward
# ---------------------------------------------------------------------------
def simple_transformer_forward(src, params):
    """src: int32 [B, S] token ids -> logits [B, S, VOCAB_SIZE]."""
    B, S = src.shape
    rows = B * S
    ids = src.reshape(rows).astype(jnp.int32)

    inputs = []
    in_specs = []

    def add(arr):
        inputs.append(arr)
        in_specs.append(pl.BlockSpec(arr.shape, lambda i, ids_ref: (0, 0)))

    add(params["emb"])                                            # (V, D) f32
    for p in params["layers"]:
        for name in ("wqkv", "bqkv", "wo", "bo", "g_ln1", "beta_ln1",
                     "w1", "b1", "w2", "b2", "g_ln2", "beta_ln2"):
            add(p[name])
    add(params["w_out"])
    add(params["b_out"])

    kernel = functools.partial(_fused_forward_kernel,
                               nhead=NHEAD, d_k=D_K, num_layers=NUM_LAYERS,
                               n_batch=B, seq=S)

    logits2d = pl.pallas_call(
        kernel,
        out_shape=jax.ShapeDtypeStruct((rows, VOCAB_SIZE), jnp.float32),
        grid_spec=pltpu.PrefetchScalarGridSpec(
            num_scalar_prefetch=1,                 # token ids -> SMEM
            grid=(1,),
            in_specs=in_specs,
            out_specs=pl.BlockSpec((rows, VOCAB_SIZE),
                                   lambda i, ids_ref: (0, 0)),
            scratch_shapes=[pltpu.VMEM((rows, D_MODEL), jnp.float32)]),
        compiler_params=pltpu.CompilerParams(
            dimension_semantics=("arbitrary",)),
    )(ids, *inputs)
    return logits2d.reshape(B, S, VOCAB_SIZE)


# ---------------------------------------------------------------------------
# Parameter construction (PyTorch-default inits, constants folded in)
# ---------------------------------------------------------------------------
def _linear_params(key, fan_in, fan_out):
    """nn.Linear default init U(-1/sqrt(fan_in), 1/sqrt(fan_in)); W stored (in,out)."""
    kw, kb = jax.random.split(key)
    bound = 1.0 / math.sqrt(fan_in)
    w = jax.random.uniform(kw, (fan_in, fan_out), jnp.float32, -bound, bound)
    b = jax.random.uniform(kb, (1, fan_out), jnp.float32, -bound, bound)
    return w, b


def init_params(key):
    keys = jax.random.split(key, 2 + NUM_LAYERS)
    params = {}
    emb = jax.random.normal(keys[0], (VOCAB_SIZE, D_MODEL), jnp.float32)
    params["emb"] = emb * math.sqrt(D_MODEL)          # fold sqrt(d_model)

    w_out, b_out = _linear_params(keys[1], D_MODEL, VOCAB_SIZE)
    params["w_out"] = w_out.astype(DOT_DTYPE)
    params["b_out"] = b_out                           # bias stays f32

    attn_scale = 1.0 / math.sqrt(D_K)
    layers = []
    for li in range(NUM_LAYERS):
        lk = jax.random.split(keys[2 + li], 6)
        p = {}
        wq, bq = _linear_params(lk[0], D_MODEL, D_MODEL)
        wk, bk = _linear_params(lk[1], D_MODEL, D_MODEL)
        wv, bv = _linear_params(lk[2], D_MODEL, D_MODEL)
        wq = wq * attn_scale                          # fold 1/sqrt(d_k) into Q
        bq = bq * attn_scale
        p["wqkv"] = jnp.concatenate([wq, wk, wv], axis=1).astype(DOT_DTYPE)
        p["bqkv"] = jnp.concatenate([bq, bk, bv], axis=1)           # f32
        wo, bo = _linear_params(lk[3], D_MODEL, D_MODEL)
        p["wo"], p["bo"] = wo.astype(DOT_DTYPE), bo
        w1, b1 = _linear_params(lk[4], D_MODEL, DIM_FF)
        p["w1"], p["b1"] = w1.astype(DOT_DTYPE), b1
        w2, b2 = _linear_params(lk[5], DIM_FF, D_MODEL)
        p["w2"], p["b2"] = w2.astype(DOT_DTYPE), b2
        p["g_ln1"] = jnp.ones((1, D_MODEL), jnp.float32)
        p["beta_ln1"] = jnp.zeros((1, D_MODEL), jnp.float32)
        p["g_ln2"] = jnp.ones((1, D_MODEL), jnp.float32)
        p["beta_ln2"] = jnp.zeros((1, D_MODEL), jnp.float32)
        layers.append(p)
    params["layers"] = layers
    return params


if __name__ == "__main__":
    key = jax.random.PRNGKey(0)
    k_params, k_src = jax.random.split(key)
    params = init_params(k_params)
    src = jax.random.randint(k_src, (BATCH, SEQ), 0, VOCAB_SIZE, dtype=jnp.int32)

    logits = jax.jit(simple_transformer_forward)(src, params)
    jax.block_until_ready(logits)

    assert logits.shape == (BATCH, SEQ, VOCAB_SIZE)
    assert logits.dtype == jnp.float32
    assert bool(jnp.all(jnp.isfinite(logits)))
    print("KERNEL_OK")
</pallas_src>

<mosaic_0001>
module attributes {stable_mosaic.version = 11 : i64} {
  func.func @_fused_forward_kernel(%arg0: i32, %arg1: memref<16xi32, #tpu.memory_space<smem>>, %arg2: memref<512x128xf32, #tpu.memory_space<vmem>>, %arg3: memref<128x384xbf16, #tpu.memory_space<vmem>>, %arg4: memref<1x384xf32, #tpu.memory_space<vmem>>, %arg5: memref<128x128xbf16, #tpu.memory_space<vmem>>, %arg6: memref<1x128xf32, #tpu.memory_space<vmem>>, %arg7: memref<1x128xf32, #tpu.memory_space<vmem>>, %arg8: memref<1x128xf32, #tpu.memory_space<vmem>>, %arg9: memref<128x256xbf16, #tpu.memory_space<vmem>>, %arg10: memref<1x256xf32, #tpu.memory_space<vmem>>, %arg11: memref<256x128xbf16, #tpu.memory_space<vmem>>, %arg12: memref<1x128xf32, #tpu.memory_space<vmem>>, %arg13: memref<1x128xf32, #tpu.memory_space<vmem>>, %arg14: memref<1x128xf32, #tpu.memory_space<vmem>>, %arg15: memref<128x384xbf16, #tpu.memory_space<vmem>>, %arg16: memref<1x384xf32, #tpu.memory_space<vmem>>, %arg17: memref<128x128xbf16, #tpu.memory_space<vmem>>, %arg18: memref<1x128xf32, #tpu.memory_space<vmem>>, %arg19: memref<1x128xf32, #tpu.memory_space<vmem>>, %arg20: memref<1x128xf32, #tpu.memory_space<vmem>>, %arg21: memref<128x256xbf16, #tpu.memory_space<vmem>>, %arg22: memref<1x256xf32, #tpu.memory_space<vmem>>, %arg23: memref<256x128xbf16, #tpu.memory_space<vmem>>, %arg24: memref<1x128xf32, #tpu.memory_space<vmem>>, %arg25: memref<1x128xf32, #tpu.memory_space<vmem>>, %arg26: memref<1x128xf32, #tpu.memory_space<vmem>>, %arg27: memref<128x512xbf16, #tpu.memory_space<vmem>>, %arg28: memref<1x512xf32, #tpu.memory_space<vmem>>, %arg29: memref<16x512xf32, #tpu.memory_space<vmem>>, %arg30: memref<16x128xf32, #tpu.memory_space<vmem>>) attributes {dimension_semantics = [#tpu.dimension_semantics<arbitrary>], iteration_bounds = array<i64: 1>, scalar_prefetch = 1 : i64, scratch_operands = 1 : i64, tpu.core_type = #tpu.core_type<tc>, window_params = [{pipeline_mode = #tpu.pipeline_mode<synchronous>, transform_indices = @transform_0, window_bounds = array<i64: 512, 128>}, {pipeline_mode = #tpu.pipeline_mode<synchronous>, transform_indices = @transform_1, window_bounds = array<i64: 128, 384>}, {pipeline_mode = #tpu.pipeline_mode<synchronous>, transform_indices = @transform_2, window_bounds = array<i64: 1, 384>}, {pipeline_mode = #tpu.pipeline_mode<synchronous>, transform_indices = @transform_3, window_bounds = array<i64: 128, 128>}, {pipeline_mode = #tpu.pipeline_mode<synchronous>, transform_indices = @transform_4, window_bounds = array<i64: 1, 128>}, {pipeline_mode = #tpu.pipeline_mode<synchronous>, transform_indices = @transform_5, window_bounds = array<i64: 1, 128>}, {pipeline_mode = #tpu.pipeline_mode<synchronous>, transform_indices = @transform_6, window_bounds = array<i64: 1, 128>}, {pipeline_mode = #tpu.pipeline_mode<synchronous>, transform_indices = @transform_7, window_bounds = array<i64: 128, 256>}, {pipeline_mode = #tpu.pipeline_mode<synchronous>, transform_indices = @transform_8, window_bounds = array<i64: 1, 256>}, {pipeline_mode = #tpu.pipeline_mode<synchronous>, transform_indices = @transform_9, window_bounds = array<i64: 256, 128>}, {pipeline_mode = #tpu.pipeline_mode<synchronous>, transform_indices = @transform_10, window_bounds = array<i64: 1, 128>}, {pipeline_mode = #tpu.pipeline_mode<synchronous>, transform_indices = @transform_11, window_bounds = array<i64: 1, 128>}, {pipeline_mode = #tpu.pipeline_mode<synchronous>, transform_indices = @transform_12, window_bounds = array<i64: 1, 128>}, {pipeline_mode = #tpu.pipeline_mode<synchronous>, transform_indices = @transform_13, window_bounds = array<i64: 128, 384>}, {pipeline_mode = #tpu.pipeline_mode<synchronous>, transform_indices = @transform_14, window_bounds = array<i64: 1, 384>}, {pipeline_mode = #tpu.pipeline_mode<synchronous>, transform_indices = @transform_15, window_bounds = array<i64: 128, 128>}, {pipeline_mode = #tpu.pipeline_mode<synchronous>, transform_indices = @transform_16, window_bounds = array<i64: 1, 128>}, {pipeline_mode = #tpu.pipeline_mode<synchronous>, transform_indices = @transform_17, window_bounds = array<i64: 1, 128>}, {pipeline_mode = #tpu.pipeline_mode<synchronous>, transform_indices = @transform_18, window_bounds = array<i64: 1, 128>}, {pipeline_mode = #tpu.pipeline_mode<synchronous>, transform_indices = @transform_19, window_bounds = array<i64: 128, 256>}, {pipeline_mode = #tpu.pipeline_mode<synchronous>, transform_indices = @transform_20, window_bounds = array<i64: 1, 256>}, {pipeline_mode = #tpu.pipeline_mode<synchronous>, transform_indices = @transform_21, window_bounds = array<i64: 256, 128>}, {pipeline_mode = #tpu.pipeline_mode<synchronous>, transform_indices = @transform_22, window_bounds = array<i64: 1, 128>}, {pipeline_mode = #tpu.pipeline_mode<synchronous>, transform_indices = @transform_23, window_bounds = array<i64: 1, 128>}, {pipeline_mode = #tpu.pipeline_mode<synchronous>, transform_indices = @transform_24, window_bounds = array<i64: 1, 128>}, {pipeline_mode = #tpu.pipeline_mode<synchronous>, transform_indices = @transform_25, window_bounds = array<i64: 128, 512>}, {pipeline_mode = #tpu.pipeline_mode<synchronous>, transform_indices = @transform_26, window_bounds = array<i64: 1, 512>}, {pipeline_mode = #tpu.pipeline_mode<synchronous>, transform_indices = @transform_27, window_bounds = array<i64: 16, 512>}]} {
    %c0 = arith.constant 0 : index
    %0 = memref.load %arg1[%c0] : memref<16xi32, #tpu.memory_space<smem>>
    %1 = arith.index_cast %0 : i32 to index
    %c0_0 = arith.constant 0 : index
    %2 = vector.load %arg2[%1, %c0_0] : memref<512x128xf32, #tpu.memory_space<vmem>>, vector<1x128xf32>
    %c0_1 = arith.constant 0 : index
    %c0_2 = arith.constant 0 : index
    %3 = vector.load %arg30[%c0_1, %c0_2] : memref<16x128xf32, #tpu.memory_space<vmem>>, vector<1x128xf32>
    tpu.vector_store %arg30[%c0_1, %c0_2], %2 {strides = array<i32>} : memref<16x128xf32, #tpu.memory_space<vmem>>, vector<1x128xf32>,
    %c1 = arith.constant 1 : index
    %4 = memref.load %arg1[%c1] : memref<16xi32, #tpu.memory_space<smem>>
    %5 = arith.index_cast %4 : i32 to index
    %c0_3 = arith.constant 0 : index
    %6 = vector.load %arg2[%5, %c0_3] : memref<512x128xf32, #tpu.memory_space<vmem>>, vector<1x128xf32>
    %c1_4 = arith.constant 1 : index
    %c0_5 = arith.constant 0 : index
    %7 = vector.load %arg30[%c1_4, %c0_5] : memref<16x128xf32, #tpu.memory_space<vmem>>, vector<1x128xf32>
    tpu.vector_store %arg30[%c1_4, %c0_5], %6 {strides = array<i32>} : memref<16x128xf32, #tpu.memory_space<vmem>>, vector<1x128xf32>,
    %c2 = arith.constant 2 : index
    %8 = memref.load %arg1[%c2] : memref<16xi32, #tpu.memory_space<smem>>
    %9 = arith.index_cast %8 : i32 to index
    %c0_6 = arith.constant 0 : index
    %10 = vector.load %arg2[%9, %c0_6] : memref<512x128xf32, #tpu.memory_space<vmem>>, vector<1x128xf32>
    %c2_7 = arith.constant 2 : index
    %c0_8 = arith.constant 0 : index
    %11 = vector.load %arg30[%c2_7, %c0_8] : memref<16x128xf32, #tpu.memory_space<vmem>>, vector<1x128xf32>
    tpu.vector_store %arg30[%c2_7, %c0_8], %10 {strides = array<i32>} : memref<16x128xf32, #tpu.memory_space<vmem>>, vector<1x128xf32>,
    %c3 = arith.constant 3 : index
    %12 = memref.load %arg1[%c3] : memref<16xi32, #tpu.memory_space<smem>>
    %13 = arith.index_cast %12 : i32 to index
    %c0_9 = arith.constant 0 : index
    %14 = vector.load %arg2[%13, %c0_9] : memref<512x128xf32, #tpu.memory_space<vmem>>, vector<1x128xf32>
    %c3_10 = arith.constant 3 : index
    %c0_11 = arith.constant 0 : index
    %15 = vector.load %arg30[%c3_10, %c0_11] : memref<16x128xf32, #tpu.memory_space<vmem>>, vector<1x128xf32>
    tpu.vector_store %arg30[%c3_10, %c0_11], %14 {strides = array<i32>} : memref<16x128xf32, #tpu.memory_space<vmem>>, vector<1x128xf32>,
    %c4 = arith.constant 4 : index
    %16 = memref.load %arg1[%c4] : memref<16xi32, #tpu.memory_space<smem>>
    %17 = arith.index_cast %16 : i32 to index
    %c0_12 = arith.constant 0 : index
    %18 = vector.load %arg2[%17, %c0_12] : memref<512x128xf32, #tpu.memory_space<vmem>>, vector<1x128xf32>
    %c4_13 = arith.constant 4 : index
    %c0_14 = arith.constant 0 : index
    %19 = vector.load %arg30[%c4_13, %c0_14] : memref<16x128xf32, #tpu.memory_space<vmem>>, vector<1x128xf32>
    tpu.vector_store %arg30[%c4_13, %c0_14], %18 {strides = array<i32>} : memref<16x128xf32, #tpu.memory_space<vmem>>, vector<1x128xf32>,
    %c5 = arith.constant 5 : index
    %20 = memref.load %arg1[%c5] : memref<16xi32, #tpu.memory_space<smem>>
    %21 = arith.index_cast %20 : i32 to index
    %c0_15 = arith.constant 0 : index
    %22 = vector.load %arg2[%21, %c0_15] : memref<512x128xf32, #tpu.memory_space<vmem>>, vector<1x128xf32>
    %c5_16 = arith.constant 5 : index
    %c0_17 = arith.constant 0 : index
    %23 = vector.load %arg30[%c5_16, %c0_17] : memref<16x128xf32, #tpu.memory_space<vmem>>, vector<1x128xf32>
    tpu.vector_store %arg30[%c5_16, %c0_17], %22 {strides = array<i32>} : memref<16x128xf32, #tpu.memory_space<vmem>>, vector<1x128xf32>,
    %c6 = arith.constant 6 : index
    %24 = memref.load %arg1[%c6] : memref<16xi32, #tpu.memory_space<smem>>
    %25 = arith.index_cast %24 : i32 to index
    %c0_18 = arith.constant 0 : index
    %26 = vector.load %arg2[%25, %c0_18] : memref<512x128xf32, #tpu.memory_space<vmem>>, vector<1x128xf32>
    %c6_19 = arith.constant 6 : index
    %c0_20 = arith.constant 0 : index
    %27 = vector.load %arg30[%c6_19, %c0_20] : memref<16x128xf32, #tpu.memory_space<vmem>>, vector<1x128xf32>
    tpu.vector_store %arg30[%c6_19, %c0_20], %26 {strides = array<i32>} : memref<16x128xf32, #tpu.memory_space<vmem>>, vector<1x128xf32>,
    %c7 = arith.constant 7 : index
    %28 = memref.load %arg1[%c7] : memref<16xi32, #tpu.memory_space<smem>>
    %29 = arith.index_cast %28 : i32 to index
    %c0_21 = arith.constant 0 : index
    %30 = vector.load %arg2[%29, %c0_21] : memref<512x128xf32, #tpu.memory_space<vmem>>, vector<1x128xf32>
    %c7_22 = arith.constant 7 : index
    %c0_23 = arith.constant 0 : index
    %31 = vector.load %arg30[%c7_22, %c0_23] : memref<16x128xf32, #tpu.memory_space<vmem>>, vector<1x128xf32>
    tpu.vector_store %arg30[%c7_22, %c0_23], %30 {strides = array<i32>} : memref<16x128xf32, #tpu.memory_space<vmem>>, vector<1x128xf32>,
    %c8 = arith.constant 8 : index
    %32 = memref.load %arg1[%c8] : memref<16xi32, #tpu.memory_space<smem>>
    %33 = arith.index_cast %32 : i32 to index
    %c0_24 = arith.constant 0 : index
    %34 = vector.load %arg2[%33, %c0_24] : memref<512x128xf32, #tpu.memory_space<vmem>>, vector<1x128xf32>
    %c8_25 = arith.constant 8 : index
    %c0_26 = arith.constant 0 : index
    %35 = vector.load %arg30[%c8_25, %c0_26] : memref<16x128xf32, #tpu.memory_space<vmem>>, vector<1x128xf32>
    tpu.vector_store %arg30[%c8_25, %c0_26], %34 {strides = array<i32>} : memref<16x128xf32, #tpu.memory_space<vmem>>, vector<1x128xf32>,
    %c9 = arith.constant 9 : index
    %36 = memref.load %arg1[%c9] : memref<16xi32, #tpu.memory_space<smem>>
    %37 = arith.index_cast %36 : i32 to index
    %c0_27 = arith.constant 0 : index
    %38 = vector.load %arg2[%37, %c0_27] : memref<512x128xf32, #tpu.memory_space<vmem>>, vector<1x128xf32>
    %c9_28 = arith.constant 9 : index
    %c0_29 = arith.constant 0 : index
    %39 = vector.load %arg30[%c9_28, %c0_29] : memref<16x128xf32, #tpu.memory_space<vmem>>, vector<1x128xf32>
    tpu.vector_store %arg30[%c9_28, %c0_29], %38 {strides = array<i32>} : memref<16x128xf32, #tpu.memory_space<vmem>>, vector<1x128xf32>,
    %c10 = arith.constant 10 : index
    %40 = memref.load %arg1[%c10] : memref<16xi32, #tpu.memory_space<smem>>
    %41 = arith.index_cast %40 : i32 to index
    %c0_30 = arith.constant 0 : index
    %42 = vector.load %arg2[%41, %c0_30] : memref<512x128xf32, #tpu.memory_space<vmem>>, vector<1x128xf32>
    %c10_31 = arith.constant 10 : index
    %c0_32 = arith.constant 0 : index
    %43 = vector.load %arg30[%c10_31, %c0_32] : memref<16x128xf32, #tpu.memory_space<vmem>>, vector<1x128xf32>
    tpu.vector_store %arg30[%c10_31, %c0_32], %42 {strides = array<i32>} : memref<16x128xf32, #tpu.memory_space<vmem>>, vector<1x128xf32>,
    %c11 = arith.constant 11 : index
    %44 = memref.load %arg1[%c11] : memref<16xi32, #tpu.memory_space<smem>>
    %45 = arith.index_cast %44 : i32 to index
    %c0_33 = arith.constant 0 : index
    %46 = vector.load %arg2[%45, %c0_33] : memref<512x128xf32, #tpu.memory_space<vmem>>, vector<1x128xf32>
    %c11_34 = arith.constant 11 : index
    %c0_35 = arith.constant 0 : index
    %47 = vector.load %arg30[%c11_34, %c0_35] : memref<16x128xf32, #tpu.memory_space<vmem>>, vector<1x128xf32>
    tpu.vector_store %arg30[%c11_34, %c0_35], %46 {strides = array<i32>} : memref<16x128xf32, #tpu.memory_space<vmem>>, vector<1x128xf32>,
    %c12 = arith.constant 12 : index
    %48 = memref.load %arg1[%c12] : memref<16xi32, #tpu.memory_space<smem>>
    %49 = arith.index_cast %48 : i32 to index
    %c0_36 = arith.constant 0 : index
    %50 = vector.load %arg2[%49, %c0_36] : memref<512x128xf32, #tpu.memory_space<vmem>>, vector<1x128xf32>
    %c12_37 = arith.constant 12 : index
    %c0_38 = arith.constant 0 : index
    %51 = vector.load %arg30[%c12_37, %c0_38] : memref<16x128xf32, #tpu.memory_space<vmem>>, vector<1x128xf32>
    tpu.vector_store %arg30[%c12_37, %c0_38], %50 {strides = array<i32>} : memref<16x128xf32, #tpu.memory_space<vmem>>, vector<1x128xf32>,
    %c13 = arith.constant 13 : index
    %52 = memref.load %arg1[%c13] : memref<16xi32, #tpu.memory_space<smem>>
    %53 = arith.index_cast %52 : i32 to index
    %c0_39 = arith.constant 0 : index
    %54 = vector.load %arg2[%53, %c0_39] : memref<512x128xf32, #tpu.memory_space<vmem>>, vector<1x128xf32>
    %c13_40 = arith.constant 13 : index
    %c0_41 = arith.constant 0 : index
    %55 = vector.load %arg30[%c13_40, %c0_41] : memref<16x128xf32, #tpu.memory_space<vmem>>, vector<1x128xf32>
    tpu.vector_store %arg30[%c13_40, %c0_41], %54 {strides = array<i32>} : memref<16x128xf32, #tpu.memory_space<vmem>>, vector<1x128xf32>,
    %c14 = arith.constant 14 : index
    %56 = memref.load %arg1[%c14] : memref<16xi32, #tpu.memory_space<smem>>
    %57 = arith.index_cast %56 : i32 to index
    %c0_42 = arith.constant 0 : index
    %58 = vector.load %arg2[%57, %c0_42] : memref<512x128xf32, #tpu.memory_space<vmem>>, vector<1x128xf32>
    %c14_43 = arith.constant 14 : index
    %c0_44 = arith.constant 0 : index
    %59 = vector.load %arg30[%c14_43, %c0_44] : memref<16x128xf32, #tpu.memory_space<vmem>>, vector<1x128xf32>
    tpu.vector_store %arg30[%c14_43, %c0_44], %58 {strides = array<i32>} : memref<16x128xf32, #tpu.memory_space<vmem>>, vector<1x128xf32>,
    %c15 = arith.constant 15 : index
    %60 = memref.load %arg1[%c15] : memref<16xi32, #tpu.memory_space<smem>>
    %61 = arith.index_cast %60 : i32 to index
    %c0_45 = arith.constant 0 : index
    %62 = vector.load %arg2[%61, %c0_45] : memref<512x128xf32, #tpu.memory_space<vmem>>, vector<1x128xf32>
    %c15_46 = arith.constant 15 : index
    %c0_47 = arith.constant 0 : index
    %63 = vector.load %arg30[%c15_46, %c0_47] : memref<16x128xf32, #tpu.memory_space<vmem>>, vector<1x128xf32>
    tpu.vector_store %arg30[%c15_46, %c0_47], %62 {strides = array<i32>} : memref<16x128xf32, #tpu.memory_space<vmem>>, vector<1x128xf32>,
    %c0_48 = arith.constant 0 : index
    %c0_49 = arith.constant 0 : index
    %64 = vector.load %arg30[%c0_48, %c0_49] : memref<16x128xf32, #tpu.memory_space<vmem>>, vector<16x128xf32>
    %65 = arith.truncf %64 : vector<16x128xf32> to vector<16x128xbf16>
    %c0_50 = arith.constant 0 : index
    %c0_51 = arith.constant 0 : index
    %66 = vector.load %arg3[%c0_50, %c0_51] : memref<128x384xbf16, #tpu.memory_space<vmem>>, vector<128x384xbf16>
    %cst = arith.constant dense<0.000000e+00> : vector<16x384xf32>
    %67 = tpu.matmul %65, %66, %cst {dimension_numbers = #tpu.dot_dimension_numbers<[1], [0], [0], [1], [0, 0, 1, 1], [], []>} : vector<16x128xbf16>, vector<128x384xbf16>, vector<16x384xf32> -> vector<16x384xf32>
    %c0_52 = arith.constant 0 : index
    %c0_53 = arith.constant 0 : index
    %68 = vector.load %arg4[%c0_52, %c0_53] : memref<1x384xf32, #tpu.memory_space<vmem>>, vector<1x384xf32>
    %69 = vector.broadcast %68 : vector<1x384xf32> to vector<16x384xf32>
    %70 = arith.addf %67, %69 : vector<16x384xf32>
    %c0_54 = arith.constant 0 : index
    %c0_55 = arith.constant 0 : index
    %71 = vector.load %arg5[%c0_54, %c0_55] : memref<128x128xbf16, #tpu.memory_space<vmem>>, vector<128x128xbf16>
    %cst_56 = arith.constant 0.000000e+00 : f32
    %72 = vector.broadcast %cst_56 : f32 to vector<8x128xf32>
    %73 = vector.extract_strided_slice %70 {offsets = [0, 0], sizes = [8, 32], strides = [1, 1]} : vector<16x384xf32> to vector<8x32xf32>
    %74 = vector.extract_strided_slice %70 {offsets = [0, 128], sizes = [8, 32], strides = [1, 1]} : vector<16x384xf32> to vector<8x32xf32>
    %75 = vector.extract_strided_slice %70 {offsets = [0, 256], sizes = [8, 32], strides = [1, 1]} : vector<16x384xf32> to vector<8x32xf32>
    %76 = tpu.transpose %74, [1, 0] : vector<8x32xf32> -> vector<32x8xf32>
    %cst_57 = arith.constant dense<0.000000e+00> : vector<8x8xf32>
    %77 = tpu.matmul %73, %76, %cst_57 {dimension_numbers = #tpu.dot_dimension_numbers<[1], [0], [0], [1], [0, 0, 1, 1], [], []>} : vector<8x32xf32>, vector<32x8xf32>, vector<8x8xf32> -> vector<8x8xf32>
    %cst_58 = arith.constant dense<0xFF800000> : vector<8xf32>
    %78 = vector.multi_reduction <maximumf>, %77, %cst_58 [1] : vector<8x8xf32> to vector<8xf32>
    %79 = vector.shape_cast %78 : vector<8xf32> to vector<8x1xf32>
    %80 = vector.broadcast %79 : vector<8x1xf32> to vector<8x8xf32>
    %81 = arith.subf %77, %80 : vector<8x8xf32>
    %82 = math.exp %81 : vector<8x8xf32>
    %cst_59 = arith.constant dense<0.000000e+00> : vector<8xf32>
    %83 = vector.multi_reduction <add>, %82, %cst_59 [1] : vector<8x8xf32> to vector<8xf32>
    %84 = vector.shape_cast %83 : vector<8xf32> to vector<8x1xf32>
    %85 = tpu.reciprocal %84 {approx = true} : vector<8x1xf32> -> vector<8x1xf32>
    %86 = vector.broadcast %85 : vector<8x1xf32> to vector<8x8xf32>
    %87 = arith.mulf %82, %86 : vector<8x8xf32>
    %cst_60 = arith.constant dense<0.000000e+00> : vector<8x32xf32>
    %88 = tpu.matmul %87, %75, %cst_60 {dimension_numbers = #tpu.dot_dimension_numbers<[1], [0], [0], [1], [0, 0, 1, 1], [], []>} : vector<8x8xf32>, vector<8x32xf32>, vector<8x32xf32> -> vector<8x32xf32>
    %89 = arith.truncf %88 : vector<8x32xf32> to vector<8x32xbf16>
    %90 = vector.extract_strided_slice %71 {offsets = [0, 0], sizes = [32, 128], strides = [1, 1]} : vector<128x128xbf16> to vector<32x128xbf16>
    %cst_61 = arith.constant dense<0.000000e+00> : vector<8x128xf32>
    %91 = tpu.matmul %89, %90, %cst_61 {dimension_numbers = #tpu.dot_dimension_numbers<[1], [0], [0], [1], [0, 0, 1, 1], [], []>} : vector<8x32xbf16>, vector<32x128xbf16>, vector<8x128xf32> -> vector<8x128xf32>
    %92 = arith.addf %72, %91 : vector<8x128xf32>
    %93 = vector.extract_strided_slice %70 {offsets = [0, 32], sizes = [8, 32], strides = [1, 1]} : vector<16x384xf32> to vector<8x32xf32>
    %94 = vector.extract_strided_slice %70 {offsets = [0, 160], sizes = [8, 32], strides = [1, 1]} : vector<16x384xf32> to vector<8x32xf32>
    %95 = vector.extract_strided_slice %70 {offsets = [0, 288], sizes = [8, 32], strides = [1, 1]} : vector<16x384xf32> to vector<8x32xf32>
    %96 = tpu.transpose %94, [1, 0] : vector<8x32xf32> -> vector<32x8xf32>
    %cst_62 = arith.constant dense<0.000000e+00> : vector<8x8xf32>
    %97 = tpu.matmul %93, %96, %cst_62 {dimension_numbers = #tpu.dot_dimension_numbers<[1], [0], [0], [1], [0, 0, 1, 1], [], []>} : vector<8x32xf32>, vector<32x8xf32>, vector<8x8xf32> -> vector<8x8xf32>
    %cst_63 = arith.constant dense<0xFF800000> : vector<8xf32>
    %98 = vector.multi_reduction <maximumf>, %97, %cst_63 [1] : vector<8x8xf32> to vector<8xf32>
    %99 = vector.shape_cast %98 : vector<8xf32> to vector<8x1xf32>
    %100 = vector.broadcast %99 : vector<8x1xf32> to vector<8x8xf32>
    %101 = arith.subf %97, %100 : vector<8x8xf32>
    %102 = math.exp %101 : vector<8x8xf32>
    %cst_64 = arith.constant dense<0.000000e+00> : vector<8xf32>
    %103 = vector.multi_reduction <add>, %102, %cst_64 [1] : vector<8x8xf32> to vector<8xf32>
    %104 = vector.shape_cast %103 : vector<8xf32> to vector<8x1xf32>
    %105 = tpu.reciprocal %104 {approx = true} : vector<8x1xf32> -> vector<8x1xf32>
    %106 = vector.broadcast %105 : vector<8x1xf32> to vector<8x8xf32>
    %107 = arith.mulf %102, %106 : vector<8x8xf32>
    %cst_65 = arith.constant dense<0.000000e+00> : vector<8x32xf32>
    %108 = tpu.matmul %107, %95, %cst_65 {dimension_numbers = #tpu.dot_dimension_numbers<[1], [0], [0], [1], [0, 0, 1, 1], [], []>} : vector<8x8xf32>, vector<8x32xf32>, vector<8x32xf32> -> vector<8x32xf32>
    %109 = arith.truncf %108 : vector<8x32xf32> to vector<8x32xbf16>
    %110 = vector.extract_strided_slice %71 {offsets = [32, 0], sizes = [32, 128], strides = [1, 1]} : vector<128x128xbf16> to vector<32x128xbf16>
    %cst_66 = arith.constant dense<0.000000e+00> : vector<8x128xf32>
    %111 = tpu.matmul %109, %110, %cst_66 {dimension_numbers = #tpu.dot_dimension_numbers<[1], [0], [0], [1], [0, 0, 1, 1], [], []>} : vector<8x32xbf16>, vector<32x128xbf16>, vector<8x128xf32> -> vector<8x128xf32>
    %112 = arith.addf %92, %111 : vector<8x128xf32>
    %113 = vector.extract_strided_slice %70 {offsets = [0, 64], sizes = [8, 32], strides = [1, 1]} : vector<16x384xf32> to vector<8x32xf32>
    %114 = vector.extract_strided_slice %70 {offsets = [0, 192], sizes = [8, 32], strides = [1, 1]} : vector<16x384xf32> to vector<8x32xf32>
    %115 = vector.extract_strided_slice %70 {offsets = [0, 320], sizes = [8, 32], strides = [1, 1]} : vector<16x384xf32> to vector<8x32xf32>
    %116 = tpu.transpose %114, [1, 0] : vector<8x32xf32> -> vector<32x8xf32>
    %cst_67 = arith.constant dense<0.000000e+00> : vector<8x8xf32>
    %117 = tpu.matmul %113, %116, %cst_67 {dimension_numbers = #tpu.dot_dimension_numbers<[1], [0], [0], [1], [0, 0, 1, 1], [], []>} : vector<8x32xf32>, vector<32x8xf32>, vector<8x8xf32> -> vector<8x8xf32>
    %cst_68 = arith.constant dense<0xFF800000> : vector<8xf32>
    %118 = vector.multi_reduction <maximumf>, %117, %cst_68 [1] : vector<8x8xf32> to vector<8xf32>
    %119 = vector.shape_cast %118 : vector<8xf32> to vector<8x1xf32>
    %120 = vector.broadcast %119 : vector<8x1xf32> to vector<8x8xf32>
    %121 = arith.subf %117, %120 : vector<8x8xf32>
    %122 = math.exp %121 : vector<8x8xf32>
    %cst_69 = arith.constant dense<0.000000e+00> : vector<8xf32>
    %123 = vector.multi_reduction <add>, %122, %cst_69 [1] : vector<8x8xf32> to vector<8xf32>
    %124 = vector.shape_cast %123 : vector<8xf32> to vector<8x1xf32>
    %125 = tpu.reciprocal %124 {approx = true} : vector<8x1xf32> -> vector<8x1xf32>
    %126 = vector.broadcast %125 : vector<8x1xf32> to vector<8x8xf32>
    %127 = arith.mulf %122, %126 : vector<8x8xf32>
    %cst_70 = arith.constant dense<0.000000e+00> : vector<8x32xf32>
    %128 = tpu.matmul %127, %115, %cst_70 {dimension_numbers = #tpu.dot_dimension_numbers<[1], [0], [0], [1], [0, 0, 1, 1], [], []>} : vector<8x8xf32>, vector<8x32xf32>, vector<8x32xf32> -> vector<8x32xf32>
    %129 = arith.truncf %128 : vector<8x32xf32> to vector<8x32xbf16>
    %130 = vector.extract_strided_slice %71 {offsets = [64, 0], sizes = [32, 128], strides = [1, 1]} : vector<128x128xbf16> to vector<32x128xbf16>
    %cst_71 = arith.constant dense<0.000000e+00> : vector<8x128xf32>
    %131 = tpu.matmul %129, %130, %cst_71 {dimension_numbers = #tpu.dot_dimension_numbers<[1], [0], [0], [1], [0, 0, 1, 1], [], []>} : vector<8x32xbf16>, vector<32x128xbf16>, vector<8x128xf32> -> vector<8x128xf32>
    %132 = arith.addf %112, %131 : vector<8x128xf32>
    %133 = vector.extract_strided_slice %70 {offsets = [0, 96], sizes = [8, 32], strides = [1, 1]} : vector<16x384xf32> to vector<8x32xf32>
    %134 = vector.extract_strided_slice %70 {offsets = [0, 224], sizes = [8, 32], strides = [1, 1]} : vector<16x384xf32> to vector<8x32xf32>
    %135 = vector.extract_strided_slice %70 {offsets = [0, 352], sizes = [8, 32], strides = [1, 1]} : vector<16x384xf32> to vector<8x32xf32>
    %136 = tpu.transpose %134, [1, 0] : vector<8x32xf32> -> vector<32x8xf32>
    %cst_72 = arith.constant dense<0.000000e+00> : vector<8x8xf32>
    %137 = tpu.matmul %133, %136, %cst_72 {dimension_numbers = #tpu.dot_dimension_numbers<[1], [0], [0], [1], [0, 0, 1, 1], [], []>} : vector<8x32xf32>, vector<32x8xf32>, vector<8x8xf32> -> vector<8x8xf32>
    %cst_73 = arith.constant dense<0xFF800000> : vector<8xf32>
    %138 = vector.multi_reduction <maximumf>, %137, %cst_73 [1] : vector<8x8xf32> to vector<8xf32>
    %139 = vector.shape_cast %138 : vector<8xf32> to vector<8x1xf32>
    %140 = vector.broadcast %139 : vector<8x1xf32> to vector<8x8xf32>
    %141 = arith.subf %137, %140 : vector<8x8xf32>
    %142 = math.exp %141 : vector<8x8xf32>
    %cst_74 = arith.constant dense<0.000000e+00> : vector<8xf32>
    %143 = vector.multi_reduction <add>, %142, %cst_74 [1] : vector<8x8xf32> to vector<8xf32>
    %144 = vector.shape_cast %143 : vector<8xf32> to vector<8x1xf32>
    %145 = tpu.reciprocal %144 {approx = true} : vector<8x1xf32> -> vector<8x1xf32>
    %146 = vector.broadcast %145 : vector<8x1xf32> to vector<8x8xf32>
    %147 = arith.mulf %142, %146 : vector<8x8xf32>
    %cst_75 = arith.constant dense<0.000000e+00> : vector<8x32xf32>
    %148 = tpu.matmul %147, %135, %cst_75 {dimension_numbers = #tpu.dot_dimension_numbers<[1], [0], [0], [1], [0, 0, 1, 1], [], []>} : vector<8x8xf32>, vector<8x32xf32>, vector<8x32xf32> -> vector<8x32xf32>
    %149 = arith.truncf %148 : vector<8x32xf32> to vector<8x32xbf16>
    %150 = vector.extract_strided_slice %71 {offsets = [96, 0], sizes = [32, 128], strides = [1, 1]} : vector<128x128xbf16> to vector<32x128xbf16>
    %cst_76 = arith.constant dense<0.000000e+00> : vector<8x128xf32>
    %151 = tpu.matmul %149, %150, %cst_76 {dimension_numbers = #tpu.dot_dimension_numbers<[1], [0], [0], [1], [0, 0, 1, 1], [], []>} : vector<8x32xbf16>, vector<32x128xbf16>, vector<8x128xf32> -> vector<8x128xf32>
    %152 = arith.addf %132, %151 : vector<8x128xf32>
    %cst_77 = arith.constant 0.000000e+00 : f32
    %153 = vector.broadcast %cst_77 : f32 to vector<8x128xf32>
    %154 = vector.extract_strided_slice %70 {offsets = [8, 0], sizes = [8, 32], strides = [1, 1]} : vector<16x384xf32> to vector<8x32xf32>
    %155 = vector.extract_strided_slice %70 {offsets = [8, 128], sizes = [8, 32], strides = [1, 1]} : vector<16x384xf32> to vector<8x32xf32>
    %156 = vector.extract_strided_slice %70 {offsets = [8, 256], sizes = [8, 32], strides = [1, 1]} : vector<16x384xf32> to vector<8x32xf32>
    %157 = tpu.transpose %155, [1, 0] : vector<8x32xf32> -> vector<32x8xf32>
    %cst_78 = arith.constant dense<0.000000e+00> : vector<8x8xf32>
    %158 = tpu.matmul %154, %157, %cst_78 {dimension_numbers = #tpu.dot_dimension_numbers<[1], [0], [0], [1], [0, 0, 1, 1], [], []>} : vector<8x32xf32>, vector<32x8xf32>, vector<8x8xf32> -> vector<8x8xf32>
    %cst_79 = arith.constant dense<0xFF800000> : vector<8xf32>
    %159 = vector.multi_reduction <maximumf>, %158, %cst_79 [1] : vector<8x8xf32> to vector<8xf32>
    %160 = vector.shape_cast %159 : vector<8xf32> to vector<8x1xf32>
    %161 = vector.broadcast %160 : vector<8x1xf32> to vector<8x8xf32>
    %162 = arith.subf %158, %161 : vector<8x8xf32>
    %163 = math.exp %162 : vector<8x8xf32>
    %cst_80 = arith.constant dense<0.000000e+00> : vector<8xf32>
    %164 = vector.multi_reduction <add>, %163, %cst_80 [1] : vector<8x8xf32> to vector<8xf32>
    %165 = vector.shape_cast %164 : vector<8xf32> to vector<8x1xf32>
    %166 = tpu.reciprocal %165 {approx = true} : vector<8x1xf32> -> vector<8x1xf32>
    %167 = vector.broadcast %166 : vector<8x1xf32> to vector<8x8xf32>
    %168 = arith.mulf %163, %167 : vector<8x8xf32>
    %cst_81 = arith.constant dense<0.000000e+00> : vector<8x32xf32>
    %169 = tpu.matmul %168, %156, %cst_81 {dimension_numbers = #tpu.dot_dimension_numbers<[1], [0], [0], [1], [0, 0, 1, 1], [], []>} : vector<8x8xf32>, vector<8x32xf32>, vector<8x32xf32> -> vector<8x32xf32>
    %170 = arith.truncf %169 : vector<8x32xf32> to vector<8x32xbf16>
    %171 = vector.extract_strided_slice %71 {offsets = [0, 0], sizes = [32, 128], strides = [1, 1]} : vector<128x128xbf16> to vector<32x128xbf16>
    %cst_82 = arith.constant dense<0.000000e+00> : vector<8x128xf32>
    %172 = tpu.matmul %170, %171, %cst_82 {dimension_numbers = #tpu.dot_dimension_numbers<[1], [0], [0], [1], [0, 0, 1, 1], [], []>} : vector<8x32xbf16>, vector<32x128xbf16>, vector<8x128xf32> -> vector<8x128xf32>
    %173 = arith.addf %153, %172 : vector<8x128xf32>
    %174 = vector.extract_strided_slice %70 {offsets = [8, 32], sizes = [8, 32], strides = [1, 1]} : vector<16x384xf32> to vector<8x32xf32>
    %175 = vector.extract_strided_slice %70 {offsets = [8, 160], sizes = [8, 32], strides = [1, 1]} : vector<16x384xf32> to vector<8x32xf32>
    %176 = vector.extract_strided_slice %70 {offsets = [8, 288], sizes = [8, 32], strides = [1, 1]} : vector<16x384xf32> to vector<8x32xf32>
    %177 = tpu.transpose %175, [1, 0] : vector<8x32xf32> -> vector<32x8xf32>
    %cst_83 = arith.constant dense<0.000000e+00> : vector<8x8xf32>
    %178 = tpu.matmul %174, %177, %cst_83 {dimension_numbers = #tpu.dot_dimension_numbers<[1], [0], [0], [1], [0, 0, 1, 1], [], []>} : vector<8x32xf32>, vector<32x8xf32>, vector<8x8xf32> -> vector<8x8xf32>
    %cst_84 = arith.constant dense<0xFF800000> : vector<8xf32>
    %179 = vector.multi_reduction <maximumf>, %178, %cst_84 [1] : vector<8x8xf32> to vector<8xf32>
    %180 = vector.shape_cast %179 : vector<8xf32> to vector<8x1xf32>
    %181 = vector.broadcast %180 : vector<8x1xf32> to vector<8x8xf32>
    %182 = arith.subf %178, %181 : vector<8x8xf32>
    %183 = math.exp %182 : vector<8x8xf32>
    %cst_85 = arith.constant dense<0.000000e+00> : vector<8xf32>
    %184 = vector.multi_reduction <add>, %183, %cst_85 [1] : vector<8x8xf32> to vector<8xf32>
    %185 = vector.shape_cast %184 : vector<8xf32> to vector<8x1xf32>
    %186 = tpu.reciprocal %185 {approx = true} : vector<8x1xf32> -> vector<8x1xf32>
    %187 = vector.broadcast %186 : vector<8x1xf32> to vector<8x8xf32>
    %188 = arith.mulf %183, %187 : vector<8x8xf32>
    %cst_86 = arith.constant dense<0.000000e+00> : vector<8x32xf32>
    %189 = tpu.matmul %188, %176, %cst_86 {dimension_numbers = #tpu.dot_dimension_numbers<[1], [0], [0], [1], [0, 0, 1, 1], [], []>} : vector<8x8xf32>, vector<8x32xf32>, vector<8x32xf32> -> vector<8x32xf32>
    %190 = arith.truncf %189 : vector<8x32xf32> to vector<8x32xbf16>
    %191 = vector.extract_strided_slice %71 {offsets = [32, 0], sizes = [32, 128], strides = [1, 1]} : vector<128x128xbf16> to vector<32x128xbf16>
    %cst_87 = arith.constant dense<0.000000e+00> : vector<8x128xf32>
    %192 = tpu.matmul %190, %191, %cst_87 {dimension_numbers = #tpu.dot_dimension_numbers<[1], [0], [0], [1], [0, 0, 1, 1], [], []>} : vector<8x32xbf16>, vector<32x128xbf16>, vector<8x128xf32> -> vector<8x128xf32>
    %193 = arith.addf %173, %192 : vector<8x128xf32>
    %194 = vector.extract_strided_slice %70 {offsets = [8, 64], sizes = [8, 32], strides = [1, 1]} : vector<16x384xf32> to vector<8x32xf32>
    %195 = vector.extract_strided_slice %70 {offsets = [8, 192], sizes = [8, 32], strides = [1, 1]} : vector<16x384xf32> to vector<8x32xf32>
    %196 = vector.extract_strided_slice %70 {offsets = [8, 320], sizes = [8, 32], strides = [1, 1]} : vector<16x384xf32> to vector<8x32xf32>
    %197 = tpu.transpose %195, [1, 0] : vector<8x32xf32> -> vector<32x8xf32>
    %cst_88 = arith.constant dense<0.000000e+00> : vector<8x8xf32>
    %198 = tpu.matmul %194, %197, %cst_88 {dimension_numbers = #tpu.dot_dimension_numbers<[1], [0], [0], [1], [0, 0, 1, 1], [], []>} : vector<8x32xf32>, vector<32x8xf32>, vector<8x8xf32> -> vector<8x8xf32>
    %cst_89 = arith.constant dense<0xFF800000> : vector<8xf32>
    %199 = vector.multi_reduction <maximumf>, %198, %cst_89 [1] : vector<8x8xf32> to vector<8xf32>
    %200 = vector.shape_cast %199 : vector<8xf32> to vector<8x1xf32>
    %201 = vector.broadcast %200 : vector<8x1xf32> to vector<8x8xf32>
    %202 = arith.subf %198, %201 : vector<8x8xf32>
    %203 = math.exp %202 : vector<8x8xf32>
    %cst_90 = arith.constant dense<0.000000e+00> : vector<8xf32>
    %204 = vector.multi_reduction <add>, %203, %cst_90 [1] : vector<8x8xf32> to vector<8xf32>
    %205 = vector.shape_cast %204 : vector<8xf32> to vector<8x1xf32>
    %206 = tpu.reciprocal %205 {approx = true} : vector<8x1xf32> -> vector<8x1xf32>
    %207 = vector.broadcast %206 : vector<8x1xf32> to vector<8x8xf32>
    %208 = arith.mulf %203, %207 : vector<8x8xf32>
    %cst_91 = arith.constant dense<0.000000e+00> : vector<8x32xf32>
    %209 = tpu.matmul %208, %196, %cst_91 {dimension_numbers = #tpu.dot_dimension_numbers<[1], [0], [0], [1], [0, 0, 1, 1], [], []>} : vector<8x8xf32>, vector<8x32xf32>, vector<8x32xf32> -> vector<8x32xf32>
    %210 = arith.truncf %209 : vector<8x32xf32> to vector<8x32xbf16>
    %211 = vector.extract_strided_slice %71 {offsets = [64, 0], sizes = [32, 128], strides = [1, 1]} : vector<128x128xbf16> to vector<32x128xbf16>
    %cst_92 = arith.constant dense<0.000000e+00> : vector<8x128xf32>
    %212 = tpu.matmul %210, %211, %cst_92 {dimension_numbers = #tpu.dot_dimension_numbers<[1], [0], [0], [1], [0, 0, 1, 1], [], []>} : vector<8x32xbf16>, vector<32x128xbf16>, vector<8x128xf32> -> vector<8x128xf32>
    %213 = arith.addf %193, %212 : vector<8x128xf32>
    %214 = vector.extract_strided_slice %70 {offsets = [8, 96], sizes = [8, 32], strides = [1, 1]} : vector<16x384xf32> to vector<8x32xf32>
    %215 = vector.extract_strided_slice %70 {offsets = [8, 224], sizes = [8, 32], strides = [1, 1]} : vector<16x384xf32> to vector<8x32xf32>
    %216 = vector.extract_strided_slice %70 {offsets = [8, 352], sizes = [8, 32], strides = [1, 1]} : vector<16x384xf32> to vector<8x32xf32>
    %217 = tpu.transpose %215, [1, 0] : vector<8x32xf32> -> vector<32x8xf32>
    %cst_93 = arith.constant dense<0.000000e+00> : vector<8x8xf32>
    %218 = tpu.matmul %214, %217, %cst_93 {dimension_numbers = #tpu.dot_dimension_numbers<[1], [0], [0], [1], [0, 0, 1, 1], [], []>} : vector<8x32xf32>, vector<32x8xf32>, vector<8x8xf32> -> vector<8x8xf32>
    %cst_94 = arith.constant dense<0xFF800000> : vector<8xf32>
    %219 = vector.multi_reduction <maximumf>, %218, %cst_94 [1] : vector<8x8xf32> to vector<8xf32>
    %220 = vector.shape_cast %219 : vector<8xf32> to vector<8x1xf32>
    %221 = vector.broadcast %220 : vector<8x1xf32> to vector<8x8xf32>
    %222 = arith.subf %218, %221 : vector<8x8xf32>
    %223 = math.exp %222 : vector<8x8xf32>
    %cst_95 = arith.constant dense<0.000000e+00> : vector<8xf32>
    %224 = vector.multi_reduction <add>, %223, %cst_95 [1] : vector<8x8xf32> to vector<8xf32>
    %225 = vector.shape_cast %224 : vector<8xf32> to vector<8x1xf32>
    %226 = tpu.reciprocal %225 {approx = true} : vector<8x1xf32> -> vector<8x1xf32>
    %227 = vector.broadcast %226 : vector<8x1xf32> to vector<8x8xf32>
    %228 = arith.mulf %223, %227 : vector<8x8xf32>
    %cst_96 = arith.constant dense<0.000000e+00> : vector<8x32xf32>
    %229 = tpu.matmul %228, %216, %cst_96 {dimension_numbers = #tpu.dot_dimension_numbers<[1], [0], [0], [1], [0, 0, 1, 1], [], []>} : vector<8x8xf32>, vector<8x32xf32>, vector<8x32xf32> -> vector<8x32xf32>
    %230 = arith.truncf %229 : vector<8x32xf32> to vector<8x32xbf16>
    %231 = vector.extract_strided_slice %71 {offsets = [96, 0], sizes = [32, 128], strides = [1, 1]} : vector<128x128xbf16> to vector<32x128xbf16>
    %cst_97 = arith.constant dense<0.000000e+00> : vector<8x128xf32>
    %232 = tpu.matmul %230, %231, %cst_97 {dimension_numbers = #tpu.dot_dimension_numbers<[1], [0], [0], [1], [0, 0, 1, 1], [], []>} : vector<8x32xbf16>, vector<32x128xbf16>, vector<8x128xf32> -> vector<8x128xf32>
    %233 = arith.addf %213, %232 : vector<8x128xf32>
    %234 = tpu.concatenate %152, %233 in 0 : vector<8x128xf32>, vector<8x128xf32> -> vector<16x128xf32>
    %c0_98 = arith.constant 0 : index
    %c0_99 = arith.constant 0 : index
    %235 = vector.load %arg6[%c0_98, %c0_99] : memref<1x128xf32, #tpu.memory_space<vmem>>, vector<1x128xf32>
    %236 = vector.broadcast %235 : vector<1x128xf32> to vector<16x128xf32>
    %237 = arith.addf %234, %236 : vector<16x128xf32>
    %238 = arith.addf %64, %237 : vector<16x128xf32>
    %cst_100 = arith.constant dense<0.000000e+00> : vector<16xf32>
    %239 = vector.multi_reduction <add>, %238, %cst_100 [1] : vector<16x128xf32> to vector<16xf32>
    %240 = vector.shape_cast %239 : vector<16xf32> to vector<16x1xf32>
    %cst_101 = arith.constant 1.280000e+02 : f32
    %241 = vector.broadcast %cst_101 : f32 to vector<16x1xf32>
    %242 = arith.divf %240, %241 : vector<16x1xf32>
    %243 = vector.broadcast %242 : vector<16x1xf32> to vector<16x128xf32>
    %244 = arith.subf %238, %243 : vector<16x128xf32>
    %245 = arith.mulf %244, %244 : vector<16x128xf32>
    %cst_102 = arith.constant dense<0.000000e+00> : vector<16xf32>
    %246 = vector.multi_reduction <add>, %245, %cst_102 [1] : vector<16x128xf32> to vector<16xf32>
    %247 = vector.shape_cast %246 : vector<16xf32> to vector<16x1xf32>
    %cst_103 = arith.constant 1.280000e+02 : f32
    %248 = vector.broadcast %cst_103 : f32 to vector<16x1xf32>
    %249 = arith.divf %247, %248 : vector<16x1xf32>
    %250 = vector.broadcast %242 : vector<16x1xf32> to vector<16x128xf32>
    %251 = arith.subf %238, %250 : vector<16x128xf32>
    %cst_104 = arith.constant 9.99999974E-6 : f32
    %252 = vector.broadcast %cst_104 : f32 to vector<16x1xf32>
    %253 = arith.addf %249, %252 : vector<16x1xf32>
    %254 = math.rsqrt %253 : vector<16x1xf32>
    %255 = vector.broadcast %254 : vector<16x1xf32> to vector<16x128xf32>
    %256 = arith.mulf %251, %255 : vector<16x128xf32>
    %c0_105 = arith.constant 0 : index
    %c0_106 = arith.constant 0 : index
    %257 = vector.load %arg7[%c0_105, %c0_106] : memref<1x128xf32, #tpu.memory_space<vmem>>, vector<1x128xf32>
    %258 = vector.broadcast %257 : vector<1x128xf32> to vector<16x128xf32>
    %259 = arith.mulf %256, %258 : vector<16x128xf32>
    %c0_107 = arith.constant 0 : index
    %c0_108 = arith.constant 0 : index
    %260 = vector.load %arg8[%c0_107, %c0_108] : memref<1x128xf32, #tpu.memory_space<vmem>>, vector<1x128xf32>
    %261 = vector.broadcast %260 : vector<1x128xf32> to vector<16x128xf32>
    %262 = arith.addf %259, %261 : vector<16x128xf32>
    %263 = arith.truncf %262 : vector<16x128xf32> to vector<16x128xbf16>
    %c0_109 = arith.constant 0 : index
    %c0_110 = arith.constant 0 : index
    %264 = vector.load %arg9[%c0_109, %c0_110] : memref<128x256xbf16, #tpu.memory_space<vmem>>, vector<128x256xbf16>
    %cst_111 = arith.constant dense<0.000000e+00> : vector<16x256xf32>
    %265 = tpu.matmul %263, %264, %cst_111 {dimension_numbers = #tpu.dot_dimension_numbers<[1], [0], [0], [1], [0, 0, 1, 1], [], []>} : vector<16x128xbf16>, vector<128x256xbf16>, vector<16x256xf32> -> vector<16x256xf32>
    %c0_112 = arith.constant 0 : index
    %c0_113 = arith.constant 0 : index
    %266 = vector.load %arg10[%c0_112, %c0_113] : memref<1x256xf32, #tpu.memory_space<vmem>>, vector<1x256xf32>
    %267 = vector.broadcast %266 : vector<1x256xf32> to vector<16x256xf32>
    %268 = arith.addf %265, %267 : vector<16x256xf32>
    %cst_114 = arith.constant 0.000000e+00 : f32
    %269 = vector.broadcast %cst_114 : f32 to vector<16x256xf32>
    %270 = arith.maximumf %268, %269 : vector<16x256xf32>
    %271 = arith.truncf %270 : vector<16x256xf32> to vector<16x256xbf16>
    %c0_115 = arith.constant 0 : index
    %c0_116 = arith.constant 0 : index
    %272 = vector.load %arg11[%c0_115, %c0_116] : memref<256x128xbf16, #tpu.memory_space<vmem>>, vector<256x128xbf16>
    %cst_117 = arith.constant dense<0.000000e+00> : vector<16x128xf32>
    %273 = tpu.matmul %271, %272, %cst_117 {dimension_numbers = #tpu.dot_dimension_numbers<[1], [0], [0], [1], [0, 0, 1, 1], [], []>} : vector<16x256xbf16>, vector<256x128xbf16>, vector<16x128xf32> -> vector<16x128xf32>
    %c0_118 = arith.constant 0 : index
    %c0_119 = arith.constant 0 : index
    %274 = vector.load %arg12[%c0_118, %c0_119] : memref<1x128xf32, #tpu.memory_space<vmem>>, vector<1x128xf32>
    %275 = vector.broadcast %274 : vector<1x128xf32> to vector<16x128xf32>
    %276 = arith.addf %273, %275 : vector<16x128xf32>
    %277 = arith.addf %262, %276 : vector<16x128xf32>
    %cst_120 = arith.constant dense<0.000000e+00> : vector<16xf32>
    %278 = vector.multi_reduction <add>, %277, %cst_120 [1] : vector<16x128xf32> to vector<16xf32>
    %279 = vector.shape_cast %278 : vector<16xf32> to vector<16x1xf32>
    %cst_121 = arith.constant 1.280000e+02 : f32
    %280 = vector.broadcast %cst_121 : f32 to vector<16x1xf32>
    %281 = arith.divf %279, %280 : vector<16x1xf32>
    %282 = vector.broadcast %281 : vector<16x1xf32> to vector<16x128xf32>
    %283 = arith.subf %277, %282 : vector<16x128xf32>
    %284 = arith.mulf %283, %283 : vector<16x128xf32>
    %cst_122 = arith.constant dense<0.000000e+00> : vector<16xf32>
    %285 = vector.multi_reduction <add>, %284, %cst_122 [1] : vector<16x128xf32> to vector<16xf32>
    %286 = vector.shape_cast %285 : vector<16xf32> to vector<16x1xf32>
    %cst_123 = arith.constant 1.280000e+02 : f32
    %287 = vector.broadcast %cst_123 : f32 to vector<16x1xf32>
    %288 = arith.divf %286, %287 : vector<16x1xf32>
    %289 = vector.broadcast %281 : vector<16x1xf32> to vector<16x128xf32>
    %290 = arith.subf %277, %289 : vector<16x128xf32>
    %cst_124 = arith.constant 9.99999974E-6 : f32
    %291 = vector.broadcast %cst_124 : f32 to vector<16x1xf32>
    %292 = arith.addf %288, %291 : vector<16x1xf32>
    %293 = math.rsqrt %292 : vector<16x1xf32>
    %294 = vector.broadcast %293 : vector<16x1xf32> to vector<16x128xf32>
    %295 = arith.mulf %290, %294 : vector<16x128xf32>
    %c0_125 = arith.constant 0 : index
    %c0_126 = arith.constant 0 : index
    %296 = vector.load %arg13[%c0_125, %c0_126] : memref<1x128xf32, #tpu.memory_space<vmem>>, vector<1x128xf32>
    %297 = vector.broadcast %296 : vector<1x128xf32> to vector<16x128xf32>
    %298 = arith.mulf %295, %297 : vector<16x128xf32>
    %c0_127 = arith.constant 0 : index
    %c0_128 = arith.constant 0 : index
    %299 = vector.load %arg14[%c0_127, %c0_128] : memref<1x128xf32, #tpu.memory_space<vmem>>, vector<1x128xf32>
    %300 = vector.broadcast %299 : vector<1x128xf32> to vector<16x128xf32>
    %301 = arith.addf %298, %300 : vector<16x128xf32>
    %302 = arith.truncf %301 : vector<16x128xf32> to vector<16x128xbf16>
    %c0_129 = arith.constant 0 : index
    %c0_130 = arith.constant 0 : index
    %303 = vector.load %arg15[%c0_129, %c0_130] : memref<128x384xbf16, #tpu.memory_space<vmem>>, vector<128x384xbf16>
    %cst_131 = arith.constant dense<0.000000e+00> : vector<16x384xf32>
    %304 = tpu.matmul %302, %303, %cst_131 {dimension_numbers = #tpu.dot_dimension_numbers<[1], [0], [0], [1], [0, 0, 1, 1], [], []>} : vector<16x128xbf16>, vector<128x384xbf16>, vector<16x384xf32> -> vector<16x384xf32>
    %c0_132 = arith.constant 0 : index
    %c0_133 = arith.constant 0 : index
    %305 = vector.load %arg16[%c0_132, %c0_133] : memref<1x384xf32, #tpu.memory_space<vmem>>, vector<1x384xf32>
    %306 = vector.broadcast %305 : vector<1x384xf32> to vector<16x384xf32>
    %307 = arith.addf %304, %306 : vector<16x384xf32>
    %c0_134 = arith.constant 0 : index
    %c0_135 = arith.constant 0 : index
    %308 = vector.load %arg17[%c0_134, %c0_135] : memref<128x128xbf16, #tpu.memory_space<vmem>>, vector<128x128xbf16>
    %cst_136 = arith.constant 0.000000e+00 : f32
    %309 = vector.broadcast %cst_136 : f32 to vector<8x128xf32>
    %310 = vector.extract_strided_slice %307 {offsets = [0, 0], sizes = [8, 32], strides = [1, 1]} : vector<16x384xf32> to vector<8x32xf32>
    %311 = vector.extract_strided_slice %307 {offsets = [0, 128], sizes = [8, 32], strides = [1, 1]} : vector<16x384xf32> to vector<8x32xf32>
    %312 = vector.extract_strided_slice %307 {offsets = [0, 256], sizes = [8, 32], strides = [1, 1]} : vector<16x384xf32> to vector<8x32xf32>
    %313 = tpu.transpose %311, [1, 0] : vector<8x32xf32> -> vector<32x8xf32>
    %cst_137 = arith.constant dense<0.000000e+00> : vector<8x8xf32>
    %314 = tpu.matmul %310, %313, %cst_137 {dimension_numbers = #tpu.dot_dimension_numbers<[1], [0], [0], [1], [0, 0, 1, 1], [], []>} : vector<8x32xf32>, vector<32x8xf32>, vector<8x8xf32> -> vector<8x8xf32>
    %cst_138 = arith.constant dense<0xFF800000> : vector<8xf32>
    %315 = vector.multi_reduction <maximumf>, %314, %cst_138 [1] : vector<8x8xf32> to vector<8xf32>
    %316 = vector.shape_cast %315 : vector<8xf32> to vector<8x1xf32>
    %317 = vector.broadcast %316 : vector<8x1xf32> to vector<8x8xf32>
    %318 = arith.subf %314, %317 : vector<8x8xf32>
    %319 = math.exp %318 : vector<8x8xf32>
    %cst_139 = arith.constant dense<0.000000e+00> : vector<8xf32>
    %320 = vector.multi_reduction <add>, %319, %cst_139 [1] : vector<8x8xf32> to vector<8xf32>
    %321 = vector.shape_cast %320 : vector<8xf32> to vector<8x1xf32>
    %322 = tpu.reciprocal %321 {approx = true} : vector<8x1xf32> -> vector<8x1xf32>
    %323 = vector.broadcast %322 : vector<8x1xf32> to vector<8x8xf32>
    %324 = arith.mulf %319, %323 : vector<8x8xf32>
    %cst_140 = arith.constant dense<0.000000e+00> : vector<8x32xf32>
    %325 = tpu.matmul %324, %312, %cst_140 {dimension_numbers = #tpu.dot_dimension_numbers<[1], [0], [0], [1], [0, 0, 1, 1], [], []>} : vector<8x8xf32>, vector<8x32xf32>, vector<8x32xf32> -> vector<8x32xf32>
    %326 = arith.truncf %325 : vector<8x32xf32> to vector<8x32xbf16>
    %327 = vector.extract_strided_slice %308 {offsets = [0, 0], sizes = [32, 128], strides = [1, 1]} : vector<128x128xbf16> to vector<32x128xbf16>
    %cst_141 = arith.constant dense<0.000000e+00> : vector<8x128xf32>
    %328 = tpu.matmul %326, %327, %cst_141 {dimension_numbers = #tpu.dot_dimension_numbers<[1], [0], [0], [1], [0, 0, 1, 1], [], []>} : vector<8x32xbf16>, vector<32x128xbf16>, vector<8x128xf32> -> vector<8x128xf32>
    %329 = arith.addf %309, %328 : vector<8x128xf32>
    %330 = vector.extract_strided_slice %307 {offsets = [0, 32], sizes = [8, 32], strides = [1, 1]} : vector<16x384xf32> to vector<8x32xf32>
    %331 = vector.extract_strided_slice %307 {offsets = [0, 160], sizes = [8, 32], strides = [1, 1]} : vector<16x384xf32> to vector<8x32xf32>
    %332 = vector.extract_strided_slice %307 {offsets = [0, 288], sizes = [8, 32], strides = [1, 1]} : vector<16x384xf32> to vector<8x32xf32>
    %333 = tpu.transpose %331, [1, 0] : vector<8x32xf32> -> vector<32x8xf32>
    %cst_142 = arith.constant dense<0.000000e+00> : vector<8x8xf32>
    %334 = tpu.matmul %330, %333, %cst_142 {dimension_numbers = #tpu.dot_dimension_numbers<[1], [0], [0], [1], [0, 0, 1, 1], [], []>} : vector<8x32xf32>, vector<32x8xf32>, vector<8x8xf32> -> vector<8x8xf32>
    %cst_143 = arith.constant dense<0xFF800000> : vector<8xf32>
    %335 = vector.multi_reduction <maximumf>, %334, %cst_143 [1] : vector<8x8xf32> to vector<8xf32>
    %336 = vector.shape_cast %335 : vector<8xf32> to vector<8x1xf32>
    %337 = vector.broadcast %336 : vector<8x1xf32> to vector<8x8xf32>
    %338 = arith.subf %334, %337 : vector<8x8xf32>
    %339 = math.exp %338 : vector<8x8xf32>
    %cst_144 = arith.constant dense<0.000000e+00> : vector<8xf32>
    %340 = vector.multi_reduction <add>, %339, %cst_144 [1] : vector<8x8xf32> to vector<8xf32>
    %341 = vector.shape_cast %340 : vector<8xf32> to vector<8x1xf32>
    %342 = tpu.reciprocal %341 {approx = true} : vector<8x1xf32> -> vector<8x1xf32>
    %343 = vector.broadcast %342 : vector<8x1xf32> to vector<8x8xf32>
    %344 = arith.mulf %339, %343 : vector<8x8xf32>
    %cst_145 = arith.constant dense<0.000000e+00> : vector<8x32xf32>
    %345 = tpu.matmul %344, %332, %cst_145 {dimension_numbers = #tpu.dot_dimension_numbers<[1], [0], [0], [1], [0, 0, 1, 1], [], []>} : vector<8x8xf32>, vector<8x32xf32>, vector<8x32xf32> -> vector<8x32xf32>
    %346 = arith.truncf %345 : vector<8x32xf32> to vector<8x32xbf16>
    %347 = vector.extract_strided_slice %308 {offsets = [32, 0], sizes = [32, 128], strides = [1, 1]} : vector<128x128xbf16> to vector<32x128xbf16>
    %cst_146 = arith.constant dense<0.000000e+00> : vector<8x128xf32>
    %348 = tpu.matmul %346, %347, %cst_146 {dimension_numbers = #tpu.dot_dimension_numbers<[1], [0], [0], [1], [0, 0, 1, 1], [], []>} : vector<8x32xbf16>, vector<32x128xbf16>, vector<8x128xf32> -> vector<8x128xf32>
    %349 = arith.addf %329, %348 : vector<8x128xf32>
    %350 = vector.extract_strided_slice %307 {offsets = [0, 64], sizes = [8, 32], strides = [1, 1]} : vector<16x384xf32> to vector<8x32xf32>
    %351 = vector.extract_strided_slice %307 {offsets = [0, 192], sizes = [8, 32], strides = [1, 1]} : vector<16x384xf32> to vector<8x32xf32>
    %352 = vector.extract_strided_slice %307 {offsets = [0, 320], sizes = [8, 32], strides = [1, 1]} : vector<16x384xf32> to vector<8x32xf32>
    %353 = tpu.transpose %351, [1, 0] : vector<8x32xf32> -> vector<32x8xf32>
    %cst_147 = arith.constant dense<0.000000e+00> : vector<8x8xf32>
    %354 = tpu.matmul %350, %353, %cst_147 {dimension_numbers = #tpu.dot_dimension_numbers<[1], [0], [0], [1], [0, 0, 1, 1], [], []>} : vector<8x32xf32>, vector<32x8xf32>, vector<8x8xf32> -> vector<8x8xf32>
    %cst_148 = arith.constant dense<0xFF800000> : vector<8xf32>
    %355 = vector.multi_reduction <maximumf>, %354, %cst_148 [1] : vector<8x8xf32> to vector<8xf32>
    %356 = vector.shape_cast %355 : vector<8xf32> to vector<8x1xf32>
    %357 = vector.broadcast %356 : vector<8x1xf32> to vector<8x8xf32>
    %358 = arith.subf %354, %357 : vector<8x8xf32>
    %359 = math.exp %358 : vector<8x8xf32>
    %cst_149 = arith.constant dense<0.000000e+00> : vector<8xf32>
    %360 = vector.multi_reduction <add>, %359, %cst_149 [1] : vector<8x8xf32> to vector<8xf32>
    %361 = vector.shape_cast %360 : vector<8xf32> to vector<8x1xf32>
    %362 = tpu.reciprocal %361 {approx = true} : vector<8x1xf32> -> vector<8x1xf32>
    %363 = vector.broadcast %362 : vector<8x1xf32> to vector<8x8xf32>
    %364 = arith.mulf %359, %363 : vector<8x8xf32>
    %cst_150 = arith.constant dense<0.000000e+00> : vector<8x32xf32>
    %365 = tpu.matmul %364, %352, %cst_150 {dimension_numbers = #tpu.dot_dimension_numbers<[1], [0], [0], [1], [0, 0, 1, 1], [], []>} : vector<8x8xf32>, vector<8x32xf32>, vector<8x32xf32> -> vector<8x32xf32>
    %366 = arith.truncf %365 : vector<8x32xf32> to vector<8x32xbf16>
    %367 = vector.extract_strided_slice %308 {offsets = [64, 0], sizes = [32, 128], strides = [1, 1]} : vector<128x128xbf16> to vector<32x128xbf16>
    %cst_151 = arith.constant dense<0.000000e+00> : vector<8x128xf32>
    %368 = tpu.matmul %366, %367, %cst_151 {dimension_numbers = #tpu.dot_dimension_numbers<[1], [0], [0], [1], [0, 0, 1, 1], [], []>} : vector<8x32xbf16>, vector<32x128xbf16>, vector<8x128xf32> -> vector<8x128xf32>
    %369 = arith.addf %349, %368 : vector<8x128xf32>
    %370 = vector.extract_strided_slice %307 {offsets = [0, 96], sizes = [8, 32], strides = [1, 1]} : vector<16x384xf32> to vector<8x32xf32>
    %371 = vector.extract_strided_slice %307 {offsets = [0, 224], sizes = [8, 32], strides = [1, 1]} : vector<16x384xf32> to vector<8x32xf32>
    %372 = vector.extract_strided_slice %307 {offsets = [0, 352], sizes = [8, 32], strides = [1, 1]} : vector<16x384xf32> to vector<8x32xf32>
    %373 = tpu.transpose %371, [1, 0] : vector<8x32xf32> -> vector<32x8xf32>
    %cst_152 = arith.constant dense<0.000000e+00> : vector<8x8xf32>
    %374 = tpu.matmul %370, %373, %cst_152 {dimension_numbers = #tpu.dot_dimension_numbers<[1], [0], [0], [1], [0, 0, 1, 1], [], []>} : vector<8x32xf32>, vector<32x8xf32>, vector<8x8xf32> -> vector<8x8xf32>
    %cst_153 = arith.constant dense<0xFF800000> : vector<8xf32>
    %375 = vector.multi_reduction <maximumf>, %374, %cst_153 [1] : vector<8x8xf32> to vector<8xf32>
    %376 = vector.shape_cast %375 : vector<8xf32> to vector<8x1xf32>
    %377 = vector.broadcast %376 : vector<8x1xf32> to vector<8x8xf32>
    %378 = arith.subf %374, %377 : vector<8x8xf32>
    %379 = math.exp %378 : vector<8x8xf32>
    %cst_154 = arith.constant dense<0.000000e+00> : vector<8xf32>
    %380 = vector.multi_reduction <add>, %379, %cst_154 [1] : vector<8x8xf32> to vector<8xf32>
    %381 = vector.shape_cast %380 : vector<8xf32> to vector<8x1xf32>
    %382 = tpu.reciprocal %381 {approx = true} : vector<8x1xf32> -> vector<8x1xf32>
    %383 = vector.broadcast %382 : vector<8x1xf32> to vector<8x8xf32>
    %384 = arith.mulf %379, %383 : vector<8x8xf32>
    %cst_155 = arith.constant dense<0.000000e+00> : vector<8x32xf32>
    %385 = tpu.matmul %384, %372, %cst_155 {dimension_numbers = #tpu.dot_dimension_numbers<[1], [0], [0], [1], [0, 0, 1, 1], [], []>} : vector<8x8xf32>, vector<8x32xf32>, vector<8x32xf32> -> vector<8x32xf32>
    %386 = arith.truncf %385 : vector<8x32xf32> to vector<8x32xbf16>
    %387 = vector.extract_strided_slice %308 {offsets = [96, 0], sizes = [32, 128], strides = [1, 1]} : vector<128x128xbf16> to vector<32x128xbf16>
    %cst_156 = arith.constant dense<0.000000e+00> : vector<8x128xf32>
    %388 = tpu.matmul %386, %387, %cst_156 {dimension_numbers = #tpu.dot_dimension_numbers<[1], [0], [0], [1], [0, 0, 1, 1], [], []>} : vector<8x32xbf16>, vector<32x128xbf16>, vector<8x128xf32> -> vector<8x128xf32>
    %389 = arith.addf %369, %388 : vector<8x128xf32>
    %cst_157 = arith.constant 0.000000e+00 : f32
    %390 = vector.broadcast %cst_157 : f32 to vector<8x128xf32>
    %391 = vector.extract_strided_slice %307 {offsets = [8, 0], sizes = [8, 32], strides = [1, 1]} : vector<16x384xf32> to vector<8x32xf32>
    %392 = vector.extract_strided_slice %307 {offsets = [8, 128], sizes = [8, 32], strides = [1, 1]} : vector<16x384xf32> to vector<8x32xf32>
    %393 = vector.extract_strided_slice %307 {offsets = [8, 256], sizes = [8, 32], strides = [1, 1]} : vector<16x384xf32> to vector<8x32xf32>
    %394 = tpu.transpose %392, [1, 0] : vector<8x32xf32> -> vector<32x8xf32>
    %cst_158 = arith.constant dense<0.000000e+00> : vector<8x8xf32>
    %395 = tpu.matmul %391, %394, %cst_158 {dimension_numbers = #tpu.dot_dimension_numbers<[1], [0], [0], [1], [0, 0, 1, 1], [], []>} : vector<8x32xf32>, vector<32x8xf32>, vector<8x8xf32> -> vector<8x8xf32>
    %cst_159 = arith.constant dense<0xFF800000> : vector<8xf32>
    %396 = vector.multi_reduction <maximumf>, %395, %cst_159 [1] : vector<8x8xf32> to vector<8xf32>
    %397 = vector.shape_cast %396 : vector<8xf32> to vector<8x1xf32>
    %398 = vector.broadcast %397 : vector<8x1xf32> to vector<8x8xf32>
    %399 = arith.subf %395, %398 : vector<8x8xf32>
    %400 = math.exp %399 : vector<8x8xf32>
    %cst_160 = arith.constant dense<0.000000e+00> : vector<8xf32>
    %401 = vector.multi_reduction <add>, %400, %cst_160 [1] : vector<8x8xf32> to vector<8xf32>
    %402 = vector.shape_cast %401 : vector<8xf32> to vector<8x1xf32>
    %403 = tpu.reciprocal %402 {approx = true} : vector<8x1xf32> -> vector<8x1xf32>
    %404 = vector.broadcast %403 : vector<8x1xf32> to vector<8x8xf32>
    %405 = arith.mulf %400, %404 : vector<8x8xf32>
    %cst_161 = arith.constant dense<0.000000e+00> : vector<8x32xf32>
    %406 = tpu.matmul %405, %393, %cst_161 {dimension_numbers = #tpu.dot_dimension_numbers<[1], [0], [0], [1], [0, 0, 1, 1], [], []>} : vector<8x8xf32>, vector<8x32xf32>, vector<8x32xf32> -> vector<8x32xf32>
    %407 = arith.truncf %406 : vector<8x32xf32> to vector<8x32xbf16>
    %408 = vector.extract_strided_slice %308 {offsets = [0, 0], sizes = [32, 128], strides = [1, 1]} : vector<128x128xbf16> to vector<32x128xbf16>
    %cst_162 = arith.constant dense<0.000000e+00> : vector<8x128xf32>
    %409 = tpu.matmul %407, %408, %cst_162 {dimension_numbers = #tpu.dot_dimension_numbers<[1], [0], [0], [1], [0, 0, 1, 1], [], []>} : vector<8x32xbf16>, vector<32x128xbf16>, vector<8x128xf32> -> vector<8x128xf32>
    %410 = arith.addf %390, %409 : vector<8x128xf32>
    %411 = vector.extract_strided_slice %307 {offsets = [8, 32], sizes = [8, 32], strides = [1, 1]} : vector<16x384xf32> to vector<8x32xf32>
    %412 = vector.extract_strided_slice %307 {offsets = [8, 160], sizes = [8, 32], strides = [1, 1]} : vector<16x384xf32> to vector<8x32xf32>
    %413 = vector.extract_strided_slice %307 {offsets = [8, 288], sizes = [8, 32], strides = [1, 1]} : vector<16x384xf32> to vector<8x32xf32>
    %414 = tpu.transpose %412, [1, 0] : vector<8x32xf32> -> vector<32x8xf32>
    %cst_163 = arith.constant dense<0.000000e+00> : vector<8x8xf32>
    %415 = tpu.matmul %411, %414, %cst_163 {dimension_numbers = #tpu.dot_dimension_numbers<[1], [0], [0], [1], [0, 0, 1, 1], [], []>} : vector<8x32xf32>, vector<32x8xf32>, vector<8x8xf32> -> vector<8x8xf32>
    %cst_164 = arith.constant dense<0xFF800000> : vector<8xf32>
    %416 = vector.multi_reduction <maximumf>, %415, %cst_164 [1] : vector<8x8xf32> to vector<8xf32>
    %417 = vector.shape_cast %416 : vector<8xf32> to vector<8x1xf32>
    %418 = vector.broadcast %417 : vector<8x1xf32> to vector<8x8xf32>
    %419 = arith.subf %415, %418 : vector<8x8xf32>
    %420 = math.exp %419 : vector<8x8xf32>
    %cst_165 = arith.constant dense<0.000000e+00> : vector<8xf32>
    %421 = vector.multi_reduction <add>, %420, %cst_165 [1] : vector<8x8xf32> to vector<8xf32>
    %422 = vector.shape_cast %421 : vector<8xf32> to vector<8x1xf32>
    %423 = tpu.reciprocal %422 {approx = true} : vector<8x1xf32> -> vector<8x1xf32>
    %424 = vector.broadcast %423 : vector<8x1xf32> to vector<8x8xf32>
    %425 = arith.mulf %420, %424 : vector<8x8xf32>
    %cst_166 = arith.constant dense<0.000000e+00> : vector<8x32xf32>
    %426 = tpu.matmul %425, %413, %cst_166 {dimension_numbers = #tpu.dot_dimension_numbers<[1], [0], [0], [1], [0, 0, 1, 1], [], []>} : vector<8x8xf32>, vector<8x32xf32>, vector<8x32xf32> -> vector<8x32xf32>
    %427 = arith.truncf %426 : vector<8x32xf32> to vector<8x32xbf16>
    %428 = vector.extract_strided_slice %308 {offsets = [32, 0], sizes = [32, 128], strides = [1, 1]} : vector<128x128xbf16> to vector<32x128xbf16>
    %cst_167 = arith.constant dense<0.000000e+00> : vector<8x128xf32>
    %429 = tpu.matmul %427, %428, %cst_167 {dimension_numbers = #tpu.dot_dimension_numbers<[1], [0], [0], [1], [0, 0, 1, 1], [], []>} : vector<8x32xbf16>, vector<32x128xbf16>, vector<8x128xf32> -> vector<8x128xf32>
    %430 = arith.addf %410, %429 : vector<8x128xf32>
    %431 = vector.extract_strided_slice %307 {offsets = [8, 64], sizes = [8, 32], strides = [1, 1]} : vector<16x384xf32> to vector<8x32xf32>
    %432 = vector.extract_strided_slice %307 {offsets = [8, 192], sizes = [8, 32], strides = [1, 1]} : vector<16x384xf32> to vector<8x32xf32>
    %433 = vector.extract_strided_slice %307 {offsets = [8, 320], sizes = [8, 32], strides = [1, 1]} : vector<16x384xf32> to vector<8x32xf32>
    %434 = tpu.transpose %432, [1, 0] : vector<8x32xf32> -> vector<32x8xf32>
    %cst_168 = arith.constant dense<0.000000e+00> : vector<8x8xf32>
    %435 = tpu.matmul %431, %434, %cst_168 {dimension_numbers = #tpu.dot_dimension_numbers<[1], [0], [0], [1], [0, 0, 1, 1], [], []>} : vector<8x32xf32>, vector<32x8xf32>, vector<8x8xf32> -> vector<8x8xf32>
    %cst_169 = arith.constant dense<0xFF800000> : vector<8xf32>
    %436 = vector.multi_reduction <maximumf>, %435, %cst_169 [1] : vector<8x8xf32> to vector<8xf32>
    %437 = vector.shape_cast %436 : vector<8xf32> to vector<8x1xf32>
    %438 = vector.broadcast %437 : vector<8x1xf32> to vector<8x8xf32>
    %439 = arith.subf %435, %438 : vector<8x8xf32>
    %440 = math.exp %439 : vector<8x8xf32>
    %cst_170 = arith.constant dense<0.000000e+00> : vector<8xf32>
    %441 = vector.multi_reduction <add>, %440, %cst_170 [1] : vector<8x8xf32> to vector<8xf32>
    %442 = vector.shape_cast %441 : vector<8xf32> to vector<8x1xf32>
    %443 = tpu.reciprocal %442 {approx = true} : vector<8x1xf32> -> vector<8x1xf32>
    %444 = vector.broadcast %443 : vector<8x1xf32> to vector<8x8xf32>
    %445 = arith.mulf %440, %444 : vector<8x8xf32>
    %cst_171 = arith.constant dense<0.000000e+00> : vector<8x32xf32>
    %446 = tpu.matmul %445, %433, %cst_171 {dimension_numbers = #tpu.dot_dimension_numbers<[1], [0], [0], [1], [0, 0, 1, 1], [], []>} : vector<8x8xf32>, vector<8x32xf32>, vector<8x32xf32> -> vector<8x32xf32>
    %447 = arith.truncf %446 : vector<8x32xf32> to vector<8x32xbf16>
    %448 = vector.extract_strided_slice %308 {offsets = [64, 0], sizes = [32, 128], strides = [1, 1]} : vector<128x128xbf16> to vector<32x128xbf16>
    %cst_172 = arith.constant dense<0.000000e+00> : vector<8x128xf32>
    %449 = tpu.matmul %447, %448, %cst_172 {dimension_numbers = #tpu.dot_dimension_numbers<[1], [0], [0], [1], [0, 0, 1, 1], [], []>} : vector<8x32xbf16>, vector<32x128xbf16>, vector<8x128xf32> -> vector<8x128xf32>
    %450 = arith.addf %430, %449 : vector<8x128xf32>
    %451 = vector.extract_strided_slice %307 {offsets = [8, 96], sizes = [8, 32], strides = [1, 1]} : vector<16x384xf32> to vector<8x32xf32>
    %452 = vector.extract_strided_slice %307 {offsets = [8, 224], sizes = [8, 32], strides = [1, 1]} : vector<16x384xf32> to vector<8x32xf32>
    %453 = vector.extract_strided_slice %307 {offsets = [8, 352], sizes = [8, 32], strides = [1, 1]} : vector<16x384xf32> to vector<8x32xf32>
    %454 = tpu.transpose %452, [1, 0] : vector<8x32xf32> -> vector<32x8xf32>
    %cst_173 = arith.constant dense<0.000000e+00> : vector<8x8xf32>
    %455 = tpu.matmul %451, %454, %cst_173 {dimension_numbers = #tpu.dot_dimension_numbers<[1], [0], [0], [1], [0, 0, 1, 1], [], []>} : vector<8x32xf32>, vector<32x8xf32>, vector<8x8xf32> -> vector<8x8xf32>
    %cst_174 = arith.constant dense<0xFF800000> : vector<8xf32>
    %456 = vector.multi_reduction <maximumf>, %455, %cst_174 [1] : vector<8x8xf32> to vector<8xf32>
    %457 = vector.shape_cast %456 : vector<8xf32> to vector<8x1xf32>
    %458 = vector.broadcast %457 : vector<8x1xf32> to vector<8x8xf32>
    %459 = arith.subf %455, %458 : vector<8x8xf32>
    %460 = math.exp %459 : vector<8x8xf32>
    %cst_175 = arith.constant dense<0.000000e+00> : vector<8xf32>
    %461 = vector.multi_reduction <add>, %460, %cst_175 [1] : vector<8x8xf32> to vector<8xf32>
    %462 = vector.shape_cast %461 : vector<8xf32> to vector<8x1xf32>
    %463 = tpu.reciprocal %462 {approx = true} : vector<8x1xf32> -> vector<8x1xf32>
    %464 = vector.broadcast %463 : vector<8x1xf32> to vector<8x8xf32>
    %465 = arith.mulf %460, %464 : vector<8x8xf32>
    %cst_176 = arith.constant dense<0.000000e+00> : vector<8x32xf32>
    %466 = tpu.matmul %465, %453, %cst_176 {dimension_numbers = #tpu.dot_dimension_numbers<[1], [0], [0], [1], [0, 0, 1, 1], [], []>} : vector<8x8xf32>, vector<8x32xf32>, vector<8x32xf32> -> vector<8x32xf32>
    %467 = arith.truncf %466 : vector<8x32xf32> to vector<8x32xbf16>
    %468 = vector.extract_strided_slice %308 {offsets = [96, 0], sizes = [32, 128], strides = [1, 1]} : vector<128x128xbf16> to vector<32x128xbf16>
    %cst_177 = arith.constant dense<0.000000e+00> : vector<8x128xf32>
    %469 = tpu.matmul %467, %468, %cst_177 {dimension_numbers = #tpu.dot_dimension_numbers<[1], [0], [0], [1], [0, 0, 1, 1], [], []>} : vector<8x32xbf16>, vector<32x128xbf16>, vector<8x128xf32> -> vector<8x128xf32>
    %470 = arith.addf %450, %469 : vector<8x128xf32>
    %471 = tpu.concatenate %389, %470 in 0 : vector<8x128xf32>, vector<8x128xf32> -> vector<16x128xf32>
    %c0_178 = arith.constant 0 : index
    %c0_179 = arith.constant 0 : index
    %472 = vector.load %arg18[%c0_178, %c0_179] : memref<1x128xf32, #tpu.memory_space<vmem>>, vector<1x128xf32>
    %473 = vector.broadcast %472 : vector<1x128xf32> to vector<16x128xf32>
    %474 = arith.addf %471, %473 : vector<16x128xf32>
    %475 = arith.addf %301, %474 : vector<16x128xf32>
    %cst_180 = arith.constant dense<0.000000e+00> : vector<16xf32>
    %476 = vector.multi_reduction <add>, %475, %cst_180 [1] : vector<16x128xf32> to vector<16xf32>
    %477 = vector.shape_cast %476 : vector<16xf32> to vector<16x1xf32>
    %cst_181 = arith.constant 1.280000e+02 : f32
    %478 = vector.broadcast %cst_181 : f32 to vector<16x1xf32>
    %479 = arith.divf %477, %478 : vector<16x1xf32>
    %480 = vector.broadcast %479 : vector<16x1xf32> to vector<16x128xf32>
    %481 = arith.subf %475, %480 : vector<16x128xf32>
    %482 = arith.mulf %481, %481 : vector<16x128xf32>
    %cst_182 = arith.constant dense<0.000000e+00> : vector<16xf32>
    %483 = vector.multi_reduction <add>, %482, %cst_182 [1] : vector<16x128xf32> to vector<16xf32>
    %484 = vector.shape_cast %483 : vector<16xf32> to vector<16x1xf32>
    %cst_183 = arith.constant 1.280000e+02 : f32
    %485 = vector.broadcast %cst_183 : f32 to vector<16x1xf32>
    %486 = arith.divf %484, %485 : vector<16x1xf32>
    %487 = vector.broadcast %479 : vector<16x1xf32> to vector<16x128xf32>
    %488 = arith.subf %475, %487 : vector<16x128xf32>
    %cst_184 = arith.constant 9.99999974E-6 : f32
    %489 = vector.broadcast %cst_184 : f32 to vector<16x1xf32>
    %490 = arith.addf %486, %489 : vector<16x1xf32>
    %491 = math.rsqrt %490 : vector<16x1xf32>
    %492 = vector.broadcast %491 : vector<16x1xf32> to vector<16x128xf32>
    %493 = arith.mulf %488, %492 : vector<16x128xf32>
    %c0_185 = arith.constant 0 : index
    %c0_186 = arith.constant 0 : index
    %494 = vector.load %arg19[%c0_185, %c0_186] : memref<1x128xf32, #tpu.memory_space<vmem>>, vector<1x128xf32>
    %495 = vector.broadcast %494 : vector<1x128xf32> to vector<16x128xf32>
    %496 = arith.mulf %493, %495 : vector<16x128xf32>
    %c0_187 = arith.constant 0 : index
    %c0_188 = arith.constant 0 : index
    %497 = vector.load %arg20[%c0_187, %c0_188] : memref<1x128xf32, #tpu.memory_space<vmem>>, vector<1x128xf32>
    %498 = vector.broadcast %497 : vector<1x128xf32> to vector<16x128xf32>
    %499 = arith.addf %496, %498 : vector<16x128xf32>
    %500 = arith.truncf %499 : vector<16x128xf32> to vector<16x128xbf16>
    %c0_189 = arith.constant 0 : index
    %c0_190 = arith.constant 0 : index
    %501 = vector.load %arg21[%c0_189, %c0_190] : memref<128x256xbf16, #tpu.memory_space<vmem>>, vector<128x256xbf16>
    %cst_191 = arith.constant dense<0.000000e+00> : vector<16x256xf32>
    %502 = tpu.matmul %500, %501, %cst_191 {dimension_numbers = #tpu.dot_dimension_numbers<[1], [0], [0], [1], [0, 0, 1, 1], [], []>} : vector<16x128xbf16>, vector<128x256xbf16>, vector<16x256xf32> -> vector<16x256xf32>
    %c0_192 = arith.constant 0 : index
    %c0_193 = arith.constant 0 : index
    %503 = vector.load %arg22[%c0_192, %c0_193] : memref<1x256xf32, #tpu.memory_space<vmem>>, vector<1x256xf32>
    %504 = vector.broadcast %503 : vector<1x256xf32> to vector<16x256xf32>
    %505 = arith.addf %502, %504 : vector<16x256xf32>
    %cst_194 = arith.constant 0.000000e+00 : f32
    %506 = vector.broadcast %cst_194 : f32 to vector<16x256xf32>
    %507 = arith.maximumf %505, %506 : vector<16x256xf32>
    %508 = arith.truncf %507 : vector<16x256xf32> to vector<16x256xbf16>
    %c0_195 = arith.constant 0 : index
    %c0_196 = arith.constant 0 : index
    %509 = vector.load %arg23[%c0_195, %c0_196] : memref<256x128xbf16, #tpu.memory_space<vmem>>, vector<256x128xbf16>
    %cst_197 = arith.constant dense<0.000000e+00> : vector<16x128xf32>
    %510 = tpu.matmul %508, %509, %cst_197 {dimension_numbers = #tpu.dot_dimension_numbers<[1], [0], [0], [1], [0, 0, 1, 1], [], []>} : vector<16x256xbf16>, vector<256x128xbf16>, vector<16x128xf32> -> vector<16x128xf32>
    %c0_198 = arith.constant 0 : index
    %c0_199 = arith.constant 0 : index
    %511 = vector.load %arg24[%c0_198, %c0_199] : memref<1x128xf32, #tpu.memory_space<vmem>>, vector<1x128xf32>
    %512 = vector.broadcast %511 : vector<1x128xf32> to vector<16x128xf32>
    %513 = arith.addf %510, %512 : vector<16x128xf32>
    %514 = arith.addf %499, %513 : vector<16x128xf32>
    %cst_200 = arith.constant dense<0.000000e+00> : vector<16xf32>
    %515 = vector.multi_reduction <add>, %514, %cst_200 [1] : vector<16x128xf32> to vector<16xf32>
    %516 = vector.shape_cast %515 : vector<16xf32> to vector<16x1xf32>
    %cst_201 = arith.constant 1.280000e+02 : f32
    %517 = vector.broadcast %cst_201 : f32 to vector<16x1xf32>
    %518 = arith.divf %516, %517 : vector<16x1xf32>
    %519 = vector.broadcast %518 : vector<16x1xf32> to vector<16x128xf32>
    %520 = arith.subf %514, %519 : vector<16x128xf32>
    %521 = arith.mulf %520, %520 : vector<16x128xf32>
    %cst_202 = arith.constant dense<0.000000e+00> : vector<16xf32>
    %522 = vector.multi_reduction <add>, %521, %cst_202 [1] : vector<16x128xf32> to vector<16xf32>
    %523 = vector.shape_cast %522 : vector<16xf32> to vector<16x1xf32>
    %cst_203 = arith.constant 1.280000e+02 : f32
    %524 = vector.broadcast %cst_203 : f32 to vector<16x1xf32>
    %525 = arith.divf %523, %524 : vector<16x1xf32>
    %526 = vector.broadcast %518 : vector<16x1xf32> to vector<16x128xf32>
    %527 = arith.subf %514, %526 : vector<16x128xf32>
    %cst_204 = arith.constant 9.99999974E-6 : f32
    %528 = vector.broadcast %cst_204 : f32 to vector<16x1xf32>
    %529 = arith.addf %525, %528 : vector<16x1xf32>
    %530 = math.rsqrt %529 : vector<16x1xf32>
    %531 = vector.broadcast %530 : vector<16x1xf32> to vector<16x128xf32>
    %532 = arith.mulf %527, %531 : vector<16x128xf32>
    %c0_205 = arith.constant 0 : index
    %c0_206 = arith.constant 0 : index
    %533 = vector.load %arg25[%c0_205, %c0_206] : memref<1x128xf32, #tpu.memory_space<vmem>>, vector<1x128xf32>
    %534 = vector.broadcast %533 : vector<1x128xf32> to vector<16x128xf32>
    %535 = arith.mulf %532, %534 : vector<16x128xf32>
    %c0_207 = arith.constant 0 : index
    %c0_208 = arith.constant 0 : index
    %536 = vector.load %arg26[%c0_207, %c0_208] : memref<1x128xf32, #tpu.memory_space<vmem>>, vector<1x128xf32>
    %537 = vector.broadcast %536 : vector<1x128xf32> to vector<16x128xf32>
    %538 = arith.addf %535, %537 : vector<16x128xf32>
    %539 = arith.truncf %538 : vector<16x128xf32> to vector<16x128xbf16>
    %c0_209 = arith.constant 0 : index
    %c0_210 = arith.constant 0 : index
    %540 = vector.load %arg27[%c0_209, %c0_210] : memref<128x512xbf16, #tpu.memory_space<vmem>>, vector<128x512xbf16>
    %cst_211 = arith.constant dense<0.000000e+00> : vector<16x512xf32>
    %541 = tpu.matmul %539, %540, %cst_211 {dimension_numbers = #tpu.dot_dimension_numbers<[1], [0], [0], [1], [0, 0, 1, 1], [], []>} : vector<16x128xbf16>, vector<128x512xbf16>, vector<16x512xf32> -> vector<16x512xf32>
    %c0_212 = arith.constant 0 : index
    %c0_213 = arith.constant 0 : index
    %542 = vector.load %arg28[%c0_212, %c0_213] : memref<1x512xf32, #tpu.memory_space<vmem>>, vector<1x512xf32>
    %543 = vector.broadcast %542 : vector<1x512xf32> to vector<16x512xf32>
    %544 = arith.addf %541, %543 : vector<16x512xf32>
    %c0_214 = arith.constant 0 : index
    %c0_215 = arith.constant 0 : index
    %545 = vector.load %arg29[%c0_214, %c0_215] : memref<16x512xf32, #tpu.memory_space<vmem>>, vector<16x512xf32>
    tpu.vector_store %arg29[%c0_214, %c0_215], %544 {strides = array<i32>} : memref<16x512xf32, #tpu.memory_space<vmem>>, vector<16x512xf32>,
    return
  }
  func.func @transform_0(%arg0: i32, %arg1: memref<16xi32, #tpu.memory_space<smem>>) -> (i32, i32) {
    %c0_i32 = arith.constant 0 : i32
    %c0_i32_0 = arith.constant 0 : i32
    %c0_i32_1 = arith.constant 0 : i32
    return %c0_i32, %c0_i32_0 : i32, i32
  }
  func.func @transform_1(%arg0: i32, %arg1: memref<16xi32, #tpu.memory_space<smem>>) -> (i32, i32) {
    %c0_i32 = arith.constant 0 : i32
    %c0_i32_0 = arith.constant 0 : i32
    %c0_i32_1 = arith.constant 0 : i32
    return %c0_i32, %c0_i32_0 : i32, i32
  }
  func.func @transform_2(%arg0: i32, %arg1: memref<16xi32, #tpu.memory_space<smem>>) -> (i32, i32) {
    %c0_i32 = arith.constant 0 : i32
    %c0_i32_0 = arith.constant 0 : i32
    %c0_i32_1 = arith.constant 0 : i32
    return %c0_i32, %c0_i32_0 : i32, i32
  }
  func.func @transform_3(%arg0: i32, %arg1: memref<16xi32, #tpu.memory_space<smem>>) -> (i32, i32) {
    %c0_i32 = arith.constant 0 : i32
    %c0_i32_0 = arith.constant 0 : i32
    %c0_i32_1 = arith.constant 0 : i32
    return %c0_i32, %c0_i32_0 : i32, i32
  }
  func.func @transform_4(%arg0: i32, %arg1: memref<16xi32, #tpu.memory_space<smem>>) -> (i32, i32) {
    %c0_i32 = arith.constant 0 : i32
    %c0_i32_0 = arith.constant 0 : i32
    %c0_i32_1 = arith.constant 0 : i32
    return %c0_i32, %c0_i32_0 : i32, i32
  }
  func.func @transform_5(%arg0: i32, %arg1: memref<16xi32, #tpu.memory_space<smem>>) -> (i32, i32) {
    %c0_i32 = arith.constant 0 : i32
    %c0_i32_0 = arith.constant 0 : i32
    %c0_i32_1 = arith.constant 0 : i32
    return %c0_i32, %c0_i32_0 : i32, i32
  }
  func.func @transform_6(%arg0: i32, %arg1: memref<16xi32, #tpu.memory_space<smem>>) -> (i32, i32) {
    %c0_i32 = arith.constant 0 : i32
    %c0_i32_0 = arith.constant 0 : i32
    %c0_i32_1 = arith.constant 0 : i32
    return %c0_i32, %c0_i32_0 : i32, i32
  }
  func.func @transform_7(%arg0: i32, %arg1: memref<16xi32, #tpu.memory_space<smem>>) -> (i32, i32) {
    %c0_i32 = arith.constant 0 : i32
    %c0_i32_0 = arith.constant 0 : i32
    %c0_i32_1 = arith.constant 0 : i32
    return %c0_i32, %c0_i32_0 : i32, i32
  }
  func.func @transform_8(%arg0: i32, %arg1: memref<16xi32, #tpu.memory_space<smem>>) -> (i32, i32) {
    %c0_i32 = arith.constant 0 : i32
    %c0_i32_0 = arith.constant 0 : i32
    %c0_i32_1 = arith.constant 0 : i32
    return %c0_i32, %c0_i32_0 : i32, i32
  }
  func.func @transform_9(%arg0: i32, %arg1: memref<16xi32, #tpu.memory_space<smem>>) -> (i32, i32) {
    %c0_i32 = arith.constant 0 : i32
    %c0_i32_0 = arith.constant 0 : i32
    %c0_i32_1 = arith.constant 0 : i32
    return %c0_i32, %c0_i32_0 : i32, i32
  }
  func.func @transform_10(%arg0: i32, %arg1: memref<16xi32, #tpu.memory_space<smem>>) -> (i32, i32) {
    %c0_i32 = arith.constant 0 : i32
    %c0_i32_0 = arith.constant 0 : i32
    %c0_i32_1 = arith.constant 0 : i32
    return %c0_i32, %c0_i32_0 : i32, i32
  }
  func.func @transform_11(%arg0: i32, %arg1: memref<16xi32, #tpu.memory_space<smem>>) -> (i32, i32) {
    %c0_i32 = arith.constant 0 : i32
    %c0_i32_0 = arith.constant 0 : i32
    %c0_i32_1 = arith.constant 0 : i32
    return %c0_i32, %c0_i32_0 : i32, i32
  }
  func.func @transform_12(%arg0: i32, %arg1: memref<16xi32, #tpu.memory_space<smem>>) -> (i32, i32) {
    %c0_i32 = arith.constant 0 : i32
    %c0_i32_0 = arith.constant 0 : i32
    %c0_i32_1 = arith.constant 0 : i32
    return %c0_i32, %c0_i32_0 : i32, i32
  }
  func.func @transform_13(%arg0: i32, %arg1: memref<16xi32, #tpu.memory_space<smem>>) -> (i32, i32) {
    %c0_i32 = arith.constant 0 : i32
    %c0_i32_0 = arith.constant 0 : i32
    %c0_i32_1 = arith.constant 0 : i32
    return %c0_i32, %c0_i32_0 : i32, i32
  }
  func.func @transform_14(%arg0: i32, %arg1: memref<16xi32, #tpu.memory_space<smem>>) -> (i32, i32) {
    %c0_i32 = arith.constant 0 : i32
    %c0_i32_0 = arith.constant 0 : i32
    %c0_i32_1 = arith.constant 0 : i32
    return %c0_i32, %c0_i32_0 : i32, i32
  }
  func.func @transform_15(%arg0: i32, %arg1: memref<16xi32, #tpu.memory_space<smem>>) -> (i32, i32) {
    %c0_i32 = arith.constant 0 : i32
    %c0_i32_0 = arith.constant 0 : i32
    %c0_i32_1 = arith.constant 0 : i32
    return %c0_i32, %c0_i32_0 : i32, i32
  }
  func.func @transform_16(%arg0: i32, %arg1: memref<16xi32, #tpu.memory_space<smem>>) -> (i32, i32) {
    %c0_i32 = arith.constant 0 : i32
    %c0_i32_0 = arith.constant 0 : i32
    %c0_i32_1 = arith.constant 0 : i32
    return %c0_i32, %c0_i32_0 : i32, i32
  }
  func.func @transform_17(%arg0: i32, %arg1: memref<16xi32, #tpu.memory_space<smem>>) -> (i32, i32) {
    %c0_i32 = arith.constant 0 : i32
    %c0_i32_0 = arith.constant 0 : i32
    %c0_i32_1 = arith.constant 0 : i32
    return %c0_i32, %c0_i32_0 : i32, i32
  }
  func.func @transform_18(%arg0: i32, %arg1: memref<16xi32, #tpu.memory_space<smem>>) -> (i32, i32) {
    %c0_i32 = arith.constant 0 : i32
    %c0_i32_0 = arith.constant 0 : i32
    %c0_i32_1 = arith.constant 0 : i32
    return %c0_i32, %c0_i32_0 : i32, i32
  }
  func.func @transform_19(%arg0: i32, %arg1: memref<16xi32, #tpu.memory_space<smem>>) -> (i32, i32) {
    %c0_i32 = arith.constant 0 : i32
    %c0_i32_0 = arith.constant 0 : i32
    %c0_i32_1 = arith.constant 0 : i32
    return %c0_i32, %c0_i32_0 : i32, i32
  }
  func.func @transform_20(%arg0: i32, %arg1: memref<16xi32, #tpu.memory_space<smem>>) -> (i32, i32) {
    %c0_i32 = arith.constant 0 : i32
    %c0_i32_0 = arith.constant 0 : i32
    %c0_i32_1 = arith.constant 0 : i32
    return %c0_i32, %c0_i32_0 : i32, i32
  }
  func.func @transform_21(%arg0: i32, %arg1: memref<16xi32, #tpu.memory_space<smem>>) -> (i32, i32) {
    %c0_i32 = arith.constant 0 : i32
    %c0_i32_0 = arith.constant 0 : i32
    %c0_i32_1 = arith.constant 0 : i32
    return %c0_i32, %c0_i32_0 : i32, i32
  }
  func.func @transform_22(%arg0: i32, %arg1: memref<16xi32, #tpu.memory_space<smem>>) -> (i32, i32) {
    %c0_i32 = arith.constant 0 : i32
    %c0_i32_0 = arith.constant 0 : i32
    %c0_i32_1 = arith.constant 0 : i32
    return %c0_i32, %c0_i32_0 : i32, i32
  }
  func.func @transform_23(%arg0: i32, %arg1: memref<16xi32, #tpu.memory_space<smem>>) -> (i32, i32) {
    %c0_i32 = arith.constant 0 : i32
    %c0_i32_0 = arith.constant 0 : i32
    %c0_i32_1 = arith.constant 0 : i32
    return %c0_i32, %c0_i32_0 : i32, i32
  }
  func.func @transform_24(%arg0: i32, %arg1: memref<16xi32, #tpu.memory_space<smem>>) -> (i32, i32) {
    %c0_i32 = arith.constant 0 : i32
    %c0_i32_0 = arith.constant 0 : i32
    %c0_i32_1 = arith.constant 0 : i32
    return %c0_i32, %c0_i32_0 : i32, i32
  }
  func.func @transform_25(%arg0: i32, %arg1: memref<16xi32, #tpu.memory_space<smem>>) -> (i32, i32) {
    %c0_i32 = arith.constant 0 : i32
    %c0_i32_0 = arith.constant 0 : i32
    %c0_i32_1 = arith.constant 0 : i32
    return %c0_i32, %c0_i32_0 : i32, i32
  }
  func.func @transform_26(%arg0: i32, %arg1: memref<16xi32, #tpu.memory_space<smem>>) -> (i32, i32) {
    %c0_i32 = arith.constant 0 : i32
    %c0_i32_0 = arith.constant 0 : i32
    %c0_i32_1 = arith.constant 0 : i32
    return %c0_i32, %c0_i32_0 : i32, i32
  }
  func.func @transform_27(%arg0: i32, %arg1: memref<16xi32, #tpu.memory_space<smem>>) -> (i32, i32) {
    %c0_i32 = arith.constant 0 : i32
    %c0_i32_0 = arith.constant 0 : i32
    %c0_i32_1 = arith.constant 0 : i32
    return %c0_i32, %c0_i32_0 : i32, i32
  }
}

</mosaic_0001>

<bundles_post_ra>
// kernel: simple_transformer_forward.1
= control target key start
LH: loop header
LB: loop body
LE: loop exit
PB: predicated region body
PF: predicated region fallthrough
CT: control target
= control target key end

     0   :  { %s4798_s30 = smov [#allocation4]   ;;  %s5460_s0 = inlined_call_operand.vmem [shape: s32[16], index: 0, kind: input, shape index: {}]   ;;  %s5461_s1 = inlined_call_operand.hbm [shape: f32[512,128], index: 1, kind: input, shape index: {}]   ;;  %s5462_s2 = inlined_call_operand.hbm [shape: bf16[128,384], index: 2, kind: input, shape index: {}]   ;;  %s5463_s3 = inlined_call_operand.vmem [shape: f32[1,384], index: 3, kind: input, shape index: {}]   ;;  %s5464_s4 = inlined_call_operand.hbm [shape: bf16[128,128], index: 4, kind: input, shape index: {}]   ;;  %s5465_s5 = inlined_call_operand.vmem [shape: f32[1,128], index: 5, kind: input, shape index: {}]   ;;  %s5466_s6 = inlined_call_operand.vmem [shape: f32[1,128], index: 6, kind: input, shape index: {}]   ;;  %s5467_s7 = inlined_call_operand.hbm [shape: f32[1,128], index: 7, kind: input, shape index: {}]   ;;  %s5468_s8 = inlined_call_operand.hbm [shape: bf16[128,256], index: 8, kind: input, shape index: {}]   ;;  %s5469_s9 = inlined_call_operand.hbm [shape: f32[1,256], index: 9, kind: input, shape index: {}]   ;;  %s5470_s10 = inlined_call_operand.hbm [shape: bf16[256,128], index: 10, kind: input, shape index: {}]   ;;  %s5471_s11 = inlined_call_operand.hbm [shape: f32[1,128], index: 11, kind: input, shape index: {}]   ;;  %s5472_s12 = inlined_call_operand.vmem [shape: f32[1,128], index: 12, kind: input, shape index: {}]   ;;  %s5473_s13 = inlined_call_operand.hbm [shape: f32[1,128], index: 13, kind: input, shape index: {}]   ;;  %s5474_s14 = inlined_call_operand.hbm [shape: bf16[128,384], index: 14, kind: input, shape index: {}]   ;;  %s5475_s15 = inlined_call_operand.vmem [shape: f32[1,384], index: 15, kind: input, shape index: {}]   ;;  %s5476_s16 = inlined_call_operand.hbm [shape: bf16[128,128], index: 16, kind: input, shape index: {}]   ;;  %s5477_s17 = inlined_call_operand.vmem [shape: f32[1,128], index: 17, kind: input, shape index: {}]   ;;  %s5478_s18 = inlined_call_operand.vmem [shape: f32[1,128], index: 18, kind: input, shape index: {}]   ;;  %s5479_s19 = inlined_call_operand.vmem [shape: f32[1,128], index: 19, kind: input, shape index: {}]   ;;  %s5480_s20 = inlined_call_operand.hbm [shape: bf16[128,256], index: 20, kind: input, shape index: {}]   ;;  %s5481_s21 = inlined_call_operand.vmem [shape: f32[1,256], index: 21, kind: input, shape index: {}]   ;;  %s5482_s22 = inlined_call_operand.hbm [shape: bf16[256,128], index: 22, kind: input, shape index: {}]   ;;  %s5483_s23 = inlined_call_operand.vmem [shape: f32[1,128], index: 23, kind: input, shape index: {}]   ;;  %s5484_s24 = inlined_call_operand.vmem [shape: f32[1,128], index: 24, kind: input, shape index: {}]   ;;  %s5485_s25 = inlined_call_operand.vmem [shape: f32[1,128], index: 25, kind: input, shape index: {}]   ;;  %s5486_s26 = inlined_call_operand.hbm [shape: bf16[128,512], index: 26, kind: input, shape index: {}]   ;;  %s5487_s27 = inlined_call_operand.hbm [shape: f32[1,512], index: 27, kind: input, shape index: {}]   ;;  %s5488_s28 = inlined_call_operand.hbm [shape: f32[16,512], index: 28, kind: output, shape index: {}]  }
   0x1   :  { %5489 = sst [smem:[#allocation40_spill]] %s5460_s0 }
   0x2   :  { %5490 = sst [smem:[#allocation41_spill]] %s5461_s1 }
   0x3   :  { %5491 = sst [smem:[#allocation42_spill]] %s5462_s2 }
   0x4   :  { %5492 = sst [smem:[#allocation43_spill]] %s5463_s3 }
   0x5   :  { %5493 = sst [smem:[#allocation44_spill]] %s5464_s4 }
   0x6   :  { %5494 = sst [smem:[#allocation45_spill]] %s5465_s5 }
   0x7   :  { %5495 = sst [smem:[#allocation46_spill]] %s5466_s6 }
   0x8   :  { %5496 = sst [smem:[#allocation47_spill]] %s5467_s7 }
   0x9   :  { %5497 = sst [smem:[#allocation48_spill]] %s5468_s8 }
   0xa   :  { %5498 = sst [smem:[#allocation49_spill]] %s5469_s9 }
   0xb   :  { %5499 = sst [smem:[#allocation50_spill]] %s5470_s10 }
   0xc   :  { %5500 = sst [smem:[#allocation51_spill]] %s5471_s11 }
   0xd   :  { %5501 = sst [smem:[#allocation52_spill]] %s5472_s12 }
   0xe   :  { %5502 = sst [smem:[#allocation53_spill]] %s5481_s21 }
   0xf   :  { %5503 = sst [smem:[#allocation54_spill]] %s5484_s24 }
  0x10   :  { %5504 = sst [smem:[#allocation55_spill]] %s5485_s25 }
  0x11   :  { %5505 = sst [smem:[#allocation56_spill]] %s5488_s28 }
  0x12   :  { %s5506_s9 = sld [smem:[#allocation40_spill]] }
  0x18   :  { %s34_s21 = sshll.u32 %s5506_s9, 4  ;;  %s35_s21 = int_to_ptr.vmem [resolvable:$true] %s34_s21 }
  0x19   :  { %37 = dma.vmem_to_smem %s35_s21, 16, %s4798_s30, [#allocation3] }
  0x1a   :  { %4778 = dma.done.wait [#allocation3], 16 }
  0x1b   :  { %4779 = vsyncadd [#allocation3], 4294967280 }
  0x1c   :  { %40 = sfence }
  0x1d   :  { %41 = vsyncpa [#allocation6], 0 }
  0x1e   :  { %42 = vsyncpa [#allocation9], 0 }
  0x1f   :  { %43 = vsyncpa [#allocation12], 0 }
  0x20   :  { %44 = vsyncpa [#allocation15], 0 }
  0x21   :  { %45 = vsyncpa [#allocation18], 0 }
  0x22   :  { %46 = vsyncpa [#allocation21], 0 }
  0x23   :  { %47 = vsyncpa [#allocation24], 0 }
  0x24   :  { %48 = vsyncpa [#allocation27], 0  ;;  %s5507_s10 = sld [smem:[#allocation42_spill]] }
  0x2a   :  { %s67_s0 = sshll.u32 %s5507_s10, 4  ;;  %s68_s0 = int_to_ptr.hbm [resolvable:$true] %s67_s0 }
  0x2b   :  { %49 = vsyncpa [#allocation7], 0  ;;  %s4799_s11 = smov [#allocation8]   ;;  %s5508_s7 = sld [smem:[#allocation47_spill]] }
  0x2c   :  { %s69_s29 = sshll.u32 %s4799_s11, 4  ;;  %s4800_s1 = smov 192   ;;  %s70_s29 = int_to_ptr.vmem [resolvable:$true] %s69_s29 }
  0x2d   :  { %s4801_s4 = smov 12   ;;  %s4802_s8 = smov [#allocation11]  }
  0x2e   :  { %75 = dma.hbm_to_vmem [thread:$0]  %s68_s0, 3072, %s70_s29, [#allocation9], %s4800_s1, %s4800_s1, %s4801_s4  }
  0x2f   :  { %s102_s5 = sshll.u32 %s4802_s8, 4  ;;  %s5509_s28 = sld [smem:[#allocation49_spill]]  ;;  %s103_s5 = int_to_ptr.vmem [resolvable:$true] %s102_s5 }
  0x30   :  { %s5510_s11 = sld [smem:[#allocation51_spill]]  ;;  %s4803_s24 = smov [#allocation14]  }
  0x31   :  { %s100_s12 = sshll.u32 %s5508_s7, 4  ;;  %s126_s21 = sshll.u32 %s4803_s24, 4  ;;  %s101_s12 = int_to_ptr.hbm [resolvable:$true] %s100_s12  ;;  %s127_s21 = int_to_ptr.vmem [resolvable:$true] %s126_s21 }
  0x32   :  { %105 = dma.hbm_to_vmem [thread:$0]  %s101_s12, 16, %s103_s5, [#allocation12]  }
  0x33   :  { %s4804_s0 = smov [#allocation17]   ;;  %s171_s8 = sshll.u32 %s5474_s14, 4  ;;  %s172_s8 = int_to_ptr.hbm [resolvable:$true] %s171_s8 }
  0x34   :  { %s150_s29 = sshll.u32 %s4804_s0, 4  ;;  %s205_s30 = sshll.u32 %s5480_s20, 4  ;;  %s151_s29 = int_to_ptr.vmem [resolvable:$true] %s150_s29  ;;  %s206_s30 = int_to_ptr.hbm [resolvable:$true] %s205_s30 }
  0x35   :  { %s124_s3 = sshll.u32 %s5509_s28, 4  ;;  %s4805_s28 = smov [#allocation20]   ;;  %s125_s3 = int_to_ptr.hbm [resolvable:$true] %s124_s3 }
  0x36   :  { %s148_s25 = sshll.u32 %s5510_s11, 4  ;;  %s173_s12 = sshll.u32 %s4805_s28, 4  ;;  %s149_s25 = int_to_ptr.hbm [resolvable:$true] %s148_s25  ;;  %s174_s12 = int_to_ptr.vmem [resolvable:$true] %s173_s12 }
  0x37   :  { %129 = dma.hbm_to_vmem [thread:$0]  %s125_s3, 32, %s127_s21, [#allocation15]  }
  0x38   :  { %153 = dma.hbm_to_vmem [thread:$0]  %s149_s25, 16, %s151_s29, [#allocation18]  }
  0x39   :  { %179 = dma.hbm_to_vmem [thread:$0]  %s172_s8, 3072, %s174_s12, [#allocation21], %s4800_s1, %s4800_s1, %s4801_s4  }
  0x3a   :  { %s4806_s24 = smov [#allocation23]   ;;  %s239_s11 = sshll.u32 %s5486_s26, 4  ;;  %s240_s11 = int_to_ptr.hbm [resolvable:$true] %s239_s11 }
  0x3b   :  { %s207_s3 = sshll.u32 %s4806_s24, 4  ;;  %s4807_s14 = smov 128   ;;  %s208_s3 = int_to_ptr.vmem [resolvable:$true] %s207_s3 }
  0x3c   :  { %s4808_s21 = smov 8   ;;  %s4809_s25 = smov [#allocation26]  }
  0x3d   :  { %213 = dma.hbm_to_vmem [thread:$0]  %s206_s30, 2048, %s208_s3, [#allocation24], %s4807_s14, %s4807_s14, %s4808_s21  }
  0x3e   :  { %s241_s0 = sshll.u32 %s4809_s25, 4  ;;  %s5511_s4 = sld [smem:[#allocation41_spill]]  ;;  %s242_s0 = int_to_ptr.vmem [resolvable:$true] %s241_s0 }
  0x3f   :  { %s4810_s2 = smov 256   ;;  %s4811_s7 = smov 16  }
  0x40   :  { %247 = dma.hbm_to_vmem [thread:$0]  %s240_s11, 4096, %s242_s0, [#allocation27], %s4810_s2, %s4810_s2, %s4811_s7  }
  0x41   :  { %s4812_s26 = smov [#allocation5]   ;;  %s5512_s5 = sld [smem:[#allocation44_spill]] }
  0x42   :  { %s56_s8 = sshll.u32 %s4812_s26, 4  ;;  %s4813_s30 = smov [#allocation10]   ;;  %s57_s8 = int_to_ptr.vmem [resolvable:$true] %s56_s8 }
  0x43   :  { %s84_s24 = sshll.u32 %s4813_s30, 4  ;;  %s5513_s10 = sld [smem:[#allocation48_spill]]  ;;  %s85_s24 = int_to_ptr.vmem [resolvable:$true] %s84_s24 }
  0x44   :  { %s54_s29 = sshll.u32 %s5511_s4, 4  ;;  %s4814_s25 = smov 64   ;;  %s55_s29 = int_to_ptr.hbm [resolvable:$true] %s54_s29 }
  0x45   :  { %62 = dma.hbm_to_vmem [thread:$0]  %s55_s29, 8192, %s57_s8, [#allocation6], %s4807_s14, %s4807_s14, %s4808_s21  }
  0x46   :  { %s4815_s0 = smov 4   ;;  %s4816_s20 = smov [#allocation13]  }
  0x47   :  { %s82_s9 = sshll.u32 %s5512_s5, 4  ;;  %s112_s1 = sshll.u32 %s4816_s20, 4  ;;  %s83_s9 = int_to_ptr.hbm [resolvable:$true] %s82_s9  ;;  %s113_s1 = int_to_ptr.vmem [resolvable:$true] %s112_s1 }
  0x48   :  { %90 = dma.hbm_to_vmem [thread:$0]  %s83_s9, 1024, %s85_s24, [#allocation9], %s4814_s25, %s4814_s25, %s4815_s0  }
  0x49   :  { %s110_s11 = sshll.u32 %s5513_s10, 4  ;;  %s5514_s7 = sld [smem:[#allocation50_spill]]  ;;  %s111_s11 = int_to_ptr.hbm [resolvable:$true] %s110_s11 }
  0x4a   :  { %118 = dma.hbm_to_vmem [thread:$0]  %s111_s11, 2048, %s113_s1, [#allocation12], %s4807_s14, %s4807_s14, %s4808_s21  }
  0x4b   :  { %s161_s28 = sshll.u32 %s5473_s13, 4  ;;  %s4817_s12 = smov [#allocation16]   ;;  %s162_s28 = int_to_ptr.hbm [resolvable:$true] %s161_s28 }
  0x4c   :  { %s136_s5 = sshll.u32 %s4817_s12, 4  ;;  %s4818_s9 = smov [#allocation19]   ;;  %s137_s5 = int_to_ptr.vmem [resolvable:$true] %s136_s5 }
  0x4d   :  { %s163_s30 = sshll.u32 %s4818_s9, 4  ;;  %s186_s6 = sshll.u32 %s5476_s16, 4  ;;  %s164_s30 = int_to_ptr.vmem [resolvable:$true] %s163_s30  ;;  %s187_s6 = int_to_ptr.hbm [resolvable:$true] %s186_s6 }
  0x4e   :  { %166 = dma.hbm_to_vmem [thread:$0]  %s162_s28, 16, %s164_s30, [#allocation18]  }
  0x4f   :  { %s134_s29 = sshll.u32 %s5514_s7, 4  ;;  %s220_s13 = sshll.u32 %s5482_s22, 4  ;;  %s135_s29 = int_to_ptr.hbm [resolvable:$true] %s134_s29  ;;  %s221_s13 = int_to_ptr.hbm [resolvable:$true] %s220_s13 }
  0x50   :  { %142 = dma.hbm_to_vmem [thread:$0]  %s135_s29, 2048, %s137_s5, [#allocation15], %s4814_s25, %s4814_s25, %s4815_s0  }
  0x51   :  { %s4819_s10 = smov [#allocation22]   ;;  %s4820_s20 = smov [#allocation25]  }
  0x52   :  { %s188_s11 = sshll.u32 %s4819_s10, 4  ;;  %s222_s1 = sshll.u32 %s4820_s20, 4  ;;  %s189_s11 = int_to_ptr.vmem [resolvable:$true] %s188_s11  ;;  %s223_s1 = int_to_ptr.vmem [resolvable:$true] %s222_s1 }
  0x53   :  { %194 = dma.hbm_to_vmem [thread:$0]  %s187_s6, 1024, %s189_s11, [#allocation21], %s4814_s25, %s4814_s25, %s4815_s0  }
  0x54   :  { %s253_s16 = sshll.u32 %s5487_s27, 4  ;;  %s4821_s22 = smov [#allocation28]   ;;  %s254_s16 = int_to_ptr.hbm [resolvable:$true] %s253_s16 }
  0x55   :  { %228 = dma.hbm_to_vmem [thread:$0]  %s221_s13, 2048, %s223_s1, [#allocation24], %s4814_s25, %s4814_s25, %s4815_s0  }
  0x56   :  { %s255_s7 = sshll.u32 %s4821_s22, 4  ;;  %s256_s7 = int_to_ptr.vmem [resolvable:$true] %s255_s7 }
  0x57   :  { %258 = dma.hbm_to_vmem [thread:$0]  %s254_s16, 64, %s256_s7, [#allocation27]  }
  0x58   :  { %4780 = dma.done.wait [#allocation6], 8192  }
  0x59   :  { %4781 = vsyncadd [#allocation6], 4294959104 }
  0x5a   :  { %4782 = dma.done.wait [#allocation9], 4096  }
  0x5b   :  { %4783 = vsyncadd [#allocation9], 4294963200 }
  0x5c   :  { %4784 = dma.done.wait [#allocation12], 2064  }
  0x5d   :  { %4785 = vsyncadd [#allocation12], 4294965232 }
  0x5e   :  { %4786 = dma.done.wait [#allocation15], 2080  }
  0x5f   :  { %4787 = vsyncadd [#allocation15], 4294965216 }
  0x60   :  { %4788 = dma.done.wait [#allocation18], 32  }
  0x61   :  { %4789 = vsyncadd [#allocation18], 4294967264 }
  0x62   :  { %4790 = dma.done.wait [#allocation21], 4096  }
  0x63   :  { %4791 = vsyncadd [#allocation21], 4294963200 }
  0x64   :  { %4792 = dma.done.wait [#allocation24], 4096  }
  0x65   :  { %4793 = vsyncadd [#allocation24], 4294963200 }
  0x66   :  { %4794 = dma.done.wait [#allocation27], 4160  }
  0x67   :  { %4795 = vsyncadd [#allocation27], 4294963136  ;;  %s5041_s27 = sld [smem:[#allocation4]]  ;;  %v3481_v0 = vld [vmem:[#allocation8 + $0xa8] sm:$0xf]  ;;  %vm613_vm0 = vcmask 261120  }
  0x68   :  { %s5043_s0 = sld [smem:[#allocation4 + $0x1]]  ;;  %v4121_v1 = vld [vmem:[#allocation8 + $0xb0] sm:$0xf0]  ;;  %v4120_v2 = vld [vmem:[#allocation8 + $0xac] sm:$0xf]  ;;  %vm640_vm1 = vcmask 64512  }
  0x69   :  { %v3482_v3 = vor.u32 %v4121_v1, %v3481_v0  ;;  %v3483_v4 = vld [vmem:[#allocation8 + $0xb4] sm:$0xf0]  ;;  %v3469_v5 = vld [vmem:[#allocation8 + $0x90] sm:$0xf]  ;;  %v4118_v6 = vld [vmem:[#allocation8 + $0x98] sm:$0xf0] }
  0x6a   :  { %v3486_v7 = vor.u32 %v4120_v2, %v3483_v4  ;;  %v4117_v8 = vld [vmem:[#allocation8 + $0x94] sm:$0xf]  ;;  %v3471_v9 = vld [vmem:[#allocation8 + $0x9c] sm:$0xf0]  ;;  %s5045_s29 = sld [smem:[#allocation4 + $0x2]]  ;;  %v3470_v10 = vor.u32 %v4118_v6, %v3469_v5 }
  0x6b   :  { %555 = vmatpush.bf16.msra.mxu0 %v3482_v3  ;;  %s5047_s26 = sld [smem:[#allocation4 + $0x3]]  ;;  %v3474_v11 = vor.u32 %v4117_v8, %v3471_v9  ;;  %v3457_v12 = vld [vmem:[#allocation8 + $0x78] sm:$0xf]  ;;  %v4115_v13 = vld [vmem:[#allocation8 + $0x80] sm:$0xf0] }
  0x6c   :  { %569 = vmatpush.bf16.msra.mxu1 %v3486_v7  ;;  %s5049_s8 = sld [smem:[#allocation4 + $0x4]]  ;;  %v4114_v14 = vld [vmem:[#allocation8 + $0x7c] sm:$0xf]  ;;  %v3459_v15 = vld [vmem:[#allocation8 + $0x84] sm:$0xf0]  ;;  %v3458_v16 = vor.u32 %v4115_v13, %v3457_v12 }
  0x6d   :  { %s5051_s28 = sld [smem:[#allocation4 + $0x5]]  ;;  %v3462_v17 = vor.u32 %v4114_v14, %v3459_v15  ;;  %v3445_v18 = vld [vmem:[#allocation8 + $0x60] sm:$0xf]  ;;  %v4112_v19 = vld [vmem:[#allocation8 + $0x68] sm:$0xf0]  ;;  %s321_s12 = scalar_lea.vmem [#allocation5], %s5041_s27 }
  0x6e   :  { %v4111_v20 = vld [vmem:[#allocation8 + $0x64] sm:$0xf]  ;;  %v3447_v21 = vld [vmem:[#allocation8 + $0x6c] sm:$0xf0]  ;;  %v3433_v22 = vld [vmem:[#allocation8 + $0x48] sm:$0xf]  ;;  %v3446_v24 = vor.u32 %v4112_v19, %v3445_v18 }
  0x6f   :  { %556 = vmatpush.bf16.msra.mxu0 %v3470_v10  ;;  %v4109_v23 = vld [vmem:[#allocation8 + $0x50] sm:$0xf0]  ;;  %v4108_v25 = vld [vmem:[#allocation8 + $0x4c] sm:$0xf]  ;;  %v3435_v26 = vld [vmem:[#allocation8 + $0x54] sm:$0xf0]  ;;  %v3450_v29 = vor.u32 %v4111_v20, %v3447_v21 }
  0x70   :  { %570 = vmatpush.bf16.msra.mxu1 %v3474_v11  ;;  %v322_v27 = vld [vmem:[%s321_s12] sm:$0x1]  ;;  %s325_s5 = scalar_lea.vmem [#allocation5], %s5043_s0  ;;  %s329_s9 = scalar_lea.vmem [#allocation5], %s5045_s29  ;;  %v4106_v33 = vld [vmem:[#allocation8 + $0x38] sm:$0xf0]  ;;  %v3434_v36 = vor.u32 %v4109_v23, %v3433_v22  ;;  %v3438_v39 = vor.u32 %v4108_v25, %v3435_v26 }
  0x71   :  { %v326_v28 = vld [vmem:[%s325_s5] sm:$0x1]  ;;  %323 = vst [vmem:[#allocation2] sm:$0x1] %v322_v27  ;;  %s333_s30 = scalar_lea.vmem [#allocation5], %s5047_s26  ;;  %s5059_s6 = sld [smem:[#allocation4 + $0x6]] }
  0x72   :  { %v330_v30 = vld [vmem:[%s329_s9] sm:$0x1]  ;;  %327 = vst [vmem:[#allocation2 + $0x1] sm:$0x1] %v326_v28  ;;  %s337_s24 = scalar_lea.vmem [#allocation5], %s5049_s8  ;;  %s5061_s14 = sld [smem:[#allocation4 + $0x7]] }
  0x73   :  { %557 = vmatpush.bf16.msra.mxu0 %v3458_v16  ;;  %v334_v31 = vld [vmem:[%s333_s30] sm:$0x1]  ;;  %331 = vst [vmem:[#allocation2 + $0x2] sm:$0x1] %v330_v30  ;;  %s341_s3 = scalar_lea.vmem [#allocation5], %s5051_s28  ;;  %s5063_s21 = sld [smem:[#allocation4 + $0x8]] }
  0x74   :  { %571 = vmatpush.bf16.msra.mxu1 %v3462_v17  ;;  %v3421_v32 = vld [vmem:[#allocation8 + $0x30] sm:$0xf]  ;;  %v4105_v37 = vld [vmem:[#allocation8 + $0x34] sm:$0xf]  ;;  %v3423_v38 = vld [vmem:[#allocation8 + $0x3c] sm:$0xf0] }
  0x75   :  { %v338_v34 = vld [vmem:[%s337_s24] sm:$0x1]  ;;  %335 = vst [vmem:[#allocation2 + $0x3] sm:$0x1] %v334_v31  ;;  %v4122_v41 = vld [vmem:[#allocation8 + $0xb8] sm:$0xf0]  ;;  %v3422_v46 = vor.u32 %v4106_v33, %v3421_v32  ;;  %v3426_v49 = vor.u32 %v4105_v37, %v3423_v38 }
  0x76   :  { %v342_v35 = vld [vmem:[%s341_s3] sm:$0x1]  ;;  %339 = vst [vmem:[#allocation2 + $0x4] sm:$0x1] %v338_v34  ;;  %v3409_v42 = vld [vmem:[#allocation8 + $0x18] sm:$0xf] }
  0x77   :  { %558 = vmatpush.bf16.msra.mxu0 %v3446_v24  ;;  %v3489_v40 = vld [vmem:[#allocation8 + $0xb0] sm:$0xf]  ;;  %343 = vst [vmem:[#allocation2 + $0x5] sm:$0x1] %v342_v35  ;;  %s5065_s13 = sld [smem:[#allocation4 + $0x9]]  ;;  %s345_s1 = scalar_lea.vmem [#allocation5], %s5059_s6 }
  0x78   :  { %572 = vmatpush.bf16.msra.mxu1 %v3450_v29  ;;  %v3490_v43 = vor.u32 %v4122_v41, %v3489_v40  ;;  %v3477_v44 = vld [vmem:[#allocation8 + $0x98] sm:$0xf]  ;;  %v4119_v45 = vld [vmem:[#allocation8 + $0xa0] sm:$0xf0]  ;;  %v4102_v48 = vld [vmem:[#allocation8 + $0x1c] sm:$0xf] }
  0x79   :  { %v4103_v47 = vld [vmem:[#allocation8 + $0x20] sm:$0xf0]  ;;  %s5067_s10 = sld [smem:[#allocation4 + $0xa]]  ;;  %v3411_v50 = vld [vmem:[#allocation8 + $0x24] sm:$0xf0]  ;;  %v3478_v51 = vor.u32 %v4119_v45, %v3477_v44  ;;  %s349_s2 = scalar_lea.vmem [#allocation5], %s5061_s14 }
  0x7a   :  { %s5069_s11 = sld [smem:[#allocation4 + $0xb]]  ;;  %583 = vmatpush.bf16.msra.mxu2 %v3490_v43  ;;  %v3465_v52 = vld [vmem:[#allocation8 + $0x80] sm:$0xf]  ;;  %v4116_v53 = vld [vmem:[#allocation8 + $0x88] sm:$0xf0]  ;;  %v3410_v57 = vor.u32 %v4103_v47, %v3409_v42  ;;  %v3414_v63 = vor.u32 %v4102_v48, %v3411_v50  ;;  %s353_s16 = scalar_lea.vmem [#allocation5], %s5063_s21 }
  0x7b   :  { %559 = vmatpush.bf16.msra.mxu0 %v3434_v36  ;;  %s5071_s20 = sld [smem:[#allocation4 + $0xc]]  ;;  %v3397_v54 = vld [vmem:[#allocation8] sm:$0xf]  ;;  %v4100_v55 = vld [vmem:[#allocation8 + $0x8] sm:$0xf0]  ;;  %v3466_v1 = vor.u32 %v4116_v53, %v3465_v52  ;;  %s4822_s24 = smov 96  }
  0x7c   :  { %573 = vmatpush.bf16.msra.mxu1 %v3438_v39  ;;  %v346_v56 = vld [vmem:[%s345_s1] sm:$0x1]  ;;  %s5074_s4 = sld [smem:[#allocation4 + $0xd]]  ;;  %v4099_v58 = vld [vmem:[#allocation8 + $0x4] sm:$0xf]  ;;  %v3398_v4 = vor.u32 %v4100_v55, %v3397_v54  ;;  %s4823_s3 = smov 32  }
  0x7d   :  { %v3399_v59 = vld [vmem:[#allocation8 + $0xc] sm:$0xf0]  ;;  %347 = vst [vmem:[#allocation2 + $0x6] sm:$0x1] %v346_v56  ;;  %v3453_v61 = vld [vmem:[#allocation8 + $0x68] sm:$0xf] }
  0x7e   :  { %v350_v60 = vld [vmem:[%s349_s2] sm:$0x1]  ;;  %v4113_v62 = vld [vmem:[#allocation8 + $0x70] sm:$0xf0]  ;;  %584 = vmatpush.bf16.msra.mxu2 %v3478_v51  ;;  %s357_s22 = scalar_lea.vmem [#allocation5], %s5065_s13  ;;  %v3402_v7 = vor.u32 %v4099_v58, %v3399_v59  ;;  %s3393_s26 = sld [smem:[#allocation4 + $0xe]] }
  0x7f   :  { %560 = vmatpush.bf16.msra.mxu0 %v3422_v46  ;;  %351 = vst [vmem:[#allocation2 + $0x7] sm:$0x1] %v350_v60  ;;  %v354_v0 = vld [vmem:[%s353_s16] sm:$0x1]  ;;  %s361_s7 = scalar_lea.vmem [#allocation5], %s5067_s10  ;;  %v3454_v9 = vor.u32 %v4113_v62, %v3453_v61  ;;  %s3394_s8 = sld [smem:[#allocation4 + $0xf]] }
  0x80   :  { %574 = vmatpush.bf16.msra.mxu1 %v3426_v49  ;;  %355 = vst [vmem:[#allocation2 + $0x8] sm:$0x1] %v354_v0  ;;  %v358_v2 = vld [vmem:[%s357_s22] sm:$0x1]  ;;  %s365_s27 = scalar_lea.vmem [#allocation5], %s5069_s11  ;;  %s5515_s30 = sld [smem:[#allocation43_spill]] }
  0x81   :  { %359 = vst [vmem:[#allocation2 + $0x9] sm:$0x1] %v358_v2  ;;  %v362_v3 = vld [vmem:[%s361_s7] sm:$0x1]  ;;  %s369_s0 = scalar_lea.vmem [#allocation5], %s5071_s20  ;;  %v5137_v0 = vld [vmem:[#allocation10 + $0x8] sm:$0xff] }
  0x82   :  { %363 = vst [vmem:[#allocation2 + $0xa] sm:$0x1] %v362_v3  ;;  %v366_v5 = vld [vmem:[%s365_s27] sm:$0x1]  ;;  %585 = vmatpush.bf16.msra.mxu2 %v3466_v1  ;;  %s373_s29 = scalar_lea.vmem [#allocation5], %s5074_s4  ;;  %v5140_v1 = vld [vmem:[#allocation10] sm:$0xff] }
  0x83   :  { %561 = vmatpush.bf16.msra.mxu0 %v3410_v57  ;;  %v3441_v6 = vld [vmem:[#allocation8 + $0x50] sm:$0xf]  ;;  %367 = vst [vmem:[#allocation2 + $0xb] sm:$0x1] %v366_v5  ;;  %v4110_v11 = vld [vmem:[#allocation8 + $0x58] sm:$0xf0] }
  0x84   :  { %575 = vmatpush.bf16.msra.mxu1 %v3414_v63  ;;  %v370_v8 = vld [vmem:[%s369_s0] sm:$0x1]  ;;  %v3442_v12 = vor.u32 %v4110_v11, %v3441_v6  ;;  %v3429_v13 = vld [vmem:[#allocation8 + $0x38] sm:$0xf]  ;;  %v4107_v14 = vld [vmem:[#allocation8 + $0x40] sm:$0xf0] }
  0x85   :  { %371 = vst [vmem:[#allocation2 + $0xc] sm:$0x1] %v370_v8  ;;  %v374_v10 = vld [vmem:[%s373_s29] sm:$0x1]  ;;  %v3417_v15 = vld [vmem:[#allocation8 + $0x20] sm:$0xf]  ;;  %v3430_v18 = vor.u32 %v4107_v14, %v3429_v13 }
  0x86   :  { %375 = vst [vmem:[#allocation2 + $0xd] sm:$0x1] %v374_v10  ;;  %586 = vmatpush.bf16.msra.mxu2 %v3454_v9  ;;  %v4104_v16 = vld [vmem:[#allocation8 + $0x28] sm:$0xf0]  ;;  %s377_s28 = scalar_lea.vmem [#allocation5], %s3393_s26  ;;  %s381_s12 = scalar_lea.vmem [#allocation5], %s3394_s8 }
  0x87   :  { %562 = vmatpush.bf16.msra.mxu0 %v3398_v4  ;;  %v378_v17 = vld [vmem:[%s377_s28] sm:$0x1]  ;;  %v3418_v20 = vor.u32 %v4104_v16, %v3417_v15  ;;  %v3405_v21 = vld [vmem:[#allocation8 + $0x8] sm:$0xf]  ;;  %v4101_v22 = vld [vmem:[#allocation8 + $0x10] sm:$0xf0] }
  0x88   :  { %576 = vmatpush.bf16.msra.mxu1 %v3402_v7  ;;  %379 = vst [vmem:[#allocation2 + $0xe] sm:$0x1] %v378_v17  ;;  %v382_v19 = vld [vmem:[%s381_s12] sm:$0x1]  ;;  %v3406_v25 = vor.u32 %v4101_v22, %v3405_v21  ;;  %v5142_v2 = vld [vmem:[#allocation10 + $0x38] sm:$0xff]  ;;  %s5516_s21 = sld [smem:[#allocation45_spill]] }
  0x89   :  { %383 = vst [vmem:[#allocation2 + $0xf] sm:$0x1] %v382_v19  ;;  %v5083_v23 = vld [vmem:[#allocation2] sm:$0xff]  ;;  %s5517_s11 = sld [smem:[#allocation46_spill]]  ;;  %s4826_s10 = smov 512  }
  0x8a   :  { %587 = vmatpush.bf16.msra.mxu2 %v3442_v12  ;;  %v5092_v27 = vld [vmem:[%s5515_s30] sm:$0x7]  ;;  %s5518_s4 = sld [smem:[#allocation52_spill]]  ;;  %s4825_s30 = smov [#allocation29]  }
  0x8b   :  { %v422_v28 = vperm.slane %v5092_v27, 1  ;;  %v421_v29 = vperm.slane %v5092_v27, 0  ;;  %v423_v34 = vperm.slane %v5092_v27, 2  ;;  %792 = vmatpush.bf16.msrb.mxu0 %v5137_v0  ;;  %v5146_v4 = vld [vmem:[#allocation10 + $0x30] sm:$0xff]  ;;  %s5519_s0 = sld [smem:[#allocation53_spill]] }
  0x8c   :  { %s5520_s28 = sld [smem:[#allocation54_spill]] }
  0x8d   :  { %s5521_s9 = sld [smem:[#allocation55_spill]] }
  0x8e   :  { %588 = vmatpush.bf16.msra.mxu2 %v3430_v18 }
  0x8f   :  { %793 = vmatpush.bf16.msrb.mxu0 %v5140_v1 }
  0x90   :  { %v5085_v24 = vld [vmem:[#allocation2 + $0x8] sm:$0xff] }
  0x91   :  { %v386_v26 = vpack.c.bf16 %v5085_v24, %v5083_v23 }
  0x92   :  { %589 = vmatpush.bf16.msra.mxu2 %v3418_v20 }
  0x93   :  { %563 = vmatmul.bf16.vlgmr.msra.gmra.mxu0 %v386_v26  ;;  %577 = vmatmul.bf16.vlgmr.msra.gmra.mxu1 %v386_v26 }
  0x94   :  { %981 = vmatpush.bf16.msra.mxu0 %v5142_v2 }
  0x96   :  { %590 = vmatpush.bf16.msra.mxu2 %v3406_v25 }
  0x98   :  { %982 = vmatpush.bf16.msra.mxu0 %v5146_v4 }
  0x99   :  { %591 = vmatmul.bf16.vlgmr.msra.gmra.mxu2 %v386_v26 }
 0x110   :  { %v578_v30 = vpop.f32.mrf.mxu1  ;;  %v564_v32 = vpop.f32.mrf.mxu0 }
 0x111   :  { %v579_v31 = vadd.f32 %v578_v30, %v422_v28  ;;  %v565_v33 = vadd.f32 %v564_v32, %v421_v29 }
 0x113   :  { %801 = vrot.lane.b32.xlu2 %v579_v31, %s4814_s25  ;;  %678 = vrot.lane.b32.xlu1 %v579_v31, %s4822_s24 }
 0x114   :  { %3491 = vmatpush.xpose.msk.msra.mxu3 %vm613_vm0, %v579_v31 }
 0x117   :  { %3492 = vmatmul.msk.f32.vlgmr.msra.gmra.mxu3 %vm613_vm0, %v565_v33 }
 0x118   :  { %v580_v42 = vpop.f32.mrf.mxu1  ;;  %v566_v62 = vpop.f32.mrf.mxu0 }
 0x119   :  { %v5121_v58 = vadd.f32 %v580_v42, %v422_v28  ;;  %v5133_v63 = vadd.f32 %v566_v62, %v421_v29 }
 0x11b   :  { %799 = vrot.lane.b32.xlu2 %v565_v33, %s4814_s25  ;;  %676 = vrot.lane.b32.xlu1 %v565_v33, %s4822_s24 }
 0x11c   :  { %v592_v35 = vpop.f32.mrf.mxu2 }
 0x11d   :  { %v5108_v36 = vadd.f32 %v592_v35, %v423_v34 }
 0x11f   :  { %670 = vmatpush.msrb.mxu3 %v5108_v36 }
 0x123   :  { %894 = vrot.lane.b32.xlu1 %v565_v33, %s4823_s3  ;;  %v4126_v33 = vld [vmem:[#allocation10 + $0x18] sm:$0xff] }
 0x16d   :  { %v802_v37 = vpop.permute.xlu2 %801 }
 0x16e   :  { %3515 = vmatpush.xpose.msk.msrb.mxu1 %vm613_vm0, %v802_v37 }
 0x175   :  { %v800_v38 = vpop.permute.xlu2 %799 }
 0x176   :  { %3516 = vmatmul.msk.f32.vlgmr.msrb.gmra.mxu1 %vm613_vm0, %v800_v38  ;;  %v4128_v38 = vld [vmem:[#allocation10 + $0x28] sm:$0xff] }
 0x185   :  { %v679_v39 = vpop.permute.xlu1 %678 }
 0x186   :  { %3494 = vmatpush.xpose.msk.msra.mxu3 %vm613_vm0, %v679_v39 }
 0x18d   :  { %v677_v50 = vpop.permute.xlu1 %676 }
 0x195   :  { %v895_v51 = vpop.permute.xlu1 %894 }
 0x19a   :  { %v637_v40 = vpop.f32.mrf.mxu3 }
 0x19b   :  { %v641_v41 = vsel %vm640_vm1, %v637_v40, -inf }
 0x19c   :  { %642 = vmax.xlane.f32.xlu0 %v641_v41 }
 0x1f3   :  { %v824_v43 = vpop.f32.mrf.mxu1 }
 0x1f4   :  { %v827_v44 = vsel %vm640_vm1, %v824_v43, -inf }
 0x1f5   :  { %828 = vmax.xlane.f32.xlu1 %v827_v44  ;;  %v4127_v44 = vld [vmem:[#allocation10 + $0x20] sm:$0xff] }
 0x20f   :  { %v643_v45 = vpop.xlane.xlu0 %642 }
 0x210   :  { %v644_v46 = vsub.f32 %v637_v40, %v643_v45  ;;  %v594_v40 = vpop.f32.mrf.mxu2 }
 0x212   :  { %v645_v47 = vmul.f32 1.442695, %v644_v46 }
 0x214   :  { %4300 = vpow2.f32 %v645_v47 }
 0x21a   :  { %v4301_v48 = vpop.eup %4300 }
 0x21b   :  { %v647_v49 = vsel %vm640_vm1, %v4301_v48, 0.0 }
 0x21c   :  { %648 = vadd.xlane.f32.xlu0 %v647_v49 }
 0x230   :  { %896 = vrot.lane.b32.xlu0 %v579_v31, %s4823_s3 }
 0x268   :  { %v829_v52 = vpop.xlane.xlu1 %828 }
 0x269   :  { %v830_v53 = vsub.f32 %v824_v43, %v829_v52  ;;  %v5171_v43 = vadd.f32 %v594_v40, %v423_v34  ;;  %v4824_v40 = vmov 128.0  }
 0x26b   :  { %v831_v54 = vmul.f32 1.442695, %v830_v53 }
 0x26d   :  { %4302 = vpow2.f32 %v831_v54 }
 0x273   :  { %v4303_v55 = vpop.eup %4302 }
 0x274   :  { %v833_v56 = vsel %vm640_vm1, %v4303_v55, 0.0 }
 0x275   :  { %834 = vadd.xlane.f32.xlu1 %v833_v56 }
 0x28e   :  { %838 = vrot.lane.b32.xlu1 %v5108_v36, %s4814_s25 }
 0x28f   :  { %v649_v57 = vpop.xlane.xlu0 %648 }
 0x290   :  { %4304 = vrcp.f32 %v649_v57 }
 0x296   :  { %v4305_v59 = vpop.eup %4304  ;;  %1151 = vrot.lane.b32.xlu1 %v5121_v58, %s4814_s25 }
 0x297   :  { %v651_v60 = vmul.f32 %v4305_v59, %v4301_v48 }
 0x299   :  { %3493 = vmatmul.msk.f32.vlgmr.msrb.gmra.mxu3 %vm640_vm1, %v651_v60 }
 0x2a1   :  { %3495 = vmatmul.msk.f32.vlgmr.msra.gmra.mxu3 %vm613_vm0, %v677_v50 }
 0x2a2   :  { %v897_v61 = vpop.permute.xlu0 %896 }
 0x2a3   :  { %3527 = vmatpush.xpose.msk.msra.mxu1 %vm613_vm0, %v897_v61 }
 0x2a6   :  { %3528 = vmatmul.msk.f32.vlgmr.msra.gmra.mxu1 %vm613_vm0, %v895_v51 }
 0x2a7   :  { %3539 = vmatpush.xpose.msk.msrb.mxu1 %vm613_vm0, %v5121_v58 }
 0x2ae   :  { %3540 = vmatmul.msk.f32.vlgmr.msrb.gmra.mxu1 %vm613_vm0, %v5133_v63 }
 0x2e8   :  { %v835_v3 = vpop.xlane.xlu1 %834 }
 0x2e9   :  { %4306 = vrcp.f32 %v835_v3 }
 0x2ef   :  { %v4307_v5 = vpop.eup %4306 }
 0x2f0   :  { %v837_v7 = vmul.f32 %v4307_v5, %v4303_v55 }
 0x300   :  { %v839_v6 = vpop.permute.xlu1 %838 }
 0x301   :  { %859 = vmatpush.msrb.mxu2 %v839_v6 }
 0x302   :  { %3517 = vmatmul.msk.f32.vlgmr.msrb.gmra.mxu2 %vm640_vm1, %v837_v7 }
 0x308   :  { %v1152_v10 = vpop.permute.xlu1 %1151 }
 0x31c   :  { %v672_v8 = vpop.f32.mrf.mxu3 }
 0x31d   :  { %v675_v9 = vpack.c.bf16 %v672_v8, %v672_v8 }
 0x31f   :  { %3514 = vmatmul.msk.bf16.vlgmr.msrb.gmra.mxu0 %vm613_vm0, %v675_v9 }
 0x320   :  { %3547 = vmatpush.xpose.msk.msrb.mxu0 %vm613_vm0, %v1152_v10 }
 0x323   :  { %v919_v11 = vpop.f32.mrf.mxu1 }
 0x324   :  { %v701_v12 = vpop.f32.mrf.mxu3  ;;  %v922_v13 = vsel %vm640_vm1, %v919_v11, -inf }
 0x325   :  { %923 = vmax.xlane.f32.xlu0 %v922_v13  ;;  %v704_v14 = vsel %vm640_vm1, %v701_v12, -inf }
 0x326   :  { %705 = vmax.xlane.f32.xlu2 %v704_v14 }
 0x385   :  { %v861_v47 = vpop.f32.mrf.mxu2 }
 0x386   :  { %v864_v49 = vpack.c.bf16 %v861_v47, %v861_v47 }
 0x398   :  { %v924_v15 = vpop.xlane.xlu0 %923 }
 0x399   :  { %v925_v16 = vsub.f32 %v919_v11, %v924_v15  ;;  %v706_v17 = vpop.xlane.xlu2 %705 }
 0x39a   :  { %v707_v18 = vsub.f32 %v701_v12, %v706_v17 }
 0x39b   :  { %v926_v19 = vmul.f32 1.442695, %v925_v16 }
 0x39c   :  { %v708_v20 = vmul.f32 1.442695, %v707_v18  ;;  %v5154_v21 = vpop.f32.mrf.mxu0 }
 0x39d   :  { %4308 = vpow2.f32 %v926_v19 }
 0x39e   :  { %4310 = vpow2.f32 %v708_v20 }
 0x3a3   :  { %v4309_v22 = vpop.eup %4308 }
 0x3a4   :  { %v4311_v25 = vpop.eup %4310  ;;  %v797_v26 = vpop.f32.mrf.mxu0  ;;  %v928_v28 = vsel %vm640_vm1, %v4309_v22, 0.0 }
 0x3a5   :  { %929 = vadd.xlane.f32.xlu0 %v928_v28  ;;  %v710_v29 = vsel %vm640_vm1, %v4311_v25, 0.0 }
 0x3a6   :  { %711 = vadd.xlane.f32.xlu2 %v710_v29 }
 0x3b9   :  { %933 = vrot.lane.b32.xlu0 %v5108_v36, %s4823_s3 }
 0x3be   :  { %716 = vrot.lane.b32.xlu2 %v5108_v36, %s4822_s24  ;;  %v4125_v36 = vld [vmem:[#allocation10 + $0x10] sm:$0xff] }
 0x3c6   :  { %1052 = vrot.lane.b32.xlu2 %v5121_v58, %s4822_s24 }
 0x3ce   :  { %1050 = vrot.lane.b32.xlu2 %v5133_v63, %s4822_s24 }
 0x3d6   :  { %1149 = vrot.lane.b32.xlu2 %v5133_v63, %s4814_s25 }
 0x418   :  { %v930_v31 = vpop.xlane.xlu0 %929 }
 0x419   :  { %v712_v30 = vpop.xlane.xlu2 %711 }
 0x41a   :  { %4312 = vrcp.f32 %v712_v30  ;;  %v5206_v30 = vld [vmem:[%s5516_s21] ss:$0 sm:$0xff]  ;;  %s5522_s21 = sld [smem:[#allocation56_spill]] }
 0x41b   :  { %4314 = vrcp.f32 %v930_v31 }
 0x420   :  { %v4313_v32 = vpop.eup %4312  ;;  %s3344_s13 = sshll.u32 %s5522_s21, 4  ;;  %s3345_s13 = int_to_ptr.hbm [resolvable:$true] %s3344_s13 }
 0x421   :  { %v714_v35 = vmul.f32 %v4313_v32, %v4311_v25  ;;  %v717_v37 = vpop.permute.xlu2 %716  ;;  %v4315_v39 = vpop.eup %4314 }
 0x422   :  { %737 = vmatpush.msrb.mxu3 %v717_v37  ;;  %v932_v41 = vmul.f32 %v4315_v39, %v4309_v22 }
 0x423   :  { %3496 = vmatmul.msk.f32.vlgmr.msrb.gmra.mxu3 %vm640_vm1, %v714_v35 }
 0x424   :  { %764 = vmatpush.bf16.msra.mxu3 %v4126_v33 }
 0x428   :  { %765 = vmatpush.bf16.msra.mxu3 %v4125_v36 }
 0x429   :  { %v1053_v48 = vpop.permute.xlu2 %1052 }
 0x42b   :  { %v934_v42 = vpop.permute.xlu0 %933 }
 0x42c   :  { %886 = vmatpush.bf16.msrb.mxu3 %v4128_v38  ;;  %954 = vmatpush.msra.mxu2 %v934_v42 }
 0x42d   :  { %3529 = vmatmul.msk.f32.vlgmr.msra.gmra.mxu2 %vm640_vm1, %v932_v41 }
 0x42e   :  { %1044 = vmatpush.msrb.mxu2 %v5171_v43 }
 0x430   :  { %1126 = vmatpush.bf16.msra.mxu2 %v4126_v33  ;;  %887 = vmatpush.bf16.msrb.mxu3 %v4127_v44 }
 0x431   :  { %v1051_v50 = vpop.permute.xlu2 %1050 }
 0x434   :  { %1127 = vmatpush.bf16.msra.mxu2 %v4125_v36 }
 0x439   :  { %v1150_v51 = vpop.permute.xlu2 %1149 }
 0x4a6   :  { %v739_v45 = vpop.f32.mrf.mxu3 }
 0x4a7   :  { %v742_v46 = vpack.c.bf16 %v739_v45, %v739_v45 }
 0x4a9   :  { %3505 = vmatmul.msk.bf16.vlgmr.msra.gmra.mxu3 %vm613_vm0, %v742_v46 }
 0x4aa   :  { %3542 = vmatpush.xpose.msk.msra.mxu3 %vm613_vm0, %v1053_v48 }
 0x4b0   :  { %v956_v27 = vpop.f32.mrf.mxu2 }
 0x4b1   :  { %v959_v34 = vpack.c.bf16 %v956_v27, %v956_v27 }
 0x4b3   :  { %3538 = vmatmul.msk.bf16.vlgmr.msra.gmra.mxu0 %vm613_vm0, %v959_v34 }
 0x4b4   :  { %1224 = vmatpush.bf16.msra.mxu0 %v4128_v38 }
 0x4b8   :  { %1225 = vmatpush.bf16.msra.mxu0 %v4127_v44 }
 0x4b9   :  { %3526 = vmatmul.msk.bf16.vlgmr.msrb.gmra.mxu3 %vm613_vm0, %v864_v49 }
 0x4ba   :  { %1142 = vmatpush.bf16.msrb.mxu3 %v5137_v0 }
 0x4be   :  { %1143 = vmatpush.bf16.msrb.mxu3 %v5140_v1 }
 0x4c3   :  { %3548 = vmatmul.msk.f32.vlgmr.msrb.gmra.mxu0 %vm613_vm0, %v1150_v51 }
 0x4c9   :  { %3543 = vmatmul.msk.f32.vlgmr.msra.gmra.mxu3 %vm613_vm0, %v1051_v50 }
 0x4ca   :  { %1307 = vmatpush.bf16.msra.mxu3 %v5142_v2 }
 0x4ce   :  { %1308 = vmatpush.bf16.msra.mxu3 %v5146_v4 }
 0x52c   :  { %v767_v52 = vpop.f32.mrf.mxu3 }
 0x52d   :  { %v796_v56 = vadd.f32 %v5154_v21, %v767_v52 }
 0x530   :  { %v984_v53 = vpop.f32.mrf.mxu0 }
 0x534   :  { %v769_v54 = vpop.f32.mrf.mxu3 }
 0x538   :  { %v986_v55 = vpop.f32.mrf.mxu0 }
 0x53c   :  { %v889_v57 = vpop.f32.mrf.mxu3 }
 0x53d   :  { %v893_v59 = vadd.f32 %v889_v57, %v796_v56 }
 0x53f   :  { %v988_v60 = vadd.f32 %v984_v53, %v893_v59 }
 0x540   :  { %v1174_v61 = vpop.f32.mrf.mxu0 }
 0x541   :  { %v1177_v62 = vsel %vm640_vm1, %v1174_v61, -inf  ;;  %v1319_v32 = vadd.f32 %v5206_v30, %v988_v60 }
 0x542   :  { %1178 = vmax.xlane.f32.xlu1 %v1177_v62 }
 0x543   :  { %v1321_v33 = vadd.f32 %v1319_v32, %v5083_v23  ;;  %v3597_v32 = vld [vmem:[#allocation13 + $0x50] sm:$0xf] }
 0x544   :  { %v891_v0 = vpop.f32.mrf.mxu3 }
 0x54c   :  { %v1075_v1 = vpop.f32.mrf.mxu3 }
 0x54d   :  { %v1078_v3 = vsel %vm640_vm1, %v1075_v1, -inf }
 0x54e   :  { %1079 = vmax.xlane.f32.xlu0 %v1078_v3 }
 0x55b   :  { %1090 = vrot.lane.b32.xlu1 %v5171_v43, %s4822_s24 }
 0x563   :  { %1232 = vrot.lane.b32.xlu1 %v5133_v63, %s4823_s3  ;;  %v1012_v63 = vpop.f32.mrf.mxu1 }
 0x564   :  { %v1015_v14 = vsel %vm640_vm1, %v1012_v63, -inf }
 0x5b5   :  { %v1179_v2 = vpop.xlane.xlu1 %1178 }
 0x5b6   :  { %v1180_v4 = vsub.f32 %v1174_v61, %v1179_v2 }
 0x5b8   :  { %v1181_v5 = vmul.f32 1.442695, %v1180_v4 }
 0x5ba   :  { %4316 = vpow2.f32 %v1181_v5 }
 0x5c0   :  { %v4317_v6 = vpop.eup %4316 }
 0x5c1   :  { %v1080_v7 = vpop.xlane.xlu0 %1079  ;;  %v1183_v8 = vsel %vm640_vm1, %v4317_v6, 0.0 }
 0x5c2   :  { %v1081_v9 = vsub.f32 %v1075_v1, %v1080_v7  ;;  %1184 = vadd.xlane.f32.xlu0 %v1183_v8 }
 0x5c4   :  { %v1082_v10 = vmul.f32 1.442695, %v1081_v9 }
 0x5c6   :  { %4318 = vpow2.f32 %v1082_v10 }
 0x5cc   :  { %v4319_v11 = vpop.eup %4318 }
 0x5cd   :  { %v1091_v12 = vpop.permute.xlu1 %1090  ;;  %v1084_v13 = vsel %vm640_vm1, %v4319_v11, 0.0 }
 0x5ce   :  { %1111 = vmatpush.msra.mxu1 %v1091_v12  ;;  %1085 = vadd.xlane.f32.xlu2 %v1084_v13 }
 0x5d5   :  { %v1233_v22 = vpop.permute.xlu1 %1232 }
 0x5d6   :  { %1234 = vrot.lane.b32.xlu0 %v5121_v58, %s4823_s3 }
 0x5e6   :  { %1188 = vrot.lane.b32.xlu2 %v5171_v43, %s4814_s25 }
 0x600   :  { %1016 = vmax.xlane.f32.xlu0 %v1015_v14 }
 0x635   :  { %v1185_v16 = vpop.xlane.xlu0 %1184 }
 0x641   :  { %v1086_v15 = vpop.xlane.xlu2 %1085 }
 0x642   :  { %4320 = vrcp.f32 %v1086_v15  ;;  %v3613_v15 = vld [vmem:[#allocation13 + $0x70] sm:$0xf] }
 0x643   :  { %4322 = vrcp.f32 %v1185_v16  ;;  %v4146_v16 = vld [vmem:[#allocation13 + $0x74] sm:$0xf0] }
 0x648   :  { %v4321_v17 = vpop.eup %4320  ;;  %v1235_v20 = vpop.permute.xlu0 %1234 }
 0x649   :  { %v1088_v18 = vmul.f32 %v4321_v17, %v4319_v11  ;;  %v1189_v19 = vpop.permute.xlu2 %1188  ;;  %v4323_v58 = vpop.eup %4322  ;;  %v4145_v17 = vld [vmem:[#allocation13 + $0x74] sm:$0xf] }
 0x64a   :  { %1209 = vmatpush.msrb.mxu1 %v1189_v19  ;;  %v1187_v21 = vmul.f32 %v4323_v58, %v4317_v6  ;;  %v3615_v19 = vld [vmem:[#allocation13 + $0x78] sm:$0xf0] }
 0x64b   :  { %3544 = vmatmul.msk.f32.vlgmr.msra.gmra.mxu1 %vm640_vm1, %v1088_v18  ;;  %v3614_v18 = vor.u32 %v4146_v16, %v3613_v15  ;;  %v4153_v15 = vld [vmem:[#allocation16 + $0x30] sm:$0xff] }
 0x64c   :  { %3551 = vmatpush.xpose.msk.msra.mxu1 %vm613_vm0, %v1235_v20  ;;  %v3618_v20 = vor.u32 %v4145_v17, %v3615_v19  ;;  %v4161_v16 = vld [vmem:[#allocation16 + $0x70] sm:$0xff]  ;;  %v4152_v19 = vld [vmem:[#allocation16 + $0x28] sm:$0xff] }
 0x64d   :  { %1485 = vmatpush.bf16.msrb.mxu0 %v3614_v18 }
 0x653   :  { %3549 = vmatmul.msk.f32.vlgmr.msrb.gmra.mxu1 %vm640_vm1, %v1187_v21 }
 0x654   :  { %1499 = vmatpush.bf16.msrb.mxu1 %v3618_v20  ;;  %v4160_v20 = vld [vmem:[#allocation16 + $0x68] sm:$0xff] }
 0x65b   :  { %3552 = vmatmul.msk.f32.vlgmr.msra.gmra.mxu1 %vm613_vm0, %v1233_v22 }
 0x673   :  { %v1017_v25 = vpop.xlane.xlu0 %1016 }
 0x674   :  { %v1018_v26 = vsub.f32 %v1012_v63, %v1017_v25 }
 0x676   :  { %v1019_v28 = vmul.f32 1.442695, %v1018_v26  ;;  %v4144_v26 = vld [vmem:[#allocation13 + $0x64] sm:$0xf0] }
 0x678   :  { %4324 = vpow2.f32 %v1019_v28  ;;  %v4143_v28 = vld [vmem:[#allocation13 + $0x64] sm:$0xf] }
 0x679   :  { %4326 = vrcp.f32 %v4824_v40  ;;  %v3589_v40 = vld [vmem:[#allocation13 + $0x40] sm:$0xf] }
 0x67e   :  { %v4325_v29 = vpop.eup %4324 }
 0x67f   :  { %v1021_v31 = vsel %vm640_vm1, %v4325_v29, 0.0  ;;  %v4327_v41 = vpop.eup %4326 }
 0x680   :  { %1022 = vadd.xlane.f32.xlu1 %v1021_v31  ;;  %v1328_v42 = vmul.f32 128.0, %v4327_v41  ;;  %vm1332_vm2 = vweird.f32 %v4327_v41 }
 0x682   :  { %v1329_v44 = vsub.f32 1.0, %v1328_v42  ;;  %v4139_v42 = vld [vmem:[#allocation13 + $0x44] sm:$0xf] }
 0x684   :  { %v1330_v45 = vmul.f32 %v4327_v41, %v1329_v44 }
 0x686   :  { %v1331_v46 = vadd.f32 %v4327_v41, %v1330_v45 }
 0x688   :  { %1323 = vadd.xlane.f32.xlu1 %v1321_v33  ;;  %v5215_v47 = vsel %vm1332_vm2, %v4327_v41, %v1331_v46  ;;  %v4140_v41 = vld [vmem:[#allocation13 + $0x44] sm:$0xf0] }
 0x689   :  { %v3590_v45 = vor.u32 %v4140_v41, %v3589_v40  ;;  %v4290_v40 = vld [vmem:[#allocation11] ss:$0 sm:$0xff] }
 0x6c8   :  { %v1113_v35 = vpop.f32.mrf.mxu1 }
 0x6d0   :  { %v1211_v37 = vpop.f32.mrf.mxu1 }
 0x6d1   :  { %v1214_v36 = vpack.c.bf16 %v1211_v37, %v1211_v37 }
 0x6d3   :  { %3550 = vmatmul.msk.bf16.vlgmr.msra.gmra.mxu0 %vm613_vm0, %v1214_v36  ;;  %v3599_v36 = vld [vmem:[#allocation13 + $0x58] sm:$0xf0] }
 0x6d8   :  { %v1257_v38 = vpop.f32.mrf.mxu1 }
 0x6d9   :  { %v1260_v39 = vsel %vm640_vm1, %v1257_v38, -inf }
 0x6da   :  { %1261 = vmax.xlane.f32.xlu2 %v1260_v39 }
 0x6f2   :  { %1271 = vrot.lane.b32.xlu2 %v5171_v43, %s4823_s3  ;;  %v1116_v43 = vpack.c.bf16 %v1113_v35, %v1113_v35  ;;  %v4141_v35 = vld [vmem:[#allocation13 + $0x54] sm:$0xf] }
 0x6f3   :  { %v1023_v23 = vpop.xlane.xlu1 %1022  ;;  %v3602_v39 = vor.u32 %v4141_v35, %v3599_v36  ;;  %v4289_v35 = vld [vmem:[%s5517_s11] ss:$0 sm:$0xff] }
 0x6f4   :  { %4328 = vrcp.f32 %v1023_v23  ;;  %v3591_v23 = vld [vmem:[#allocation13 + $0x48] sm:$0xf0] }
 0x6f5   :  { %v3594_v46 = vor.u32 %v4139_v42, %v3591_v23  ;;  %v4150_v23 = vld [vmem:[#allocation16 + $0x18] sm:$0xff] }
 0x6fa   :  { %v4329_v48 = vpop.eup %4328 }
 0x6fb   :  { %v1025_v27 = vmul.f32 %v4329_v48, %v4325_v29  ;;  %v1324_v34 = vpop.xlane.xlu1 %1323  ;;  %v3581_v48 = vld [vmem:[#allocation13 + $0x30] sm:$0xf] }
 0x6fc   :  { %v1334_v49 = vmul.f32 %v5215_v47, %v1324_v34  ;;  %v4137_v34 = vld [vmem:[#allocation13 + $0x34] sm:$0xf] }
 0x6fd   :  { %3541 = vmatmul.msk.f32.vlgmr.msrb.gmra.mxu2 %vm640_vm1, %v1025_v27  ;;  %v4138_v27 = vld [vmem:[#allocation13 + $0x34] sm:$0xf0] }
 0x6fe   :  { %v5219_v50 = vsub.f32 %v1321_v33, %v1334_v49  ;;  %v4142_v33 = vld [vmem:[#allocation13 + $0x54] sm:$0xf0] }
 0x6ff   :  { %v3598_v37 = vor.u32 %v4142_v33, %v3597_v32 }
 0x700   :  { %v1338_v51 = vmul.f32 %v5219_v50, %v5219_v50 }
 0x702   :  { %1340 = vadd.xlane.f32.xlu1 %v1338_v51  ;;  %v3582_v51 = vor.u32 %v4138_v27, %v3581_v48  ;;  %v4157_v48 = vld [vmem:[#allocation16 + $0x50] sm:$0xff]  ;;  %v4148_v27 = vld [vmem:[#allocation16 + $0x8] sm:$0xff] }
 0x705   :  { %3545 = vmatmul.msk.bf16.vlgmr.msra.gmra.mxu2 %vm613_vm0, %v1116_v43  ;;  %v3583_v43 = vld [vmem:[#allocation13 + $0x38] sm:$0xf0] }
 0x74d   :  { %v1262_v52 = vpop.xlane.xlu2 %1261 }
 0x74e   :  { %v1263_v53 = vsub.f32 %v1257_v38, %v1262_v52  ;;  %v3586_v52 = vor.u32 %v4137_v34, %v3583_v43  ;;  %v4156_v34 = vld [vmem:[#allocation16 + $0x48] sm:$0xff] }
 0x750   :  { %v1264_v54 = vmul.f32 1.442695, %v1263_v53  ;;  %v1227_v55 = vpop.f32.mrf.mxu0  ;;  %v3573_v53 = vld [vmem:[#allocation13 + $0x20] sm:$0xf] }
 0x752   :  { %4330 = vpow2.f32 %v1264_v54  ;;  %v4136_v54 = vld [vmem:[#allocation13 + $0x24] sm:$0xf0] }
 0x755   :  { %v1272_v56 = vpop.permute.xlu2 %1271 }
 0x756   :  { %1292 = vmatpush.msrb.mxu2 %v1272_v56  ;;  %v3574_v56 = vor.u32 %v4136_v54, %v3573_v53 }
 0x758   :  { %v4331_v57 = vpop.eup %4330  ;;  %v1229_v59 = vpop.f32.mrf.mxu0 }
 0x759   :  { %v1266_v60 = vsel %vm640_vm1, %v4331_v57, 0.0 }
 0x75a   :  { %1267 = vadd.xlane.f32.xlu0 %v1266_v60  ;;  %v3565_v60 = vld [vmem:[#allocation13 + $0x10] sm:$0xf] }
 0x775   :  { %v1341_v38 = vpop.xlane.xlu1 %1340 }
 0x776   :  { %v1344_v44 = vmul.f32 %v1341_v38, %v5215_v47 }
 0x778   :  { %v1346_v49 = vadd.f32 1e-05, %v1344_v44 }
 0x77a   :  { %vm1354_vm4 = vweird.f32 %v1346_v49 }
 0x780   :  { %v1046_v61 = vpop.f32.mrf.mxu2 }
 0x781   :  { %v1049_v62 = vpack.c.bf16 %v1046_v61, %v1046_v61  ;;  %v4134_v61 = vld [vmem:[#allocation13 + $0x14] sm:$0xf0] }
 0x783   :  { %3546 = vmatmul.msk.bf16.vlgmr.msrb.gmra.mxu3 %vm613_vm0, %v1049_v62  ;;  %v4133_v62 = vld [vmem:[#allocation13 + $0x14] sm:$0xf] }
 0x788   :  { %v1129_v0 = vpop.f32.mrf.mxu2 }
 0x790   :  { %v1131_v1 = vpop.f32.mrf.mxu2 }
 0x791   :  { %v3567_v1 = vld [vmem:[#allocation13 + $0x18] sm:$0xf0] }
 0x7cd   :  { %v1268_v3 = vpop.xlane.xlu0 %1267 }
 0x7ce   :  { %4332 = vrcp.f32 %v1268_v3  ;;  %v3557_v3 = vld [vmem:[#allocation13] sm:$0xf] }
 0x7cf   :  { %4334 = vrsqrt.f32 %v1346_v49 }
 0x7d4   :  { %v4333_v2 = vpop.eup %4332 }
 0x7d5   :  { %v1270_v4 = vmul.f32 %v4333_v2, %v4331_v57  ;;  %v3575_v57 = vld [vmem:[#allocation13 + $0x28] sm:$0xf0]  ;;  %v4132_v2 = vld [vmem:[#allocation13 + $0x4] sm:$0xf0] }
 0x7d7   :  { %3553 = vmatmul.msk.f32.vlgmr.msrb.gmra.mxu2 %vm640_vm1, %v1270_v4  ;;  %v3570_v4 = vor.u32 %v4133_v62, %v3567_v1 }
 0x806   :  { %v1145_v5 = vpop.f32.mrf.mxu3 }
 0x807   :  { %v1146_v9 = vadd.f32 %v1145_v5, %v1129_v0  ;;  %v3566_v0 = vor.u32 %v4134_v61, %v3565_v60  ;;  %v4131_v5 = vld [vmem:[#allocation13 + $0x4] sm:$0xf] }
 0x809   :  { %v1231_v10 = vadd.f32 %v1227_v55, %v1146_v9  ;;  %v4135_v55 = vld [vmem:[#allocation13 + $0x24] sm:$0xf] }
 0x80a   :  { %v3578_v59 = vor.u32 %v4135_v55, %v3575_v57 }
 0x80e   :  { %v1147_v6 = vpop.f32.mrf.mxu3 }
 0x80f   :  { %v3559_v6 = vld [vmem:[#allocation13 + $0x8] sm:$0xf0] }
 0x810   :  { %v3562_v9 = vor.u32 %v4131_v5, %v3559_v6  ;;  %v4291_v5 = vld [vmem:[#allocation17] ss:$0 sm:$0xff] }
 0x85a   :  { %v1294_v7 = vpop.f32.mrf.mxu2 }
 0x85b   :  { %v1297_v8 = vpack.c.bf16 %v1294_v7, %v1294_v7  ;;  %v4335_v7 = vpop.eup %4334 }
 0x85c   :  { %vm1355_vm3 = vweird.f32 %v4335_v7 }
 0x85d   :  { %3554 = vmatmul.msk.bf16.vlgmr.msra.gmra.mxu3 %vm613_vm0, %v1297_v8  ;;  %v3558_v8 = vor.u32 %v4132_v2, %v3557_v3  ;;  %vm1356_vm5 = vmor %vm1354_vm4, %vm1355_vm3 }
 0x8e0   :  { %v1310_v11 = vpop.f32.mrf.mxu3 }
 0x8e1   :  { %v1314_v12 = vadd.f32 %v1310_v11, %v1231_v10  ;;  %v1349_v10 = vmul.f32 %v4335_v7, %v1346_v49  ;;  %v4154_v11 = vld [vmem:[#allocation16 + $0x38] sm:$0xff]  ;;  %v4155_v49 = vld [vmem:[#allocation16 + $0x40] sm:$0xff] }
 0x8e2   :  { %1651 = vmatpush.bf16.msra.mxu2 %v4154_v11 }
 0x8e3   :  { %v1320_v13 = vadd.f32 %v5206_v30, %v1314_v12  ;;  %v3607_v30 = vld [vmem:[#allocation13 + $0x68] sm:$0xf0]  ;;  %v4162_v12 = vld [vmem:[#allocation16 + $0x78] sm:$0xff] }
 0x8e4   :  { %v3610_v31 = vor.u32 %v4143_v28, %v3607_v30  ;;  %1665 = vmatpush.bf16.msrb.mxu3 %v4162_v12 }
 0x8e5   :  { %v1322_v63 = vadd.f32 %v1320_v13, %v5085_v24  ;;  %v3605_v24 = vld [vmem:[#allocation13 + $0x60] sm:$0xf]  ;;  %v1350_v13 = vmul.f32 %v4335_v7, %v1349_v10 }
 0x8e6   :  { %v3606_v29 = vor.u32 %v4144_v26, %v3605_v24  ;;  %1500 = vmatpush.bf16.msrb.mxu1 %v3610_v31  ;;  %1652 = vmatpush.bf16.msra.mxu2 %v4153_v15 }
 0x8e7   :  { %1325 = vadd.xlane.f32.xlu0 %v1322_v63  ;;  %v1351_v18 = vmul.f32 0.5, %v1350_v13 }
 0x8e8   :  { %v1312_v14 = vpop.f32.mrf.mxu3  ;;  %1486 = vmatpush.bf16.msrb.mxu0 %v3606_v29  ;;  %1666 = vmatpush.bf16.msrb.mxu3 %v4161_v16 }
 0x8ea   :  { %1501 = vmatpush.bf16.msrb.mxu1 %v3602_v39  ;;  %1653 = vmatpush.bf16.msra.mxu2 %v4152_v19 }
 0x8ec   :  { %1487 = vmatpush.bf16.msrb.mxu0 %v3598_v37  ;;  %1667 = vmatpush.bf16.msrb.mxu3 %v4160_v20 }
 0x8ee   :  { %1502 = vmatpush.bf16.msrb.mxu1 %v3594_v46  ;;  %v4149_v46 = vld [vmem:[#allocation16 + $0x10] sm:$0xff] }
 0x8f0   :  { %1488 = vmatpush.bf16.msrb.mxu0 %v3590_v45 }
 0x8f2   :  { %1503 = vmatpush.bf16.msrb.mxu1 %v3586_v52 }
 0x8f4   :  { %1489 = vmatpush.bf16.msrb.mxu0 %v3582_v51  ;;  %v1399_v51 = vld [vmem:[#allocation14] sm:$0x3] }
 0x8f5   :  { %v1401_v53 = vperm.slane %v1399_v51, 0  ;;  %v1402_v54 = vperm.slane %v1399_v51, 1  ;;  %v3733_v51 = vld [vmem:[#allocation20 + $0x60] sm:$0xf] }
 0x8f6   :  { %1504 = vmatpush.bf16.msrb.mxu1 %v3578_v59 }
 0x8f8   :  { %1490 = vmatpush.bf16.msrb.mxu0 %v3574_v56 }
 0x8fa   :  { %1505 = vmatpush.bf16.msrb.mxu1 %v3570_v4 }
 0x8fc   :  { %1491 = vmatpush.bf16.msrb.mxu0 %v3566_v0 }
 0x8fe   :  { %1506 = vmatpush.bf16.msrb.mxu1 %v3562_v9 }
 0x900   :  { %1492 = vmatpush.bf16.msrb.mxu0 %v3558_v8 }
 0x95a   :  { %v1326_v58 = vpop.xlane.xlu0 %1325 }
 0x95b   :  { %v1335_v21 = vmul.f32 %v5215_v47, %v1326_v58  ;;  %v1352_v58 = vsub.f32 1.5, %v1351_v18 }
 0x95d   :  { %v5231_v22 = vsub.f32 %v1322_v63, %v1335_v21  ;;  %v4151_v21 = vld [vmem:[#allocation16 + $0x20] sm:$0xff]  ;;  %v1353_v26 = vmul.f32 %v4335_v7, %v1352_v58 }
 0x95e   :  { %1654 = vmatpush.bf16.msra.mxu2 %v4151_v21 }
 0x95f   :  { %v1339_v25 = vmul.f32 %v5231_v22, %v5231_v22  ;;  %v1357_v30 = vsel %vm1356_vm5, %v4335_v7, %v1353_v26  ;;  %v4184_v26 = vld [vmem:[#allocation20 + $0xac] sm:$0xf] }
 0x960   :  { %v1368_v33 = vmul.f32 %v1357_v30, %v5219_v50  ;;  %v4158_v50 = vld [vmem:[#allocation16 + $0x58] sm:$0xff]  ;;  %v3777_v30 = vld [vmem:[#allocation20 + $0xb0] sm:$0xf] }
 0x961   :  { %1342 = vadd.xlane.f32.xlu0 %v1339_v25  ;;  %v4159_v25 = vld [vmem:[#allocation16 + $0x60] sm:$0xff] }
 0x962   :  { %1668 = vmatpush.bf16.msrb.mxu3 %v4159_v25  ;;  %v1374_v39 = vmul.f32 %v4289_v35, %v1368_v33  ;;  %1655 = vmatpush.bf16.msra.mxu2 %v4150_v23  ;;  %v3769_v25 = vld [vmem:[#allocation20 + $0xa8] sm:$0xf]  ;;  %v4179_v23 = vld [vmem:[#allocation20 + $0x80] sm:$0xf0] }
 0x964   :  { %v1380_v42 = vadd.f32 %v4290_v40, %v1374_v39  ;;  %v3759_v39 = vld [vmem:[#allocation20 + $0x9c] sm:$0xf0] }
 0x966   :  { %1669 = vmatpush.bf16.msrb.mxu3 %v4158_v50  ;;  %1656 = vmatpush.bf16.msra.mxu2 %v4149_v46  ;;  %v4178_v50 = vld [vmem:[#allocation20 + $0x7c] sm:$0xf] }
 0x96a   :  { %1670 = vmatpush.bf16.msrb.mxu3 %v4157_v48  ;;  %1657 = vmatpush.bf16.msra.mxu2 %v4148_v27  ;;  %v3747_v48 = vld [vmem:[#allocation20 + $0x84] sm:$0xf0]  ;;  %v3753_v27 = vld [vmem:[#allocation20 + $0x80] sm:$0xf] }
 0x96e   :  { %1671 = vmatpush.bf16.msrb.mxu3 %v4156_v34  ;;  %v4180_v34 = vld [vmem:[#allocation20 + $0x88] sm:$0xf0] }
 0x972   :  { %1672 = vmatpush.bf16.msrb.mxu3 %v4155_v49  ;;  %v3754_v49 = vor.u32 %v4180_v34, %v3753_v27 }
 0x9d4   :  { %v1343_v63 = vpop.xlane.xlu0 %1342 }
 0x9d5   :  { %v1345_v14 = vmul.f32 %v1343_v63, %v5215_v47 }
 0x9d7   :  { %v1347_v17 = vadd.f32 1e-05, %v1345_v14 }
 0x9d9   :  { %4336 = vrsqrt.f32 %v1347_v17  ;;  %vm1364_vm7 = vweird.f32 %v1347_v17 }
 0x9df   :  { %v4337_v24 = vpop.eup %4336 }
 0x9e0   :  { %v1359_v28 = vmul.f32 %v4337_v24, %v1347_v17  ;;  %vm1365_vm6 = vweird.f32 %v4337_v24 }
 0x9e1   :  { %vm1366_vm8 = vmor %vm1364_vm7, %vm1365_vm6 }
 0x9e2   :  { %v1360_v29 = vmul.f32 %v4337_v24, %v1359_v28 }
 0x9e4   :  { %v1361_v31 = vmul.f32 0.5, %v1360_v29  ;;  %v3771_v29 = vld [vmem:[#allocation20 + $0xb4] sm:$0xf0] }
 0x9e6   :  { %v1362_v32 = vsub.f32 1.5, %v1361_v31  ;;  %v4186_v31 = vld [vmem:[#allocation20 + $0xb8] sm:$0xf0] }
 0x9e7   :  { %v3778_v33 = vor.u32 %v4186_v31, %v3777_v30  ;;  %v4163_v30 = vld [vmem:[#allocation20 + $0x4] sm:$0xf] }
 0x9e8   :  { %v1363_v37 = vmul.f32 %v4337_v24, %v1362_v32  ;;  %v3774_v32 = vor.u32 %v4184_v26, %v3771_v29  ;;  %v4164_v29 = vld [vmem:[#allocation20 + $0x8] sm:$0xf0] }
 0x9ea   :  { %v1367_v36 = vsel %vm1366_vm8, %v4337_v24, %v1363_v37  ;;  %v4185_v24 = vld [vmem:[#allocation20 + $0xb0] sm:$0xf0]  ;;  %1916 = vmatpush.bf16.msra.mxu1 %v3774_v32  ;;  %v4182_v37 = vld [vmem:[#allocation20 + $0x98] sm:$0xf0] }
 0x9eb   :  { %v1369_v38 = vmul.f32 %v1367_v36, %v5231_v22  ;;  %v4147_v22 = vld [vmem:[#allocation16] sm:$0xff]  ;;  %v3770_v28 = vor.u32 %v4185_v24, %v3769_v25  ;;  %v4181_v36 = vld [vmem:[#allocation20 + $0x94] sm:$0xf] }
 0x9ec   :  { %1658 = vmatpush.bf16.msra.mxu2 %v4147_v22  ;;  %v3750_v22 = vor.u32 %v4178_v50, %v3747_v48 }
 0x9ed   :  { %v1375_v41 = vmul.f32 %v4289_v35, %v1369_v38  ;;  %1902 = vmatpush.bf16.msra.mxu0 %v3770_v28  ;;  %v3757_v35 = vld [vmem:[#allocation20 + $0x90] sm:$0xf]  ;;  %v3685_v28 = vld [vmem:[#allocation20] sm:$0xf] }
 0x9ee   :  { %v3758_v38 = vor.u32 %v4182_v37, %v3757_v35  ;;  %v3686_v32 = vor.u32 %v4164_v29, %v3685_v28  ;;  %v3693_v35 = vld [vmem:[#allocation20 + $0x8] sm:$0xf]  ;;  %v4165_v37 = vld [vmem:[#allocation20 + $0x10] sm:$0xf0] }
 0x9ef   :  { %v1381_v44 = vadd.f32 %v4290_v40, %v1375_v41  ;;  %v3765_v40 = vld [vmem:[#allocation20 + $0x98] sm:$0xf]  ;;  %v4183_v41 = vld [vmem:[#allocation20 + $0xa0] sm:$0xf0]  ;;  %v5306_v29 = vld [vmem:[#allocation22 + $0x8] sm:$0xff] }
 0x9f0   :  { %1930 = vmatpush.bf16.msrb.mxu2 %v3778_v33  ;;  %v3687_v33 = vld [vmem:[#allocation20 + $0xc] sm:$0xf0] }
 0x9f1   :  { %v1382_v45 = vpack.c.bf16 %v1381_v44, %v1380_v42  ;;  %1903 = vmatpush.bf16.msra.mxu0 %v3758_v38  ;;  %v3694_v38 = vor.u32 %v4165_v37, %v3693_v35 }
 0x9f3   :  { %1493 = vmatmul.bf16.vlgmr.msrb.gmra.mxu0 %v1382_v45  ;;  %1507 = vmatmul.bf16.vlgmr.msrb.gmra.mxu1 %v1382_v45  ;;  %v3745_v45 = vld [vmem:[#allocation20 + $0x78] sm:$0xf] }
 0x9f4   :  { %v3746_v46 = vor.u32 %v4179_v23, %v3745_v45 }
 0x9f6   :  { %1904 = vmatpush.bf16.msra.mxu0 %v3746_v46 }
 0xa70   :  { %v1494_v43 = vpop.f32.mrf.mxu0  ;;  %v1508_v52 = vpop.f32.mrf.mxu1 }
 0xa71   :  { %v1495_v55 = vadd.f32 %v1494_v43, %v1401_v53  ;;  %v1509_v56 = vadd.f32 %v1508_v52, %v1402_v54  ;;  %v4176_v43 = vld [vmem:[#allocation20 + $0x68] sm:$0xf0]  ;;  %v4175_v52 = vld [vmem:[#allocation20 + $0x64] sm:$0xf] }
 0xa73   :  { %v1513_v62 = vmax.f32 %v1495_v55, 0.0  ;;  %v1514_v0 = vmax.f32 %v1509_v56, 0.0  ;;  %v3741_v55 = vld [vmem:[#allocation20 + $0x68] sm:$0xf]  ;;  %v4177_v56 = vld [vmem:[#allocation20 + $0x70] sm:$0xf0] }
 0xa78   :  { %v1496_v57 = vpop.f32.mrf.mxu0  ;;  %v1510_v59 = vpop.f32.mrf.mxu1 }
 0xa79   :  { %v1497_v60 = vadd.f32 %v1496_v57, %v1401_v53  ;;  %v1511_v61 = vadd.f32 %v1510_v59, %v1402_v54  ;;  %v3734_v53 = vor.u32 %v4176_v43, %v3733_v51  ;;  %v3735_v54 = vld [vmem:[#allocation20 + $0x6c] sm:$0xf0]  ;;  %v3742_v59 = vor.u32 %v4177_v56, %v3741_v55 }
 0xa7a   :  { %v3738_v57 = vor.u32 %v4175_v52, %v3735_v54 }
 0xa7b   :  { %v1515_v1 = vmax.f32 %v1497_v60, 0.0  ;;  %v1516_v3 = vmax.f32 %v1511_v61, 0.0  ;;  %1905 = vmatpush.bf16.msra.mxu0 %v3734_v53  ;;  %v3721_v60 = vld [vmem:[#allocation20 + $0x48] sm:$0xf]  ;;  %v4173_v61 = vld [vmem:[#allocation20 + $0x50] sm:$0xf0] }
 0xa7c   :  { %v4292_v53 = vld [vmem:[%s5518_s4] ss:$0 sm:$0xff] }
 0xa7d   :  { %v1517_v2 = vpack.c.bf16 %v1515_v1, %v1513_v62  ;;  %v1518_v4 = vpack.c.bf16 %v1516_v3, %v1514_v0  ;;  %v4172_v62 = vld [vmem:[#allocation20 + $0x4c] sm:$0xf]  ;;  %v3722_v0 = vor.u32 %v4173_v61, %v3721_v60  ;;  %v3723_v1 = vld [vmem:[#allocation20 + $0x54] sm:$0xf0]  ;;  %v3729_v3 = vld [vmem:[#allocation20 + $0x50] sm:$0xf] }
 0xa7f   :  { %1659 = vmatmul.bf16.vlgmr.msra.gmra.mxu2 %v1517_v2  ;;  %1673 = vmatmul.bf16.vlgmr.msrb.gmra.mxu3 %v1518_v4  ;;  %v4174_v2 = vld [vmem:[#allocation20 + $0x58] sm:$0xf0]  ;;  %v3726_v4 = vor.u32 %v4172_v62, %v3723_v1 }
 0xa80   :  { %1906 = vmatpush.bf16.msra.mxu0 %v3722_v0  ;;  %v5268_v0 = vld [vmem:[%s5475_s15] sm:$0x7] }
 0xa81   :  { %v1769_v1 = vperm.slane %v5268_v0, 1 }
 0xb02   :  { %v1660_v6 = vpop.f32.mrf.mxu2  ;;  %v1674_v7 = vpop.f32.mrf.mxu3 }
 0xb03   :  { %v1661_v8 = vadd.f32 %v4291_v5, %v1660_v6  ;;  %v3709_v6 = vld [vmem:[#allocation20 + $0x30] sm:$0xf] }
 0xb05   :  { %v1675_v9 = vadd.f32 %v1674_v7, %v1661_v8  ;;  %v4170_v7 = vld [vmem:[#allocation20 + $0x38] sm:$0xf0]  ;;  %v4169_v8 = vld [vmem:[#allocation20 + $0x34] sm:$0xf] }
 0xb07   :  { %v1679_v10 = vadd.f32 %v1675_v9, %v1380_v42  ;;  %v3762_v42 = vor.u32 %v4181_v36, %v3759_v39  ;;  %v3710_v9 = vor.u32 %v4170_v7, %v3709_v6  ;;  %v3690_v36 = vor.u32 %v4163_v30, %v3687_v33 }
 0xb08   :  { %v1770_v6 = vperm.slane %v5268_v0, 2 }
 0xb09   :  { %1681 = vadd.xlane.f32.xlu1 %v1679_v10  ;;  %1917 = vmatpush.bf16.msra.mxu1 %v3762_v42 }
 0xb0a   :  { %v1662_v11 = vpop.f32.mrf.mxu2  ;;  %v1676_v13 = vpop.f32.mrf.mxu3  ;;  %1907 = vmatpush.bf16.msra.mxu0 %v3710_v9 }
 0xb0b   :  { %v1663_v12 = vadd.f32 %v4291_v5, %v1662_v11  ;;  %v3730_v5 = vor.u32 %v4174_v2, %v3729_v3  ;;  %v3717_v11 = vld [vmem:[#allocation20 + $0x38] sm:$0xf] }
 0xb0d   :  { %v1677_v63 = vadd.f32 %v1676_v13, %v1663_v12  ;;  %1918 = vmatpush.bf16.msra.mxu1 %v3750_v22  ;;  %v4171_v12 = vld [vmem:[#allocation20 + $0x40] sm:$0xf0] }
 0xb0f   :  { %v1680_v14 = vadd.f32 %v1677_v63, %v1381_v44  ;;  %v3766_v44 = vor.u32 %v4183_v41, %v3765_v40  ;;  %v3718_v63 = vor.u32 %v4171_v12, %v3717_v11 }
 0xb11   :  { %1683 = vadd.xlane.f32.xlu0 %v1680_v14  ;;  %1931 = vmatpush.bf16.msrb.mxu2 %v3766_v44 }
 0xb12   :  { %1919 = vmatpush.bf16.msra.mxu1 %v3738_v57 }
 0xb15   :  { %1932 = vmatpush.bf16.msrb.mxu2 %v3754_v49 }
 0xb16   :  { %1920 = vmatpush.bf16.msra.mxu1 %v3726_v4 }
 0xb19   :  { %1933 = vmatpush.bf16.msrb.mxu2 %v3742_v59  ;;  %v4293_v59 = vld [vmem:[#allocation19] ss:$0 sm:$0xff] }
 0xb1d   :  { %1934 = vmatpush.bf16.msrb.mxu2 %v3730_v5 }
 0xb21   :  { %1935 = vmatpush.bf16.msrb.mxu2 %v3718_v63 }
 0xb7c   :  { %v1682_v15 = vpop.xlane.xlu1 %1681 }
 0xb7d   :  { %v1685_v16 = vmul.f32 %v1682_v15, %v5215_v47  ;;  %v4167_v15 = vld [vmem:[#allocation20 + $0x20] sm:$0xf0] }
 0xb7f   :  { %v5243_v17 = vsub.f32 %v1679_v10, %v1685_v16  ;;  %v3711_v10 = vld [vmem:[#allocation20 + $0x3c] sm:$0xf0]  ;;  %v4166_v16 = vld [vmem:[#allocation20 + $0x1c] sm:$0xf] }
 0xb80   :  { %v3714_v13 = vor.u32 %v4169_v8, %v3711_v10 }
 0xb81   :  { %v1689_v18 = vmul.f32 %v5243_v17, %v5243_v17 }
 0xb82   :  { %1921 = vmatpush.bf16.msra.mxu1 %v3714_v13 }
 0xb83   :  { %1691 = vadd.xlane.f32.xlu2 %v1689_v18 }
 0xb84   :  { %v1684_v19 = vpop.xlane.xlu0 %1683 }
 0xb85   :  { %v1686_v20 = vmul.f32 %v1684_v19, %v5215_v47  ;;  %v3699_v19 = vld [vmem:[#allocation20 + $0x24] sm:$0xf0] }
 0xb86   :  { %v3702_v24 = vor.u32 %v4166_v16, %v3699_v19 }
 0xb87   :  { %v5248_v58 = vsub.f32 %v1680_v14, %v1686_v20  ;;  %v3697_v14 = vld [vmem:[#allocation20 + $0x18] sm:$0xf]  ;;  %v3705_v20 = vld [vmem:[#allocation20 + $0x20] sm:$0xf] }
 0xb88   :  { %v3698_v18 = vor.u32 %v4167_v15, %v3697_v14  ;;  %1922 = vmatpush.bf16.msra.mxu1 %v3702_v24 }
 0xb89   :  { %v1690_v21 = vmul.f32 %v5248_v58, %v5248_v58 }
 0xb8a   :  { %1908 = vmatpush.bf16.msra.mxu0 %v3698_v18 }
 0xb8b   :  { %1693 = vadd.xlane.f32.xlu1 %v1690_v21  ;;  %v4168_v21 = vld [vmem:[#allocation20 + $0x28] sm:$0xf0] }
 0xb8c   :  { %v3706_v26 = vor.u32 %v4168_v21, %v3705_v20  ;;  %1923 = vmatpush.bf16.msra.mxu1 %v3690_v36 }
 0xb8e   :  { %1936 = vmatpush.bf16.msrb.mxu2 %v3706_v26  ;;  %1909 = vmatpush.bf16.msra.mxu0 %v3686_v32  ;;  %v5315_v32 = vld [vmem:[#allocation22] sm:$0xff] }
 0xb90   :  { %2137 = vmatpush.bf16.msrb.mxu1 %v5306_v29 }
 0xb92   :  { %1937 = vmatpush.bf16.msrb.mxu2 %v3694_v38 }
 0xb94   :  { %2138 = vmatpush.bf16.msrb.mxu1 %v5315_v32 }
 0xbf6   :  { %v1692_v25 = vpop.xlane.xlu2 %1691 }
 0xbf7   :  { %v1695_v31 = vmul.f32 %v1692_v25, %v5215_v47 }
 0xbf9   :  { %v1697_v39 = vadd.f32 1e-05, %v1695_v31 }
 0xbfb   :  { %4338 = vrsqrt.f32 %v1697_v39  ;;  %vm1705_vm10 = vweird.f32 %v1697_v39 }
 0xbfe   :  { %v1694_v40 = vpop.xlane.xlu1 %1693 }
 0xbff   :  { %v1696_v41 = vmul.f32 %v1694_v40, %v5215_v47 }
 0xc01   :  { %v4339_v42 = vpop.eup %4338  ;;  %v1698_v44 = vadd.f32 1e-05, %v1696_v41 }
 0xc02   :  { %v1700_v45 = vmul.f32 %v4339_v42, %v1697_v39  ;;  %vm1706_vm9 = vweird.f32 %v4339_v42 }
 0xc03   :  { %4340 = vrsqrt.f32 %v1698_v44  ;;  %vm1707_vm11 = vmor %vm1705_vm10, %vm1706_vm9  ;;  %vm1715_vm13 = vweird.f32 %v1698_v44 }
 0xc04   :  { %v1701_v23 = vmul.f32 %v4339_v42, %v1700_v45 }
 0xc06   :  { %v1702_v50 = vmul.f32 0.5, %v1701_v23 }
 0xc08   :  { %v1703_v46 = vsub.f32 1.5, %v1702_v50 }
 0xc09   :  { %v4341_v48 = vpop.eup %4340 }
 0xc0a   :  { %v1704_v27 = vmul.f32 %v4339_v42, %v1703_v46  ;;  %v1710_v34 = vmul.f32 %v4341_v48, %v1698_v44  ;;  %vm1716_vm12 = vweird.f32 %v4341_v48 }
 0xc0b   :  { %vm1717_vm14 = vmor %vm1715_vm13, %vm1716_vm12 }
 0xc0c   :  { %v1711_v22 = vmul.f32 %v4341_v48, %v1710_v34  ;;  %v1708_v49 = vsel %vm1707_vm11, %v4339_v42, %v1704_v27 }
 0xc0d   :  { %v1719_v52 = vmul.f32 %v1708_v49, %v5243_v17 }
 0xc0e   :  { %v1712_v51 = vmul.f32 0.5, %v1711_v22 }
 0xc0f   :  { %v1725_v57 = vmul.f32 %v4292_v53, %v1719_v52  ;;  %v4192_v52 = vld [vmem:[#allocation22 + $0x28] sm:$0xff] }
 0xc10   :  { %v1713_v43 = vsub.f32 1.5, %v1712_v51 }
 0xc11   :  { %v5259_v61 = vadd.f32 %v4293_v59, %v1725_v57 }
 0xc12   :  { %v1714_v54 = vmul.f32 %v4341_v48, %v1713_v43 }
 0xc14   :  { %v1718_v55 = vsel %vm1717_vm14, %v4341_v48, %v1714_v54 }
 0xc15   :  { %v1720_v56 = vmul.f32 %v1718_v55, %v5248_v58  ;;  %v1768_v58 = vperm.slane %v5268_v0, 0  ;;  %v5338_v55 = vld [vmem:[#allocation22 + $0x18] sm:$0xff] }
 0xc16   :  { %2109 = vmatpush.bf16.msrb.mxu0 %v5338_v55 }
 0xc17   :  { %v1726_v60 = vmul.f32 %v4292_v53, %v1720_v56  ;;  %v4191_v53 = vld [vmem:[#allocation22 + $0x20] sm:$0xff] }
 0xc19   :  { %v5261_v62 = vadd.f32 %v4293_v59, %v1726_v60 }
 0xc1b   :  { %v1733_v17 = vpack.c.bf16 %v5261_v62, %v5259_v61 }
 0xc1d   :  { %1910 = vmatmul.bf16.vlgmr.msra.gmra.mxu0 %v1733_v17  ;;  %1924 = vmatmul.bf16.vlgmr.msra.gmra.mxu1 %v1733_v17 }
 0xc1e   :  { %1938 = vmatmul.bf16.vlgmr.msrb.gmra.mxu2 %v1733_v17 }
 0xc9a   :  { %v1911_v3 = vpop.f32.mrf.mxu0  ;;  %v1925_v2 = vpop.f32.mrf.mxu1 }
 0xc9b   :  { %v5274_v4 = vadd.f32 %v1911_v3, %v1768_v58  ;;  %v5276_v5 = vadd.f32 %v1925_v2, %v1769_v1  ;;  %v5350_v3 = vld [vmem:[#allocation22 + $0x10] sm:$0xff] }
 0xc9c   :  { %2110 = vmatpush.bf16.msrb.mxu0 %v5350_v3 }
 0xc9d   :  { %3779 = vmatpush.xpose.msk.msra.mxu3 %vm613_vm0, %v5276_v5  ;;  %2144 = vrot.lane.b32.xlu2 %v5274_v4, %s4814_s25 }
 0xca0   :  { %3780 = vmatmul.msk.f32.vlgmr.msra.gmra.mxu3 %vm613_vm0, %v5274_v4 }
 0xca1   :  { %v1939_v7 = vpop.f32.mrf.mxu2 }
 0xca2   :  { %v5287_v8 = vadd.f32 %v1939_v7, %v1770_v6  ;;  %v1927_v30 = vpop.f32.mrf.mxu1  ;;  %v1913_v45 = vpop.f32.mrf.mxu0 }
 0xca3   :  { %v5311_v31 = vadd.f32 %v1927_v30, %v1769_v1  ;;  %v5325_v23 = vadd.f32 %v1913_v45, %v1768_v58 }
 0xca4   :  { %2015 = vmatpush.msrb.mxu3 %v5287_v8 }
 0xca9   :  { %v5303_v24 = vpop.f32.mrf.mxu2 }
 0xcf7   :  { %v2145_v18 = vpop.permute.xlu2 %2144 }
 0xd23   :  { %v1983_v9 = vpop.f32.mrf.mxu3 }
 0xd24   :  { %v1986_v10 = vsel %vm640_vm1, %v1983_v9, -inf }
 0xd25   :  { %1987 = vmax.xlane.f32.xlu0 %v1986_v10 }
 0xd39   :  { %2023 = vrot.lane.b32.xlu0 %v5276_v5, %s4822_s24 }
 0xd41   :  { %2146 = vrot.lane.b32.xlu0 %v5276_v5, %s4814_s25 }
 0xd98   :  { %v1988_v11 = vpop.xlane.xlu0 %1987 }
 0xd99   :  { %v1989_v12 = vsub.f32 %v1983_v9, %v1988_v11 }
 0xd9b   :  { %v1990_v13 = vmul.f32 1.442695, %v1989_v12 }
 0xd9d   :  { %4342 = vpow2.f32 %v1990_v13 }
 0xda3   :  { %v4343_v63 = vpop.eup %4342 }
 0xda4   :  { %v1992_v14 = vsel %vm640_vm1, %v4343_v63, 0.0 }
 0xda5   :  { %1993 = vadd.xlane.f32.xlu1 %v1992_v14 }
 0xdab   :  { %v2024_v15 = vpop.permute.xlu0 %2023 }
 0xdac   :  { %3782 = vmatpush.xpose.msk.msra.mxu3 %vm613_vm0, %v2024_v15 }
 0xdb3   :  { %v2147_v16 = vpop.permute.xlu0 %2146 }
 0xdb4   :  { %3803 = vmatpush.xpose.msk.msra.mxu2 %vm613_vm0, %v2147_v16 }
 0xdb7   :  { %3804 = vmatmul.msk.f32.vlgmr.msra.gmra.mxu2 %vm613_vm0, %v2145_v18 }
 0xdb8   :  { %2231 = vmatpush.bf16.msrb.mxu2 %v4192_v52 }
 0xdbc   :  { %2232 = vmatpush.bf16.msrb.mxu2 %v4191_v53 }
 0xdbe   :  { %2021 = vrot.lane.b32.xlu1 %v5274_v4, %s4822_s24 }
 0xe18   :  { %v1994_v19 = vpop.xlane.xlu1 %1993 }
 0xe19   :  { %4344 = vrcp.f32 %v1994_v19 }
 0xe1f   :  { %v4345_v20 = vpop.eup %4344 }
 0xe20   :  { %v1996_v21 = vmul.f32 %v4345_v20, %v4343_v63 }
 0xe22   :  { %3781 = vmatmul.msk.f32.vlgmr.msrb.gmra.mxu3 %vm640_vm1, %v1996_v21 }
 0xe30   :  { %v2022_v25 = vpop.permute.xlu1 %2021 }
 0xe31   :  { %3783 = vmatmul.msk.f32.vlgmr.msra.gmra.mxu3 %vm613_vm0, %v2022_v25  ;;  %v5365_v25 = vadd.f32 %v5303_v24, %v1770_v6 }
 0xe3a   :  { %v2169_v26 = vpop.f32.mrf.mxu2 }
 0xe3b   :  { %v2172_v28 = vsel %vm640_vm1, %v2169_v26, -inf }
 0xe3c   :  { %2173 = vmax.xlane.f32.xlu1 %v2172_v28 }
 0xe55   :  { %2061 = vrot.lane.b32.xlu1 %v5287_v8, %s4822_s24 }
 0xe5d   :  { %2496 = vrot.lane.b32.xlu1 %v5311_v31, %s4814_s25 }
 0xea5   :  { %v2017_v33 = vpop.f32.mrf.mxu3 }
 0xea6   :  { %v2020_v35 = vpack.c.bf16 %v2017_v33, %v2017_v33 }
 0xea8   :  { %3802 = vmatmul.msk.bf16.vlgmr.msrb.gmra.mxu1 %vm613_vm0, %v2020_v35 }
 0xeaf   :  { %v2174_v37 = vpop.xlane.xlu1 %2173 }
 0xeb0   :  { %v2175_v36 = vsub.f32 %v2169_v26, %v2174_v37 }
 0xeb2   :  { %v2176_v38 = vmul.f32 1.442695, %v2175_v36 }
 0xeb4   :  { %4346 = vpow2.f32 %v2176_v38  ;;  %v2046_v39 = vpop.f32.mrf.mxu3 }
 0xeb5   :  { %v2049_v40 = vsel %vm640_vm1, %v2046_v39, -inf }
 0xeb6   :  { %2050 = vmax.xlane.f32.xlu0 %v2049_v40 }
 0xeba   :  { %v4347_v41 = vpop.eup %4346 }
 0xebb   :  { %v2178_v42 = vsel %vm640_vm1, %v4347_v41, 0.0 }
 0xebe   :  { %2179 = vadd.xlane.f32.xlu0 %v2178_v42 }
 0xec7   :  { %v2062_v44 = vpop.permute.xlu1 %2061 }
 0xec8   :  { %2082 = vmatpush.msrb.mxu3 %v2062_v44 }
 0xecf   :  { %v2497_v9 = vpop.permute.xlu1 %2496 }
 0xed2   :  { %2183 = vrot.lane.b32.xlu0 %v5287_v8, %s4814_s25 }
 0xeda   :  { %2395 = vrot.lane.b32.xlu0 %v5325_v23, %s4822_s24 }
 0xee2   :  { %2494 = vrot.lane.b32.xlu0 %v5325_v23, %s4814_s25 }
 0xf25   :  { %v2140_v50 = vpop.f32.mrf.mxu1 }
 0xf29   :  { %v2051_v46 = vpop.xlane.xlu0 %2050 }
 0xf2a   :  { %v2052_v48 = vsub.f32 %v2046_v39, %v2051_v46 }
 0xf2c   :  { %v2053_v27 = vmul.f32 1.442695, %v2052_v48 }
 0xf2d   :  { %v2142_v34 = vpop.f32.mrf.mxu1 }
 0xf2e   :  { %4348 = vpow2.f32 %v2053_v27 }
 0xf31   :  { %v2180_v51 = vpop.xlane.xlu0 %2179 }
 0xf34   :  { %v4349_v22 = vpop.eup %4348 }
 0xf35   :  { %v2055_v49 = vsel %vm640_vm1, %v4349_v22, 0.0 }
 0xf36   :  { %2056 = vadd.xlane.f32.xlu2 %v2055_v49 }
 0xf44   :  { %v2184_v43 = vpop.permute.xlu0 %2183 }
 0xf45   :  { %2204 = vmatpush.msra.mxu3 %v2184_v43 }
 0xf4c   :  { %v2396_v10 = vpop.permute.xlu0 %2395 }
 0xf4e   :  { %2397 = vrot.lane.b32.xlu2 %v5311_v31, %s4822_s24 }
 0xf54   :  { %v2495_v11 = vpop.permute.xlu0 %2494 }
 0xf56   :  { %2241 = vrot.lane.b32.xlu2 %v5276_v5, %s4823_s3 }
 0xf5e   :  { %2239 = vrot.lane.b32.xlu2 %v5274_v4, %s4823_s3 }
 0xfa9   :  { %v2057_v54 = vpop.xlane.xlu2 %2056 }
 0xfaa   :  { %4350 = vrcp.f32 %v2057_v54 }
 0xfab   :  { %4352 = vrcp.f32 %v2180_v51 }
 0xfb0   :  { %v4351_v56 = vpop.eup %4350 }
 0xfb1   :  { %v2059_v57 = vmul.f32 %v4351_v56, %v4349_v22  ;;  %v2398_v59 = vpop.permute.xlu2 %2397  ;;  %v4353_v60 = vpop.eup %4352 }
 0xfb2   :  { %3830 = vmatpush.xpose.msk.msra.mxu2 %vm613_vm0, %v2398_v59  ;;  %v2182_v17 = vmul.f32 %v4353_v60, %v4347_v41 }
 0xfb3   :  { %3784 = vmatmul.msk.f32.vlgmr.msrb.gmra.mxu3 %vm640_vm1, %v2059_v57 }
 0xfb9   :  { %v2242_v58 = vpop.permute.xlu2 %2241 }
 0xfba   :  { %3815 = vmatpush.xpose.msk.msrb.mxu3 %vm613_vm0, %v2242_v58 }
 0xfbb   :  { %3805 = vmatmul.msk.f32.vlgmr.msra.gmra.mxu3 %vm640_vm1, %v2182_v17 }
 0xfbe   :  { %3827 = vmatpush.xpose.msk.msra.mxu3 %vm613_vm0, %v5311_v31 }
 0xfc1   :  { %v2240_v1 = vpop.permute.xlu2 %2239 }
 0xfc3   :  { %3816 = vmatmul.msk.f32.vlgmr.msrb.gmra.mxu3 %vm613_vm0, %v2240_v1 }
 0xfcb   :  { %3828 = vmatmul.msk.f32.vlgmr.msra.gmra.mxu3 %vm613_vm0, %v5325_v23 }
0x1036   :  { %v2084_v2 = vpop.f32.mrf.mxu3 }
0x1037   :  { %v2087_v4 = vpack.c.bf16 %v2084_v2, %v2084_v2 }
0x1039   :  { %3793 = vmatmul.msk.bf16.vlgmr.msrb.gmra.mxu0 %vm613_vm0, %v2087_v4 }
0x103e   :  { %v2206_v5 = vpop.f32.mrf.mxu3 }
0x103f   :  { %v2209_v7 = vpack.c.bf16 %v2206_v5, %v2206_v5 }
0x1041   :  { %3814 = vmatmul.msk.bf16.vlgmr.msrb.gmra.mxu2 %vm613_vm0, %v2209_v7 }
0x1042   :  { %3835 = vmatpush.xpose.msk.msrb.mxu2 %vm613_vm0, %v2497_v9 }
0x1046   :  { %v2264_v26 = vpop.f32.mrf.mxu3 }
0x104e   :  { %v2357_v28 = vpop.f32.mrf.mxu3 }
0x104f   :  { %v2360_v30 = vsel %vm640_vm1, %v2357_v28, -inf }
0x1051   :  { %3831 = vmatmul.msk.f32.vlgmr.msra.gmra.mxu2 %vm613_vm0, %v2396_v10 }
0x1052   :  { %2569 = vmatpush.bf16.msra.mxu2 %v4192_v52 }
0x1056   :  { %2570 = vmatpush.bf16.msra.mxu2 %v4191_v53 }
0x1059   :  { %3836 = vmatmul.msk.f32.vlgmr.msrb.gmra.mxu2 %vm613_vm0, %v2495_v11 }
0x10b6   :  { %v2112_v12 = vpop.f32.mrf.mxu0 }
0x10b7   :  { %v2141_v63 = vadd.f32 %v2140_v50, %v2112_v12  ;;  %v2267_v50 = vsel %vm640_vm1, %v2264_v26, -inf }
0x10be   :  { %v2114_v13 = vpop.f32.mrf.mxu0 }
0x10bf   :  { %v4194_v13 = vld [vmem:[#allocation22 + $0x38] sm:$0xff] }
0x10c0   :  { %2326 = vmatpush.bf16.msra.mxu1 %v4194_v13 }
0x10c4   :  { %v2234_v14 = vpop.f32.mrf.mxu2 }
0x10c5   :  { %v5358_v15 = vadd.f32 %v2234_v14, %v2141_v63 }
0x10cc   :  { %v2236_v16 = vpop.f32.mrf.mxu2 }
0x10d4   :  { %v2420_v18 = vpop.f32.mrf.mxu2 }
0x10d5   :  { %v2423_v19 = vsel %vm640_vm1, %v2420_v18, -inf }
0x10d6   :  { %2424 = vmax.xlane.f32.xlu1 %v2423_v19 }
0x10dc   :  { %v2519_v20 = vpop.f32.mrf.mxu2 }
0x10dd   :  { %v2522_v21 = vsel %vm640_vm1, %v2519_v20, -inf }
0x10de   :  { %2523 = vmax.xlane.f32.xlu0 %v2522_v21 }
0x10f2   :  { %2435 = vrot.lane.b32.xlu0 %v5365_v25, %s4822_s24  ;;  %s3342_s24 = sshll.u32 %s4825_s30, 4  ;;  %s3343_s24 = int_to_ptr.vmem [resolvable:$true] %s3342_s24 }
0x10fa   :  { %2577 = vrot.lane.b32.xlu0 %v5325_v23, %s4823_s3 }
0x1124   :  { %2361 = vmax.xlane.f32.xlu0 %v2360_v30 }
0x1149   :  { %v2425_v33 = vpop.xlane.xlu1 %2424 }
0x114a   :  { %v2426_v35 = vsub.f32 %v2420_v18, %v2425_v33 }
0x114c   :  { %v2427_v37 = vmul.f32 1.442695, %v2426_v35 }
0x114e   :  { %4354 = vpow2.f32 %v2427_v37 }
0x1151   :  { %v2524_v36 = vpop.xlane.xlu0 %2523 }
0x1152   :  { %v2525_v0 = vsub.f32 %v2519_v20, %v2524_v36 }
0x1154   :  { %v4355_v38 = vpop.eup %4354  ;;  %v2526_v6 = vmul.f32 1.442695, %v2525_v0 }
0x1155   :  { %v2429_v24 = vsel %vm640_vm1, %v4355_v38, 0.0 }
0x1156   :  { %4356 = vpow2.f32 %v2526_v6  ;;  %2430 = vadd.xlane.f32.xlu2 %v2429_v24 }
0x115c   :  { %v4357_v39 = vpop.eup %4356 }
0x115d   :  { %v2528_v40 = vsel %vm640_vm1, %v4357_v39, 0.0 }
0x115e   :  { %2529 = vadd.xlane.f32.xlu1 %v2528_v40 }
0x1164   :  { %v2436_v41 = vpop.permute.xlu0 %2435 }
0x1165   :  { %2456 = vmatpush.msrb.mxu3 %v2436_v41 }
0x116c   :  { %v2578_v42 = vpop.permute.xlu0 %2577 }
0x116e   :  { %2579 = vrot.lane.b32.xlu2 %v5311_v31, %s4823_s3 }
0x1177   :  { %2533 = vrot.lane.b32.xlu1 %v5365_v25, %s4814_s25 }
0x1197   :  { %v2362_v44 = vpop.xlane.xlu0 %2361 }
0x1198   :  { %v2363_v45 = vsub.f32 %v2357_v28, %v2362_v44 }
0x119a   :  { %v2364_v23 = vmul.f32 1.442695, %v2363_v45 }
0x119c   :  { %4358 = vpow2.f32 %v2364_v23 }
0x11a1   :  { %2268 = vmax.xlane.f32.xlu1 %v2267_v50 }
0x11a2   :  { %v4359_v46 = vpop.eup %4358 }
0x11a3   :  { %v2366_v48 = vsel %vm640_vm1, %v4359_v46, 0.0 }
0x11a4   :  { %2367 = vadd.xlane.f32.xlu0 %v2366_v48 }
0x11c9   :  { %v2431_v27 = vpop.xlane.xlu2 %2430 }
0x11ca   :  { %4360 = vrcp.f32 %v2431_v27 }
0x11d0   :  { %v4361_v34 = vpop.eup %4360 }
0x11d1   :  { %v2433_v22 = vmul.f32 %v4361_v34, %v4355_v38  ;;  %v2530_v31 = vpop.xlane.xlu1 %2529  ;;  %v2580_v52 = vpop.permute.xlu2 %2579 }
0x11d2   :  { %4362 = vrcp.f32 %v2530_v31 }
0x11d3   :  { %3832 = vmatmul.msk.f32.vlgmr.msrb.gmra.mxu3 %vm640_vm1, %v2433_v22 }
0x11d8   :  { %v4363_v49 = vpop.eup %4362 }
0x11d9   :  { %v2532_v51 = vmul.f32 %v4363_v49, %v4357_v39  ;;  %v3901_v49 = vld [vmem:[#allocation23 + $0x70] sm:$0xf] }
0x11e9   :  { %v2534_v43 = vpop.permute.xlu1 %2533 }
0x11ea   :  { %2554 = vmatpush.msra.mxu3 %v2534_v43  ;;  %v4209_v43 = vld [vmem:[#allocation23 + $0x74] sm:$0xf] }
0x11eb   :  { %3837 = vmatmul.msk.f32.vlgmr.msra.gmra.mxu3 %vm640_vm1, %v2532_v51  ;;  %v4210_v51 = vld [vmem:[#allocation23 + $0x74] sm:$0xf0] }
0x11ec   :  { %3839 = vmatpush.xpose.msk.msrb.mxu3 %vm613_vm0, %v2580_v52  ;;  %v3902_v52 = vor.u32 %v4210_v51, %v3901_v49  ;;  %v4217_v49 = vld [vmem:[#allocation25 + $0x30] sm:$0xff] }
0x11ed   :  { %v4225_v51 = vld [vmem:[#allocation25 + $0x70] sm:$0xff] }
0x11ee   :  { %2823 = vmatpush.bf16.msrb.mxu2 %v3902_v52 }
0x11f3   :  { %3840 = vmatmul.msk.f32.vlgmr.msrb.gmra.mxu3 %vm613_vm0, %v2578_v42 }
0x1214   :  { %v2269_v53 = vpop.xlane.xlu1 %2268 }
0x1215   :  { %v2270_v54 = vsub.f32 %v2264_v26, %v2269_v53  ;;  %v3903_v53 = vld [vmem:[#allocation23 + $0x78] sm:$0xf0] }
0x1217   :  { %v2271_v56 = vmul.f32 1.442695, %v2270_v54  ;;  %v2368_v5 = vpop.xlane.xlu0 %2367  ;;  %v3906_v54 = vor.u32 %v4209_v43, %v3903_v53  ;;  %v4216_v53 = vld [vmem:[#allocation25 + $0x28] sm:$0xff] }
0x1219   :  { %4364 = vpow2.f32 %v2271_v56  ;;  %2837 = vmatpush.bf16.msra.mxu3 %v3906_v54  ;;  %v4224_v54 = vld [vmem:[#allocation25 + $0x68] sm:$0xff] }
0x121f   :  { %v4365_v57 = vpop.eup %4364 }
0x1220   :  { %v2273_v59 = vsel %vm640_vm1, %v4365_v57, 0.0 }
0x1221   :  { %2274 = vadd.xlane.f32.xlu1 %v2273_v59 }
0x123a   :  { %2278 = vrot.lane.b32.xlu1 %v5287_v8, %s4823_s3 }
0x1256   :  { %v2458_v60 = vpop.f32.mrf.mxu3 }
0x1257   :  { %v2461_v12 = vpack.c.bf16 %v2458_v60, %v2458_v60 }
0x126e   :  { %v2556_v17 = vpop.f32.mrf.mxu3 }
0x126f   :  { %v2559_v58 = vpack.c.bf16 %v2556_v17, %v2556_v17  ;;  %v4208_v17 = vld [vmem:[#allocation23 + $0x64] sm:$0xf0] }
0x1271   :  { %3838 = vmatmul.msk.bf16.vlgmr.msra.gmra.mxu2 %vm613_vm0, %v2559_v58  ;;  %v4207_v58 = vld [vmem:[#allocation23 + $0x64] sm:$0xf] }
0x1276   :  { %v2602_v1 = vpop.f32.mrf.mxu3 }
0x1277   :  { %v2605_v2 = vsel %vm640_vm1, %v2602_v1, -inf }
0x1278   :  { %2606 = vmax.xlane.f32.xlu2 %v2605_v2  ;;  %v3895_v2 = vld [vmem:[#allocation23 + $0x68] sm:$0xf0] }
0x1290   :  { %2616 = vrot.lane.b32.xlu2 %v5365_v25, %s4823_s3 }
0x1294   :  { %v2275_v4 = vpop.xlane.xlu1 %2274 }
0x1295   :  { %4366 = vrcp.f32 %v2275_v4  ;;  %v3898_v4 = vor.u32 %v4207_v58, %v3895_v2 }
0x1296   :  { %4368 = vrcp.f32 %v2368_v5  ;;  %v3885_v5 = vld [vmem:[#allocation23 + $0x50] sm:$0xf] }
0x1297   :  { %2838 = vmatpush.bf16.msra.mxu3 %v3898_v4 }
0x129b   :  { %v4367_v7 = vpop.eup %4366 }
0x129c   :  { %v2277_v9 = vmul.f32 %v4367_v7, %v4365_v57  ;;  %v4369_v8 = vpop.eup %4368  ;;  %v4206_v7 = vld [vmem:[#allocation23 + $0x54] sm:$0xf0] }
0x129d   :  { %v2370_v11 = vmul.f32 %v4369_v8, %v4359_v46  ;;  %v3887_v8 = vld [vmem:[#allocation23 + $0x58] sm:$0xf0] }
0x12ac   :  { %v2279_v10 = vpop.permute.xlu1 %2278 }
0x12ad   :  { %2299 = vmatpush.msra.mxu0 %v2279_v10  ;;  %v3886_v10 = vor.u32 %v4206_v7, %v3885_v5 }
0x12ae   :  { %3817 = vmatmul.msk.f32.vlgmr.msra.gmra.mxu0 %vm640_vm1, %v2277_v9  ;;  %v4205_v9 = vld [vmem:[#allocation23 + $0x54] sm:$0xf] }
0x12af   :  { %2389 = vmatpush.msrb.mxu0 %v5365_v25 }
0x12b1   :  { %2471 = vmatpush.bf16.msra.mxu0 %v5338_v55 }
0x12b5   :  { %2472 = vmatpush.bf16.msra.mxu0 %v5350_v3  ;;  %v4193_v3 = vld [vmem:[#allocation22 + $0x30] sm:$0xff] }
0x12b6   :  { %3829 = vmatmul.msk.f32.vlgmr.msrb.gmra.mxu0 %vm640_vm1, %v2370_v11  ;;  %2327 = vmatpush.bf16.msra.mxu1 %v4193_v3 }
0x12ba   :  { %2487 = vmatpush.bf16.msrb.mxu1 %v5306_v29  ;;  %v4294_v29 = vld [vmem:[%s5477_s17] ss:$0 sm:$0xff] }
0x12be   :  { %3833 = vmatmul.msk.bf16.vlgmr.msra.gmra.mxu0 %vm613_vm0, %v2461_v12  ;;  %2488 = vmatpush.bf16.msrb.mxu1 %v5315_v32  ;;  %v3890_v12 = vor.u32 %v4205_v9, %v3887_v8  ;;  %v4295_v9 = vld [vmem:[%s5478_s18] ss:$0 sm:$0xff] }
0x12c0   :  { %2839 = vmatpush.bf16.msra.mxu3 %v3890_v12 }
0x12eb   :  { %v2607_v63 = vpop.xlane.xlu2 %2606 }
0x12ec   :  { %v2608_v14 = vsub.f32 %v2602_v1, %v2607_v63  ;;  %v4204_v63 = vld [vmem:[#allocation23 + $0x44] sm:$0xf0] }
0x12ee   :  { %v2609_v16 = vmul.f32 1.442695, %v2608_v14  ;;  %v4203_v14 = vld [vmem:[#allocation23 + $0x44] sm:$0xf] }
0x12f0   :  { %4370 = vpow2.f32 %v2609_v16 }
0x12f3   :  { %v2617_v18 = vpop.permute.xlu2 %2616 }
0x12f4   :  { %v2572_v19 = vpop.f32.mrf.mxu2  ;;  %2637 = vmatpush.msrb.mxu0 %v2617_v18 }
0x12f6   :  { %v4371_v20 = vpop.eup %4370 }
0x12f7   :  { %v2611_v55 = vsel %vm640_vm1, %v4371_v20, 0.0 }
0x12f8   :  { %2612 = vadd.xlane.f32.xlu0 %v2611_v55  ;;  %v3869_v55 = vld [vmem:[#allocation23 + $0x30] sm:$0xf] }
0x12fc   :  { %v2574_v21 = vpop.f32.mrf.mxu2 }
0x12fd   :  { %v4202_v21 = vld [vmem:[#allocation23 + $0x34] sm:$0xf0] }
0x132b   :  { %v2301_v25 = vpop.f32.mrf.mxu0 }
0x132c   :  { %v2304_v26 = vpack.c.bf16 %v2301_v25, %v2301_v25 }
0x132e   :  { %3826 = vmatmul.msk.bf16.vlgmr.msra.gmra.mxu1 %vm613_vm0, %v2304_v26  ;;  %v3870_v26 = vor.u32 %v4202_v21, %v3869_v55  ;;  %v4221_v55 = vld [vmem:[#allocation25 + $0x50] sm:$0xff]  ;;  %v4220_v21 = vld [vmem:[#allocation25 + $0x48] sm:$0xff] }
0x132f   :  { %2652 = vmatpush.bf16.msra.mxu1 %v4194_v13  ;;  %v3877_v13 = vld [vmem:[#allocation23 + $0x40] sm:$0xf] }
0x1330   :  { %v3878_v18 = vor.u32 %v4204_v63, %v3877_v13  ;;  %v4296_v13 = vld [vmem:[%s5479_s19] ss:$0 sm:$0xff] }
0x1333   :  { %v2391_v28 = vpop.f32.mrf.mxu0  ;;  %2653 = vmatpush.bf16.msra.mxu1 %v4193_v3  ;;  %v4201_v3 = vld [vmem:[#allocation23 + $0x34] sm:$0xf] }
0x1334   :  { %v2394_v33 = vpack.c.bf16 %v2391_v28, %v2391_v28  ;;  %v3871_v28 = vld [vmem:[#allocation23 + $0x38] sm:$0xf0] }
0x133b   :  { %v2474_v30 = vpop.f32.mrf.mxu0 }
0x133e   :  { %3834 = vmatmul.msk.bf16.vlgmr.msrb.gmra.mxu1 %vm613_vm0, %v2394_v33  ;;  %v3861_v33 = vld [vmem:[#allocation23 + $0x20] sm:$0xf] }
0x1343   :  { %v2476_v35 = vpop.f32.mrf.mxu0 }
0x1344   :  { %v4200_v35 = vld [vmem:[#allocation23 + $0x24] sm:$0xf0] }
0x136b   :  { %v2613_v37 = vpop.xlane.xlu0 %2612 }
0x136c   :  { %4372 = vrcp.f32 %v2613_v37  ;;  %v4199_v37 = vld [vmem:[#allocation23 + $0x24] sm:$0xf] }
0x1372   :  { %v4373_v36 = vpop.eup %4372 }
0x1373   :  { %v2615_v0 = vmul.f32 %v4373_v36, %v4371_v20  ;;  %v3862_v36 = vor.u32 %v4200_v35, %v3861_v33 }
0x1375   :  { %3841 = vmatmul.msk.f32.vlgmr.msrb.gmra.mxu0 %vm640_vm1, %v2615_v0  ;;  %v3863_v0 = vld [vmem:[#allocation23 + $0x28] sm:$0xf0] }
0x13ab   :  { %v2329_v32 = vpop.f32.mrf.mxu1 }
0x13ac   :  { %v2333_v38 = vadd.f32 %v2329_v32, %v5358_v15  ;;  %v3853_v32 = vld [vmem:[#allocation23 + $0x10] sm:$0xf] }
0x13ae   :  { %v2664_v6 = vadd.f32 %v4294_v29, %v2333_v38  ;;  %v4198_v38 = vld [vmem:[#allocation23 + $0x14] sm:$0xf0] }
0x13b0   :  { %v2666_v24 = vadd.f32 %v2664_v6, %v5259_v61  ;;  %v4197_v6 = vld [vmem:[#allocation23 + $0x14] sm:$0xf] }
0x13b2   :  { %2668 = vadd.xlane.f32.xlu0 %v2666_v24 }
0x13b3   :  { %v2331_v39 = vpop.f32.mrf.mxu1 }
0x13b4   :  { %v3855_v39 = vld [vmem:[#allocation23 + $0x18] sm:$0xf0] }
0x13bb   :  { %v2490_v40 = vpop.f32.mrf.mxu1 }
0x13bc   :  { %v2491_v15 = vadd.f32 %v2490_v40, %v2474_v30  ;;  %v3874_v30 = vor.u32 %v4201_v3, %v3871_v28  ;;  %v3845_v40 = vld [vmem:[#allocation23] sm:$0xf] }
0x13bd   :  { %v4211_v3 = vld [vmem:[#allocation25] sm:$0xff] }
0x13be   :  { %v2576_v48 = vadd.f32 %v2572_v19, %v2491_v15  ;;  %v3879_v19 = vld [vmem:[#allocation23 + $0x48] sm:$0xf0] }
0x13bf   :  { %v3882_v20 = vor.u32 %v4203_v14, %v3879_v19  ;;  %v4222_v19 = vld [vmem:[#allocation25 + $0x58] sm:$0xff] }
0x13c1   :  { %2840 = vmatpush.bf16.msra.mxu3 %v3882_v20  ;;  %v4213_v20 = vld [vmem:[#allocation25 + $0x10] sm:$0xff] }
0x13c3   :  { %v2492_v41 = vpop.f32.mrf.mxu1 }
0x13c4   :  { %v4196_v41 = vld [vmem:[#allocation23 + $0x4] sm:$0xf0] }
0x13c5   :  { %2841 = vmatpush.bf16.msra.mxu3 %v3874_v30 }
0x13f2   :  { %v2639_v42 = vpop.f32.mrf.mxu0 }
0x13f3   :  { %v2642_v44 = vpack.c.bf16 %v2639_v42, %v2639_v42  ;;  %v3858_v42 = vor.u32 %v4197_v6, %v3855_v39 }
0x13f5   :  { %3842 = vmatmul.msk.bf16.vlgmr.msra.gmra.mxu1 %vm613_vm0, %v2642_v44  ;;  %v4195_v44 = vld [vmem:[#allocation23 + $0x4] sm:$0xf] }
0x1425   :  { %v2669_v45 = vpop.xlane.xlu0 %2668 }
0x1426   :  { %v2672_v23 = vmul.f32 %v2669_v45, %v5215_v47  ;;  %v3847_v45 = vld [vmem:[#allocation23 + $0x8] sm:$0xf0] }
0x1427   :  { %v3850_v15 = vor.u32 %v4195_v44, %v3847_v45  ;;  %v4297_v44 = vld [vmem:[%s5483_s23] ss:$0 sm:$0xff] }
0x1428   :  { %v5410_v50 = vsub.f32 %v2666_v24, %v2672_v23  ;;  %v3854_v24 = vor.u32 %v4198_v38, %v3853_v32 }
0x142a   :  { %v2676_v46 = vmul.f32 %v5410_v50, %v5410_v50 }
0x142c   :  { %2678 = vadd.xlane.f32.xlu1 %v2676_v46  ;;  %v3846_v46 = vor.u32 %v4196_v41, %v3845_v40 }
0x1472   :  { %v2655_v61 = vpop.f32.mrf.mxu1 }
0x1473   :  { %v2659_v27 = vadd.f32 %v2655_v61, %v2576_v48  ;;  %v4218_v61 = vld [vmem:[#allocation25 + $0x38] sm:$0xff] }
0x1474   :  { %2989 = vmatpush.bf16.msra.mxu0 %v4218_v61 }
0x1475   :  { %v2665_v34 = vadd.f32 %v4294_v29, %v2659_v27  ;;  %v3866_v29 = vor.u32 %v4199_v37, %v3863_v0  ;;  %v4226_v27 = vld [vmem:[#allocation25 + $0x78] sm:$0xff] }
0x1476   :  { %3003 = vmatpush.bf16.msrb.mxu1 %v4226_v27 }
0x1477   :  { %v2667_v22 = vadd.f32 %v2665_v34, %v5261_v62  ;;  %v3893_v62 = vld [vmem:[#allocation23 + $0x60] sm:$0xf]  ;;  %2842 = vmatpush.bf16.msra.mxu3 %v3866_v29 }
0x1478   :  { %v3894_v1 = vor.u32 %v4208_v17, %v3893_v62  ;;  %2990 = vmatpush.bf16.msra.mxu0 %v4217_v49 }
0x1479   :  { %2670 = vadd.xlane.f32.xlu0 %v2667_v22 }
0x147a   :  { %v2657_v31 = vpop.f32.mrf.mxu1  ;;  %2824 = vmatpush.bf16.msrb.mxu2 %v3894_v1  ;;  %3004 = vmatpush.bf16.msrb.mxu1 %v4225_v51 }
0x147b   :  { %2843 = vmatpush.bf16.msra.mxu3 %v3858_v42 }
0x147c   :  { %2991 = vmatpush.bf16.msra.mxu0 %v4216_v53 }
0x147e   :  { %2825 = vmatpush.bf16.msrb.mxu2 %v3886_v10  ;;  %3005 = vmatpush.bf16.msrb.mxu1 %v4224_v54 }
0x147f   :  { %2844 = vmatpush.bf16.msra.mxu3 %v3850_v15 }
0x1482   :  { %2826 = vmatpush.bf16.msrb.mxu2 %v3878_v18 }
0x1486   :  { %2827 = vmatpush.bf16.msrb.mxu2 %v3870_v26  ;;  %v2737_v26 = vld [vmem:[%s5519_s0] sm:$0x3] }
0x1487   :  { %v2739_v33 = vperm.slane %v2737_v26, 0  ;;  %v2740_v35 = vperm.slane %v2737_v26, 1 }
0x148a   :  { %2828 = vmatpush.bf16.msrb.mxu2 %v3862_v36 }
0x148e   :  { %2829 = vmatpush.bf16.msrb.mxu2 %v3854_v24 }
0x1492   :  { %2830 = vmatpush.bf16.msrb.mxu2 %v3846_v46 }
0x149f   :  { %v2679_v11 = vpop.xlane.xlu1 %2678 }
0x14a0   :  { %v2682_v16 = vmul.f32 %v2679_v11, %v5215_v47 }
0x14a2   :  { %v2684_v25 = vadd.f32 1e-05, %v2682_v16 }
0x14a4   :  { %4374 = vrsqrt.f32 %v2684_v25  ;;  %vm2692_vm0 = vweird.f32 %v2684_v25 }
0x14aa   :  { %v4375_v23 = vpop.eup %4374 }
0x14ab   :  { %v2687_v48 = vmul.f32 %v4375_v23, %v2684_v25  ;;  %vm2693_vm15 = vweird.f32 %v4375_v23  ;;  %v4219_v25 = vld [vmem:[#allocation25 + $0x40] sm:$0xff] }
0x14ac   :  { %vm2694_vm1 = vmor %vm2692_vm0, %vm2693_vm15 }
0x14ad   :  { %v2688_v34 = vmul.f32 %v4375_v23, %v2687_v48 }
0x14af   :  { %v2689_v52 = vmul.f32 0.5, %v2688_v34 }
0x14ec   :  { %v2671_v56 = vpop.xlane.xlu0 %2670 }
0x14ed   :  { %v2673_v57 = vmul.f32 %v2671_v56, %v5215_v47  ;;  %v2690_v56 = vsub.f32 1.5, %v2689_v52 }
0x14ef   :  { %v5416_v59 = vsub.f32 %v2667_v22, %v2673_v57  ;;  %v4215_v57 = vld [vmem:[#allocation25 + $0x20] sm:$0xff]  ;;  %v2691_v17 = vmul.f32 %v4375_v23, %v2690_v56 }
0x14f0   :  { %2992 = vmatpush.bf16.msra.mxu0 %v4215_v57 }
0x14f1   :  { %v2677_v60 = vmul.f32 %v5416_v59, %v5416_v59  ;;  %v2695_v2 = vsel %vm2694_vm1, %v4375_v23, %v2691_v17  ;;  %v4255_v17 = vld [vmem:[#allocation26 + $0xe4] sm:$0xf] }
0x14f2   :  { %v2706_v7 = vmul.f32 %v2695_v2, %v5410_v50  ;;  %v4214_v50 = vld [vmem:[#allocation25 + $0x18] sm:$0xff]  ;;  %v4093_v2 = vld [vmem:[#allocation26 + $0xe8] sm:$0xf] }
0x14f3   :  { %2680 = vadd.xlane.f32.xlu0 %v2677_v60  ;;  %v4223_v60 = vld [vmem:[#allocation25 + $0x60] sm:$0xff] }
0x14f4   :  { %3006 = vmatpush.bf16.msrb.mxu1 %v4223_v60  ;;  %v2712_v12 = vmul.f32 %v4295_v9, %v2706_v7  ;;  %2993 = vmatpush.bf16.msra.mxu0 %v4214_v50  ;;  %v4085_v60 = vld [vmem:[#allocation26 + $0xe0] sm:$0xf] }
0x14f6   :  { %v2718_v14 = vadd.f32 %v4296_v13, %v2712_v12  ;;  %v4253_v12 = vld [vmem:[#allocation26 + $0xcc] sm:$0xf0] }
0x14f8   :  { %3007 = vmatpush.bf16.msrb.mxu1 %v4222_v19  ;;  %2994 = vmatpush.bf16.msra.mxu0 %v4213_v20  ;;  %v4252_v20 = vld [vmem:[#allocation26 + $0xcc] sm:$0xf] }
0x14fc   :  { %3008 = vmatpush.bf16.msrb.mxu1 %v4221_v55  ;;  %v4079_v55 = vld [vmem:[#allocation26 + $0xd8] sm:$0xf0] }
0x1500   :  { %3009 = vmatpush.bf16.msrb.mxu1 %v4220_v21  ;;  %v4053_v21 = vld [vmem:[#allocation26 + $0xa0] sm:$0xf] }
0x1504   :  { %3010 = vmatpush.bf16.msrb.mxu1 %v4219_v25  ;;  %v4247_v25 = vld [vmem:[#allocation26 + $0xa4] sm:$0xf] }
0x1566   :  { %v2681_v22 = vpop.xlane.xlu0 %2680 }
0x1567   :  { %v2683_v31 = vmul.f32 %v2681_v22, %v5215_v47 }
0x1569   :  { %v2685_v43 = vadd.f32 1e-05, %v2683_v31 }
0x156b   :  { %4376 = vrsqrt.f32 %v2685_v43  ;;  %vm2702_vm3 = vweird.f32 %v2685_v43 }
0x1571   :  { %v4377_v62 = vpop.eup %4376 }
0x1572   :  { %v2697_v58 = vmul.f32 %v4377_v62, %v2685_v43  ;;  %vm2703_vm2 = vweird.f32 %v4377_v62 }
0x1573   :  { %vm2704_vm4 = vmor %vm2702_vm3, %vm2703_vm2 }
0x1574   :  { %v2698_v1 = vmul.f32 %v4377_v62, %v2697_v58 }
0x1576   :  { %v2699_v4 = vmul.f32 0.5, %v2698_v1  ;;  %v4087_v1 = vld [vmem:[#allocation26 + $0xf0] sm:$0xf0] }
0x1578   :  { %v2700_v5 = vsub.f32 1.5, %v2699_v4  ;;  %v4258_v4 = vld [vmem:[#allocation26 + $0xf4] sm:$0xf0] }
0x1579   :  { %v4094_v7 = vor.u32 %v4258_v4, %v4093_v2  ;;  %v4238_v2 = vld [vmem:[#allocation26 + $0x54] sm:$0xf0] }
0x157a   :  { %v2701_v10 = vmul.f32 %v4377_v62, %v2700_v5  ;;  %v4090_v5 = vor.u32 %v4255_v17, %v4087_v1  ;;  %v4013_v1 = vld [vmem:[#allocation26 + $0x48] sm:$0xf] }
0x157c   :  { %v2705_v8 = vsel %vm2704_vm4, %v4377_v62, %v2701_v10  ;;  %v4257_v62 = vld [vmem:[#allocation26 + $0xec] sm:$0xf0]  ;;  %v4095_v10 = vld [vmem:[#allocation26 + $0xf8] sm:$0xf0]  ;;  %3288 = vmatpush.bf16.msrb.mxu3 %v4090_v5  ;;  %v4014_v5 = vor.u32 %v4238_v2, %v4013_v1 }
0x157d   :  { %v2707_v11 = vmul.f32 %v2705_v8, %v5416_v59  ;;  %v4212_v59 = vld [vmem:[#allocation25 + $0x8] sm:$0xff]  ;;  %v4086_v58 = vor.u32 %v4257_v62, %v4085_v60  ;;  %v4237_v60 = vld [vmem:[#allocation26 + $0x4c] sm:$0xf0]  ;;  %v4235_v62 = vld [vmem:[#allocation26 + $0x44] sm:$0xf] }
0x157e   :  { %2995 = vmatpush.bf16.msra.mxu0 %v4212_v59  ;;  %v4082_v59 = vor.u32 %v4252_v20, %v4079_v55  ;;  %v4232_v20 = vld [vmem:[#allocation26 + $0x2c] sm:$0xf]  ;;  %v3999_v55 = vld [vmem:[#allocation26 + $0x38] sm:$0xf0] }
0x157f   :  { %v2713_v63 = vmul.f32 %v4295_v9, %v2707_v11  ;;  %v4256_v9 = vld [vmem:[#allocation26 + $0xec] sm:$0xf]  ;;  %3274 = vmatpush.bf16.msra.mxu2 %v4086_v58  ;;  %v4069_v11 = vld [vmem:[#allocation26 + $0xc0] sm:$0xf]  ;;  %v4007_v58 = vld [vmem:[#allocation26 + $0x50] sm:$0xf0] }
0x1580   :  { %v4098_v8 = vor.u32 %v4256_v9, %v4095_v10  ;;  %v4010_v4 = vor.u32 %v4235_v62, %v4007_v58  ;;  %v4015_v9 = vld [vmem:[#allocation26 + $0x58] sm:$0xf0] }
0x1581   :  { %v2719_v16 = vadd.f32 %v4296_v13, %v2713_v63  ;;  %v4251_v13 = vld [vmem:[#allocation26 + $0xc4] sm:$0xf]  ;;  %v4070_v63 = vor.u32 %v4253_v12, %v4069_v11  ;;  %v4233_v11 = vld [vmem:[#allocation26 + $0x2c] sm:$0xf0] }
0x1582   :  { %2996 = vmatpush.bf16.msra.mxu0 %v4211_v3  ;;  %3316 = vmatpush.bf16.msra.mxu1 %v4098_v8  ;;  %v4249_v3 = vld [vmem:[#allocation26 + $0xac] sm:$0xf0]  ;;  %v3989_v8 = vld [vmem:[#allocation26 + $0x20] sm:$0xf]  ;;  %v4231_v12 = vld [vmem:[#allocation26 + $0x24] sm:$0xf] }
0x1583   :  { %v2720_v18 = vpack.c.bf16 %v2719_v16, %v2718_v14  ;;  %3275 = vmatpush.bf16.msra.mxu2 %v4070_v63  ;;  %v4054_v26 = vor.u32 %v4249_v3, %v4053_v21  ;;  %v3991_v63 = vld [vmem:[#allocation26 + $0x30] sm:$0xf0]  ;;  %v4002_v3 = vor.u32 %v4232_v20, %v3999_v55 }
0x1585   :  { %2831 = vmatmul.bf16.vlgmr.msrb.gmra.mxu2 %v2720_v18  ;;  %2845 = vmatmul.bf16.vlgmr.msra.gmra.mxu3 %v2720_v18  ;;  %v4254_v18 = vld [vmem:[#allocation26 + $0xd4] sm:$0xf0] }
0x1586   :  { %3302 = vmatpush.bf16.msrb.mxu0 %v4094_v7  ;;  %3317 = vmatpush.bf16.msra.mxu1 %v4082_v59  ;;  %v4236_v7 = vld [vmem:[#allocation26 + $0x4c] sm:$0xf]  ;;  %v3973_v59 = vld [vmem:[#allocation26] sm:$0xf] }
0x1587   :  { %3276 = vmatpush.bf16.msra.mxu2 %v4054_v26  ;;  %v4018_v10 = vor.u32 %v4236_v7, %v4015_v9  ;;  %v4227_v26 = vld [vmem:[#allocation26 + $0x4] sm:$0xf] }
0x1608   :  { %v2832_v28 = vpop.f32.mrf.mxu2  ;;  %v2846_v30 = vpop.f32.mrf.mxu3 }
0x1609   :  { %v2833_v37 = vadd.f32 %v2832_v28, %v2739_v33  ;;  %v2847_v36 = vadd.f32 %v2846_v30, %v2740_v35  ;;  %v4055_v28 = vld [vmem:[#allocation26 + $0xb0] sm:$0xf0]  ;;  %v4061_v30 = vld [vmem:[#allocation26 + $0xa8] sm:$0xf] }
0x160b   :  { %v2851_v6 = vmax.f32 %v2833_v37, 0.0  ;;  %v2852_v24 = vmax.f32 %v2847_v36, 0.0  ;;  %v4248_v36 = vld [vmem:[#allocation26 + $0xac] sm:$0xf] }
0x1610   :  { %v2834_v0 = vpop.f32.mrf.mxu2  ;;  %v2848_v29 = vpop.f32.mrf.mxu3 }
0x1611   :  { %v2835_v32 = vadd.f32 %v2834_v0, %v2739_v33  ;;  %v2849_v38 = vadd.f32 %v2848_v29, %v2740_v35  ;;  %v4250_v33 = vld [vmem:[#allocation26 + $0xb4] sm:$0xf0]  ;;  %v4058_v35 = vor.u32 %v4247_v25, %v4055_v28  ;;  %v4063_v0 = vld [vmem:[#allocation26 + $0xb8] sm:$0xf0]  ;;  %v4229_v25 = vld [vmem:[#allocation26 + $0xc] sm:$0xf0] }
0x1612   :  { %v4062_v37 = vor.u32 %v4250_v33, %v4061_v30  ;;  %v4066_v29 = vor.u32 %v4248_v36, %v4063_v0  ;;  %v3975_v28 = vld [vmem:[#allocation26 + $0x10] sm:$0xf0]  ;;  %v3974_v30 = vor.u32 %v4229_v25, %v3973_v59  ;;  %v4228_v36 = vld [vmem:[#allocation26 + $0xc] sm:$0xf] }
0x1613   :  { %v2853_v39 = vmax.f32 %v2835_v32, 0.0  ;;  %v2854_v40 = vmax.f32 %v2849_v38, 0.0  ;;  %v4037_v32 = vld [vmem:[#allocation26 + $0x80] sm:$0xf]  ;;  %v4245_v38 = vld [vmem:[#allocation26 + $0x8c] sm:$0xf0]  ;;  %v3978_v33 = vor.u32 %v4227_v26, %v3975_v28 }
0x1614   :  { %3318 = vmatpush.bf16.msra.mxu1 %v4066_v29 }
0x1615   :  { %v2855_v41 = vpack.c.bf16 %v2853_v39, %v2851_v6  ;;  %v2856_v42 = vpack.c.bf16 %v2854_v40, %v2852_v24  ;;  %v4243_v6 = vld [vmem:[#allocation26 + $0x84] sm:$0xf]  ;;  %v4038_v24 = vor.u32 %v4245_v38, %v4037_v32  ;;  %v4039_v39 = vld [vmem:[#allocation26 + $0x90] sm:$0xf0]  ;;  %v4045_v40 = vld [vmem:[#allocation26 + $0x88] sm:$0xf] }
0x1616   :  { %v3983_v32 = vld [vmem:[#allocation26 + $0x18] sm:$0xf0] }
0x1617   :  { %2997 = vmatmul.bf16.vlgmr.msra.gmra.mxu0 %v2855_v41  ;;  %3011 = vmatmul.bf16.vlgmr.msrb.gmra.mxu1 %v2856_v42  ;;  %v4246_v41 = vld [vmem:[#allocation26 + $0x94] sm:$0xf0]  ;;  %v4042_v42 = vor.u32 %v4243_v6, %v4039_v39  ;;  %v3986_v38 = vor.u32 %v4228_v36, %v3983_v32 }
0x1618   :  { %3277 = vmatpush.bf16.msra.mxu2 %v4038_v24 }
0x1694   :  { %v2998_v45 = vpop.f32.mrf.mxu0  ;;  %v3012_v23 = vpop.f32.mrf.mxu1 }
0x1695   :  { %v2999_v46 = vadd.f32 %v4297_v44, %v2998_v45  ;;  %v4244_v45 = vld [vmem:[#allocation26 + $0x8c] sm:$0xf] }
0x1697   :  { %v3013_v15 = vadd.f32 %v3012_v23, %v2999_v46  ;;  %v4047_v23 = vld [vmem:[#allocation26 + $0x98] sm:$0xf0] }
0x1698   :  { %v4050_v46 = vor.u32 %v4244_v45, %v4047_v23 }
0x1699   :  { %v3017_v48 = vadd.f32 %v3013_v15, %v2718_v14  ;;  %v4071_v14 = vld [vmem:[#allocation26 + $0xd0] sm:$0xf0]  ;;  %v4021_v15 = vld [vmem:[#allocation26 + $0x60] sm:$0xf] }
0x169a   :  { %v4074_v50 = vor.u32 %v4251_v13, %v4071_v14  ;;  %3319 = vmatpush.bf16.msra.mxu1 %v4050_v46  ;;  %v3990_v13 = vor.u32 %v4233_v11, %v3989_v8  ;;  %v3997_v14 = vld [vmem:[#allocation26 + $0x28] sm:$0xf] }
0x169b   :  { %3019 = vadd.xlane.f32.xlu2 %v3017_v48 }
0x169c   :  { %v3000_v61 = vpop.f32.mrf.mxu0  ;;  %v3014_v34 = vpop.f32.mrf.mxu1  ;;  %3289 = vmatpush.bf16.msrb.mxu3 %v4074_v50  ;;  %v3994_v50 = vor.u32 %v4231_v12, %v3991_v63 }
0x169d   :  { %v3001_v27 = vadd.f32 %v4297_v44, %v3000_v61  ;;  %v4046_v44 = vor.u32 %v4246_v41, %v4045_v40  ;;  %v4239_v61 = vld [vmem:[#allocation26 + $0x64] sm:$0xf] }
0x169f   :  { %v3015_v22 = vadd.f32 %v3014_v34, %v3001_v27  ;;  %v4023_v34 = vld [vmem:[#allocation26 + $0x70] sm:$0xf0] }
0x16a0   :  { %3290 = vmatpush.bf16.msrb.mxu3 %v4058_v35  ;;  %v3981_v35 = vld [vmem:[#allocation26 + $0x8] sm:$0xf] }
0x16a1   :  { %v3018_v31 = vadd.f32 %v3015_v22, %v2719_v16  ;;  %v4077_v16 = vld [vmem:[#allocation26 + $0xc8] sm:$0xf] }
0x16a2   :  { %v4078_v19 = vor.u32 %v4254_v18, %v4077_v16  ;;  %v4029_v22 = vld [vmem:[#allocation26 + $0x68] sm:$0xf]  ;;  %v4234_v16 = vld [vmem:[#allocation26 + $0x34] sm:$0xf0] }
0x16a3   :  { %3021 = vadd.xlane.f32.xlu0 %v3018_v31 }
0x16a4   :  { %3303 = vmatpush.bf16.msrb.mxu0 %v4078_v19  ;;  %3291 = vmatpush.bf16.msrb.mxu3 %v4042_v42  ;;  %v3998_v19 = vor.u32 %v4234_v16, %v3997_v14 }
0x16a8   :  { %3304 = vmatpush.bf16.msrb.mxu0 %v4062_v37  ;;  %v4230_v37 = vld [vmem:[#allocation26 + $0x14] sm:$0xf0] }
0x16a9   :  { %v3982_v29 = vor.u32 %v4230_v37, %v3981_v35 }
0x16ac   :  { %3305 = vmatpush.bf16.msrb.mxu0 %v4046_v44 }
0x170e   :  { %v3020_v49 = vpop.xlane.xlu2 %3019 }
0x170f   :  { %v3023_v51 = vmul.f32 %v3020_v49, %v5215_v47  ;;  %v4026_v49 = vor.u32 %v4239_v61, %v4023_v34 }
0x1711   :  { %v5437_v43 = vsub.f32 %v3017_v48, %v3023_v51  ;;  %v4241_v48 = vld [vmem:[#allocation26 + $0x6c] sm:$0xf0]  ;;  %3292 = vmatpush.bf16.msrb.mxu3 %v4026_v49 }
0x1712   :  { %v4022_v27 = vor.u32 %v4241_v48, %v4021_v15 }
0x1713   :  { %v3027_v52 = vmul.f32 %v5437_v43, %v5437_v43 }
0x1714   :  { %3278 = vmatpush.bf16.msra.mxu2 %v4022_v27 }
0x1715   :  { %3029 = vadd.xlane.f32.xlu0 %v3027_v52  ;;  %v4240_v52 = vld [vmem:[#allocation26 + $0x6c] sm:$0xf]  ;;  %3293 = vmatpush.bf16.msrb.mxu3 %v4010_v4 }
0x1716   :  { %v3022_v53 = vpop.xlane.xlu0 %3021 }
0x1717   :  { %v3024_v54 = vmul.f32 %v3022_v53, %v5215_v47  ;;  %v4031_v53 = vld [vmem:[#allocation26 + $0x78] sm:$0xf0] }
0x1719   :  { %v5442_v56 = vsub.f32 %v3018_v31, %v3024_v54  ;;  %v4242_v31 = vld [vmem:[#allocation26 + $0x74] sm:$0xf0]  ;;  %v4034_v54 = vor.u32 %v4240_v52, %v4031_v53  ;;  %3294 = vmatpush.bf16.msrb.mxu3 %v3994_v50  ;;  %v4299_v53 = vld [vmem:[%s5521_s9] ss:$0 sm:$0xff] }
0x171a   :  { %v4030_v51 = vor.u32 %v4242_v31, %v4029_v22  ;;  %v4298_v22 = vld [vmem:[%s5520_s28] ss:$0 sm:$0xff] }
0x171b   :  { %v3028_v57 = vmul.f32 %v5442_v56, %v5442_v56  ;;  %3320 = vmatpush.bf16.msra.mxu1 %v4034_v54 }
0x171c   :  { %3306 = vmatpush.bf16.msrb.mxu0 %v4030_v51 }
0x171d   :  { %3031 = vadd.xlane.f32.xlu0 %v3028_v57  ;;  %v4005_v57 = vld [vmem:[#allocation26 + $0x40] sm:$0xf]  ;;  %3295 = vmatpush.bf16.msrb.mxu3 %v3978_v33 }
0x171e   :  { %v4006_v17 = vor.u32 %v4237_v60, %v4005_v57 }
0x171f   :  { %3321 = vmatpush.bf16.msra.mxu1 %v4018_v10 }
0x1720   :  { %3279 = vmatpush.bf16.msra.mxu2 %v4006_v17  ;;  %3307 = vmatpush.bf16.msrb.mxu0 %v4014_v5 }
0x1723   :  { %3322 = vmatpush.bf16.msra.mxu1 %v4002_v3 }
0x1724   :  { %3280 = vmatpush.bf16.msra.mxu2 %v3990_v13  ;;  %3308 = vmatpush.bf16.msrb.mxu0 %v3998_v19 }
0x1727   :  { %3323 = vmatpush.bf16.msra.mxu1 %v3986_v38 }
0x1728   :  { %3281 = vmatpush.bf16.msra.mxu2 %v3974_v30  ;;  %3309 = vmatpush.bf16.msrb.mxu0 %v3982_v29 }
0x1788   :  { %v3030_v18 = vpop.xlane.xlu0 %3029 }
0x1789   :  { %v3033_v21 = vmul.f32 %v3030_v18, %v5215_v47 }
0x178b   :  { %v3035_v0 = vadd.f32 1e-05, %v3033_v21 }
0x178d   :  { %4378 = vrsqrt.f32 %v3035_v0  ;;  %vm3043_vm6 = vweird.f32 %v3035_v0 }
0x1790   :  { %v3032_v6 = vpop.xlane.xlu0 %3031 }
0x1791   :  { %v3034_v24 = vmul.f32 %v3032_v6, %v5215_v47 }
0x1793   :  { %v4379_v39 = vpop.eup %4378  ;;  %v3036_v40 = vadd.f32 1e-05, %v3034_v24 }
0x1794   :  { %v3038_v41 = vmul.f32 %v4379_v39, %v3035_v0  ;;  %vm3044_vm5 = vweird.f32 %v4379_v39 }
0x1795   :  { %4380 = vrsqrt.f32 %v3036_v40  ;;  %vm3045_vm7 = vmor %vm3043_vm6, %vm3044_vm5  ;;  %vm3053_vm9 = vweird.f32 %v3036_v40 }
0x1796   :  { %v3039_v42 = vmul.f32 %v4379_v39, %v3038_v41 }
0x1798   :  { %v3040_v44 = vmul.f32 0.5, %v3039_v42 }
0x179a   :  { %v3041_v45 = vsub.f32 1.5, %v3040_v44 }
0x179b   :  { %v4381_v23 = vpop.eup %4380 }
0x179c   :  { %v3042_v46 = vmul.f32 %v4379_v39, %v3041_v45  ;;  %v3048_v15 = vmul.f32 %v4381_v23, %v3036_v40  ;;  %vm3054_vm8 = vweird.f32 %v4381_v23 }
0x179d   :  { %vm3055_vm10 = vmor %vm3053_vm9, %vm3054_vm8 }
0x179e   :  { %v3049_v48 = vmul.f32 %v4381_v23, %v3048_v15  ;;  %v3046_v61 = vsel %vm3045_vm7, %v4379_v39, %v3042_v46 }
0x179f   :  { %v3057_v47 = vmul.f32 %v3046_v61, %v5437_v43  ;;  %v3104_v43 = vld [vmem:[#allocation28] sm:$0xf] }
0x17a0   :  { %v3050_v27 = vmul.f32 0.5, %v3049_v48  ;;  %v3108_v17 = vperm.slane %v3104_v43, 2  ;;  %v3109_v58 = vperm.slane %v3104_v43, 3  ;;  %v3106_v5 = vperm.slane %v3104_v43, 0 }
0x17a1   :  { %v3063_v52 = vmul.f32 %v4298_v22, %v3057_v47  ;;  %v3107_v7 = vperm.slane %v3104_v43, 1 }
0x17a2   :  { %v3051_v34 = vsub.f32 1.5, %v3050_v27 }
0x17a3   :  { %v3069_v57 = vadd.f32 %v4299_v53, %v3063_v52 }
0x17a4   :  { %v3052_v31 = vmul.f32 %v4381_v23, %v3051_v34 }
0x17a6   :  { %v3056_v49 = vsel %vm3055_vm10, %v4381_v23, %v3052_v31 }
0x17a7   :  { %v3058_v51 = vmul.f32 %v3056_v49, %v5442_v56 }
0x17a9   :  { %v3064_v54 = vmul.f32 %v4298_v22, %v3058_v51 }
0x17ab   :  { %v3070_v60 = vadd.f32 %v4299_v53, %v3064_v54 }
0x17ad   :  { %v3071_v62 = vpack.c.bf16 %v3070_v60, %v3069_v57 }
0x17af   :  { %3282 = vmatmul.bf16.vlgmr.msra.gmra.mxu2 %v3071_v62  ;;  %3296 = vmatmul.bf16.vlgmr.msrb.gmra.mxu3 %v3071_v62 }
0x17b0   :  { %3310 = vmatmul.bf16.vlgmr.msrb.gmra.mxu0 %v3071_v62  ;;  %3324 = vmatmul.bf16.vlgmr.msra.gmra.mxu1 %v3071_v62 }
0x182d   :  { %v3311_v1 = vpop.f32.mrf.mxu0  ;;  %v3325_v2 = vpop.f32.mrf.mxu1 }
0x182e   :  { %v3312_v4 = vadd.f32 %v3311_v1, %v3108_v17  ;;  %v3326_v56 = vadd.f32 %v3325_v2, %v3109_v58 }
0x1830   :  { %3332 = vst [vmem:[#allocation29 + $0x10] sm:$0xff] %v3312_v4 }
0x1831   :  { %3333 = vst [vmem:[#allocation29 + $0x18] sm:$0xff] %v3326_v56 }
0x1832   :  { %v3283_v9 = vpop.f32.mrf.mxu2  ;;  %v3297_v10 = vpop.f32.mrf.mxu3 }
0x1833   :  { %v3284_v8 = vadd.f32 %v3283_v9, %v3106_v5  ;;  %v3298_v11 = vadd.f32 %v3297_v10, %v3107_v7 }
0x1835   :  { %3330 = vst [vmem:[#allocation29] sm:$0xff] %v3284_v8  ;;  %v3313_v12 = vpop.f32.mrf.mxu0  ;;  %v3327_v13 = vpop.f32.mrf.mxu1 }
0x1836   :  { %3331 = vst [vmem:[#allocation29 + $0x8] sm:$0xff] %v3298_v11  ;;  %v3314_v63 = vadd.f32 %v3313_v12, %v3108_v17  ;;  %v3328_v14 = vadd.f32 %v3327_v13, %v3109_v58 }
0x1838   :  { %3336 = vst [vmem:[#allocation29 + $0x30] sm:$0xff] %v3314_v63 }
0x1839   :  { %3337 = vst [vmem:[#allocation29 + $0x38] sm:$0xff] %v3328_v14 }
0x183a   :  { %v3285_v16 = vpop.f32.mrf.mxu2  ;;  %v3299_v18 = vpop.f32.mrf.mxu3 }
0x183b   :  { %v3286_v50 = vadd.f32 %v3285_v16, %v3106_v5  ;;  %v3300_v19 = vadd.f32 %v3299_v18, %v3107_v7 }
0x183d   :  { %3334 = vst [vmem:[#allocation29 + $0x20] sm:$0xff] %v3286_v50 }
0x183e   :  { %3335 = vst [vmem:[#allocation29 + $0x28] sm:$0xff] %v3300_v19 }
0x183f   :  { %3350 = dma.vmem_to_hbm [thread:$0]  %s3343_s24, 1024, %s3345_s13, [#allocation7], %s4826_s10, %s4826_s10, %s4823_s3  }
0x1840   :  { %4796 = dma.done.wait [#allocation7], 1024  }
0x1841   :  { %4797 = vsyncadd [#allocation7], 4294966272 }
0x1842   :  { %3355 = vsyncpa [#allocation6], 1 }
0x1843   :  { %3356 = vsyncpa [#allocation9], 1 }
0x1844   :  { %3357 = vsyncpa [#allocation12], 1 }
0x1845   :  { %3358 = vsyncpa [#allocation15], 1 }
0x1846   :  { %3359 = vsyncpa [#allocation18], 1 }
0x1847   :  { %3360 = vsyncpa [#allocation21], 1 }
0x1848   :  { %3361 = vsyncpa [#allocation24], 1 }
0x1849   :  { %3362 = vsyncpa [#allocation27], 1 }
0x184a   :  { %3363 = vsyncpa [#allocation7], 1 }

</bundles_post_ra>
